<compile_context>
chip_gen: v7x
topology: tpu7x:2x2x1
jax: 0.10.0
libtpu: 0.0.40
codegen_flags: <defaults>
</compile_context>

<pallas_src>
import functools

import jax
import jax.numpy as jnp
from jax.experimental import pallas as pl
from jax.experimental.pallas import tpu as pltpu

BN_EPS = 1e-5          # PyTorch BatchNorm3d default eps
LEAKY_SLOPE = 0.01     # PyTorch LeakyReLU default negative_slope


# ---------------------------------------------------------------------------
# Fused kernel: one grid step == Nb samples, fully resident in VMEM.
# ---------------------------------------------------------------------------
def _fused_residual_block_kernel(
    x_ref, m1_ref, m2_ref, ss_ref,          # inputs
    o_ref,                                   # output
    xsh_ref,                                 # scratch: (3, Nb, D+2, H, WC) f32
    *, Nb, D, H, WC, slope,
):
    M = Nb * D * H

    # Zero only the never-overwritten D-halo rows (cheap, and correct even
    # when the parallel grid axis is sharded across TensorCores; see note 5).
    zrow = jnp.zeros((3, Nb, 1, H, WC), jnp.float32)
    xsh_ref[:, :, 0:1, :, :] = zrow
    xsh_ref[:, :, D + 1:D + 2, :, :] = zrow

    def stage_in(a):
        # a: (Nb, D, H, WC) f32.  xsh[kh][n, dp, h] = padded(a)[n, dp, h+kh];
        # the h-halo column is folded into a full-width, lane/sublane-aligned
        # store via a single zero-column concat (one XLU shift per shifted copy).
        zcol = jnp.zeros((Nb, D, 1, WC), jnp.float32)
        xsh_ref[1, :, 1:D + 1, :, :] = a
        xsh_ref[0, :, 1:D + 1, :, :] = jnp.concatenate(
            [zcol, a[:, :, :H - 1, :]], axis=2)
        xsh_ref[2, :, 1:D + 1, :, :] = jnp.concatenate(
            [a[:, :, 1:, :], zcol], axis=2)

    def conv(m_ref):
        # 3x3x3 conv as 9 lane-dense MXU matmuls (bf16 operands, f32 acc),
        # accumulated in vregs — no accumulator scratch traffic.
        acc = None
        for kd in range(3):
            for kh in range(3):
                lhs = xsh_ref[kh, :, kd:kd + D, :, :].reshape(M, WC)
                t = jnp.dot(lhs.astype(jnp.bfloat16), m_ref[kd, kh],
                            preferred_element_type=jnp.float32)
                acc = t if acc is None else acc + t
        return acc                                           # (M, WC) f32

    def leaky(v):
        return jnp.where(v > 0, v, v * slope)

    # ---- stage 1: conv1 + (bias+BN1 folded) + LeakyReLU (dropout = identity)
    stage_in(x_ref[...].astype(jnp.float32))
    h = leaky(conv(m1_ref) * ss_ref[0:1, :] + ss_ref[1:2, :])

    # ---- stage 2: conv2 + (bias+BN2 folded)
    stage_in(h.reshape(Nb, D, H, WC))
    h = conv(m2_ref) * ss_ref[2:3, :] + ss_ref[3:4, :]

    # ---- residual add + final LeakyReLU (reload x: bounded live range)
    out = leaky(x_ref[...].astype(jnp.float32).reshape(M, WC) + h)
    o_ref[...] = out.reshape(Nb, D, H, WC).astype(o_ref.dtype)


# ---------------------------------------------------------------------------
# Glue: banded conv weights + folded BN scale/shift (runs once, outside kernel)
# ---------------------------------------------------------------------------
def _band_weights(w_dhwio, W):
    """(3,3,3,Cin,Cout) DHWIO conv weights -> (3, 3, W*Cin, W*Cout) banded
    matrices: the kw tap and its W-boundary zero padding are folded into the
    lane axis, so one matmul per (kd, kh) realizes the full W x Cin window.
    Built in f32; cast to bf16 happens at the call site."""
    kD, kH, kW, Cin, Cout = w_dhwio.shape
    wi = jnp.arange(W)[:, None]                 # input  w position
    wo = jnp.arange(W)[None, :]                 # output w position
    kw = wi - wo + (kW // 2)                    # tap index (may be out of range)
    valid = (kw >= 0) & (kw < kW)
    band = jnp.take(w_dhwio, jnp.clip(kw, 0, kW - 1), axis=2)   # (kD,kH,W,W,Ci,Co)
    band = jnp.where(valid[None, None, :, :, None, None], band, 0.0)
    band = band.transpose(0, 1, 2, 4, 3, 5)                     # (kD,kH,W,Ci,W,Co)
    return band.reshape(kD, kH, W * Cin, W * Cout)


def _pick_block_n(N):
    """Largest Nb in {4,2,1} dividing N while keeping the parallel grid axis
    length >= 2 (so v7x's two TensorCores both get work).  Falls back to the
    largest divisor otherwise."""
    for nb in (4, 2, 1):
        if N % nb == 0 and N // nb >= 2:
            return nb
    for nb in (4, 2, 1):
        if N % nb == 0:
            return nb
    return 1


def residual_block_forward(x, p, *, block_n=None):
    """x: (N, D, H, W, C) channels-last; returns (N, D, H, W, C)."""
    N, D, H, W, C = x.shape
    Cout = p["w1"].shape[-1]
    assert C == Cout and p["w2"].shape[-1] == Cout, "requires in_channels == out_channels"
    WC = W * C
    assert WC % 128 == 0, "lane-dense design requires W*C to be a multiple of 128"

    Nb = _pick_block_n(N) if block_n is None else block_n
    assert N % Nb == 0

    # Banded weights: build + fold in f32, cast MXU operands to bf16 last.
    m1 = _band_weights(p["w1"], W).astype(jnp.bfloat16)
    m2 = _band_weights(p["w2"], W).astype(jnp.bfloat16)

    # Fold conv bias + eval-mode BatchNorm into per-channel scale/shift,
    # pre-tiled to the lane-dense W*C layout and packed into ONE aligned
    # (8, W*C) array: rows [sc1, sh1, sc2, sh2, 0, 0, 0, 0].
    def bn_fold(bias, gamma, beta, rmean, rvar):
        scale = gamma * jax.lax.rsqrt(rvar + BN_EPS)
        shift = beta + (bias - rmean) * scale
        return jnp.tile(scale, W), jnp.tile(shift, W)

    sc1, sh1 = bn_fold(p["b1"], p["gamma1"], p["beta1"], p["rm1"], p["rv1"])
    sc2, sh2 = bn_fold(p["b2"], p["gamma2"], p["beta2"], p["rm2"], p["rv2"])
    ss = jnp.concatenate(
        [jnp.stack([sc1, sh1, sc2, sh2]), jnp.zeros((4, WC), jnp.float32)], axis=0)

    x4 = x.reshape(N, D, H, WC)

    kernel = functools.partial(_fused_residual_block_kernel,
                               Nb=Nb, D=D, H=H, WC=WC, slope=LEAKY_SLOPE)

    # VMEM budget recomputed from the actual working set (32 MiB floor).
    weight_bytes = 2 * 2 * m1.size * 2                       # 2 tensors, 2 bufs, bf16
    io_bytes = 2 * 2 * Nb * D * H * WC * x.dtype.itemsize    # in + out, double-buffered
    ss_bytes = 2 * ss.size * 4
    scratch_bytes = 3 * Nb * (D + 2) * H * WC * 4
    vmem_limit = int(min(128 * 2**20,
                         max(32 * 2**20,
                             1.5 * (weight_bytes + io_bytes + ss_bytes + scratch_bytes))))

    out4 = pl.pallas_call(
        kernel,
        out_shape=jax.ShapeDtypeStruct((N, D, H, WC), x.dtype),
        grid=(N // Nb,),
        in_specs=[
            pl.BlockSpec((Nb, D, H, WC), lambda n: (n, 0, 0, 0)),
            pl.BlockSpec((3, 3, WC, WC), lambda n: (0, 0, 0, 0)),
            pl.BlockSpec((3, 3, WC, WC), lambda n: (0, 0, 0, 0)),
            pl.BlockSpec((8, WC), lambda n: (0, 0)),
        ],
        out_specs=pl.BlockSpec((Nb, D, H, WC), lambda n: (n, 0, 0, 0)),
        scratch_shapes=[
            pltpu.VMEM((3, Nb, D + 2, H, WC), jnp.float32),   # kh-shifted halo buffers
        ],
        compiler_params=pltpu.CompilerParams(
            dimension_semantics=("parallel",),      # v7x: 2 TCs split the batch axis
            vmem_limit_bytes=vmem_limit,
        ),
    )(x4, m1, m2, ss)

    return out4.reshape(N, D, H, W, Cout)


# ---------------------------------------------------------------------------
# Pure-JAX reference (eval-mode PyTorch semantics) for verification.
# ---------------------------------------------------------------------------
def reference_forward(x, p):
    def leaky(v):
        return jnp.where(v > 0, v, LEAKY_SLOPE * v)

    def bn_eval(v, gamma, beta, rmean, rvar):
        return (v - rmean) * (gamma * jax.lax.rsqrt(rvar + BN_EPS)) + beta

    def conv3d(v, w, b):
        y = jax.lax.conv_general_dilated(
            v, w, window_strides=(1, 1, 1), padding=((1, 1), (1, 1), (1, 1)),
            dimension_numbers=("NDHWC", "DHWIO", "NDHWC"),
            precision=jax.lax.Precision.HIGHEST)
        return y + b

    h = leaky(bn_eval(conv3d(x, p["w1"], p["b1"]),
                      p["gamma1"], p["beta1"], p["rm1"], p["rv1"]))
    # dropout: identity in eval mode
    h = bn_eval(conv3d(h, p["w2"], p["b2"]),
                p["gamma2"], p["beta2"], p["rm2"], p["rv2"])
    return leaky(x + h)


if __name__ == "__main__":
    # Small shapes consistent with the module: dim=3, in==out channels,
    # num_conv=2, kernel 3x3x3, padding (1,1,1).
    N, C, D, H, W = 2, 32, 8, 8, 8

    key = jax.random.PRNGKey(0)
    ks = jax.random.split(key, 13)

    # PyTorch-style NCDHW input, converted once to channels-last NDHWC.
    x_ncdhw = jax.random.normal(ks[0], (N, C, D, H, W), jnp.float32)
    x = jnp.transpose(x_ncdhw, (0, 2, 3, 4, 1))          # (N, D, H, W, C)

    params = {
        # Conv3d weights in DHWIO layout, biases (C,)
        "w1": 0.05 * jax.random.normal(ks[1], (3, 3, 3, C, C), jnp.float32),
        "b1": 0.01 * jax.random.normal(ks[2], (C,), jnp.float32),
        "w2": 0.05 * jax.random.normal(ks[3], (3, 3, 3, C, C), jnp.float32),
        "b2": 0.01 * jax.random.normal(ks[4], (C,), jnp.float32),
        # BatchNorm3d affine + running stats (eval mode)
        "gamma1": 1.0 + 0.1 * jax.random.normal(ks[5], (C,), jnp.float32),
        "beta1": 0.1 * jax.random.normal(ks[6], (C,), jnp.float32),
        "rm1": 0.1 * jax.random.normal(ks[7], (C,), jnp.float32),
        "rv1": 0.5 + jax.random.uniform(ks[8], (C,), jnp.float32),
        "gamma2": 1.0 + 0.1 * jax.random.normal(ks[9], (C,), jnp.float32),
        "beta2": 0.1 * jax.random.normal(ks[10], (C,), jnp.float32),
        "rm2": 0.1 * jax.random.normal(ks[11], (C,), jnp.float32),
        "rv2": 0.5 + jax.random.uniform(ks[12], (C,), jnp.float32),
    }

    out = jax.jit(residual_block_forward)(x, params)
    out = jax.block_until_ready(out)

    ref = reference_forward(x, params)
    assert out.shape == ref.shape
    max_err = float(jnp.max(jnp.abs(out - ref)))
    # Tolerance reflects bf16 MXU operands (f32 accumulation) through two
    # chained 864-term 3x3x3 convolutions.
    assert jnp.allclose(out, ref, atol=5e-2, rtol=5e-2), f"max abs err = {max_err}"

    print("KERNEL_OK")
</pallas_src>

<mosaic_0001>
module attributes {stable_mosaic.version = 11 : i64} {
  func.func @_fused_residual_block_kernel(%arg0: i32, %arg1: memref<1x8x8x256xf32, #tpu.memory_space<vmem>>, %arg2: memref<3x3x256x256xbf16, #tpu.memory_space<vmem>>, %arg3: memref<3x3x256x256xbf16, #tpu.memory_space<vmem>>, %arg4: memref<8x256xf32, #tpu.memory_space<vmem>>, %arg5: memref<1x8x8x256xf32, #tpu.memory_space<vmem>>, %arg6: memref<3x1x10x8x256xf32, #tpu.memory_space<vmem>>) attributes {dimension_semantics = [#tpu.dimension_semantics<parallel>], iteration_bounds = array<i64: 2>, scalar_prefetch = 0 : i64, scratch_operands = 1 : i64, tpu.core_type = #tpu.core_type<tc>, window_params = [{transform_indices = @transform_0, window_bounds = array<i64: 1, 8, 8, 256>}, {pipeline_mode = #tpu.pipeline_mode<synchronous>, transform_indices = @transform_1, window_bounds = array<i64: 3, 3, 256, 256>}, {pipeline_mode = #tpu.pipeline_mode<synchronous>, transform_indices = @transform_2, window_bounds = array<i64: 3, 3, 256, 256>}, {pipeline_mode = #tpu.pipeline_mode<synchronous>, transform_indices = @transform_3, window_bounds = array<i64: 8, 256>}, {transform_indices = @transform_4, window_bounds = array<i64: 1, 8, 8, 256>}]} {
    %cst = arith.constant 0.000000e+00 : f32
    %0 = vector.broadcast %cst : f32 to vector<3x1x1x8x256xf32>
    %c0 = arith.constant 0 : index
    %c0_0 = arith.constant 0 : index
    %c0_1 = arith.constant 0 : index
    %c0_2 = arith.constant 0 : index
    %c0_3 = arith.constant 0 : index
    %1 = vector.load %arg6[%c0, %c0_0, %c0_1, %c0_2, %c0_3] : memref<3x1x10x8x256xf32, #tpu.memory_space<vmem>>, vector<3x1x1x8x256xf32>
    tpu.vector_store %arg6[%c0, %c0_0, %c0_1, %c0_2, %c0_3], %0 {strides = array<i32>} : memref<3x1x10x8x256xf32, #tpu.memory_space<vmem>>, vector<3x1x1x8x256xf32>,
    %c0_4 = arith.constant 0 : index
    %c0_5 = arith.constant 0 : index
    %c9 = arith.constant 9 : index
    %c0_6 = arith.constant 0 : index
    %c0_7 = arith.constant 0 : index
    %2 = vector.load %arg6[%c0_4, %c0_5, %c9, %c0_6, %c0_7] : memref<3x1x10x8x256xf32, #tpu.memory_space<vmem>>, vector<3x1x1x8x256xf32>
    tpu.vector_store %arg6[%c0_4, %c0_5, %c9, %c0_6, %c0_7], %0 {strides = array<i32>} : memref<3x1x10x8x256xf32, #tpu.memory_space<vmem>>, vector<3x1x1x8x256xf32>,
    %c0_8 = arith.constant 0 : index
    %c0_9 = arith.constant 0 : index
    %c0_10 = arith.constant 0 : index
    %c0_11 = arith.constant 0 : index
    %3 = vector.load %arg1[%c0_8, %c0_9, %c0_10, %c0_11] : memref<1x8x8x256xf32, #tpu.memory_space<vmem>>, vector<1x8x8x256xf32>
    %cst_12 = arith.constant 0.000000e+00 : f32
    %4 = vector.broadcast %cst_12 : f32 to vector<1x8x1x256xf32>
    %c1 = arith.constant 1 : index
    %c0_13 = arith.constant 0 : index
    %c1_14 = arith.constant 1 : index
    %c0_15 = arith.constant 0 : index
    %c0_16 = arith.constant 0 : index
    %5 = vector.load %arg6[%c1, %c0_13, %c1_14, %c0_15, %c0_16] : memref<3x1x10x8x256xf32, #tpu.memory_space<vmem>>, vector<1x1x8x8x256xf32>
    %6 = vector.shape_cast %5 : vector<1x1x8x8x256xf32> to vector<1x8x8x256xf32>
    %7 = vector.shape_cast %3 : vector<1x8x8x256xf32> to vector<1x1x8x8x256xf32>
    tpu.vector_store %arg6[%c1, %c0_13, %c1_14, %c0_15, %c0_16], %7 {strides = array<i32>} : memref<3x1x10x8x256xf32, #tpu.memory_space<vmem>>, vector<1x1x8x8x256xf32>,
    %8 = vector.extract_strided_slice %3 {offsets = [0, 0, 0, 0], sizes = [1, 8, 7, 256], strides = [1, 1, 1, 1]} : vector<1x8x8x256xf32> to vector<1x8x7x256xf32>
    %9 = tpu.concatenate %4, %8 in 2 : vector<1x8x1x256xf32>, vector<1x8x7x256xf32> -> vector<1x8x8x256xf32>
    %c0_17 = arith.constant 0 : index
    %c0_18 = arith.constant 0 : index
    %c1_19 = arith.constant 1 : index
    %c0_20 = arith.constant 0 : index
    %c0_21 = arith.constant 0 : index
    %10 = vector.load %arg6[%c0_17, %c0_18, %c1_19, %c0_20, %c0_21] : memref<3x1x10x8x256xf32, #tpu.memory_space<vmem>>, vector<1x1x8x8x256xf32>
    %11 = vector.shape_cast %10 : vector<1x1x8x8x256xf32> to vector<1x8x8x256xf32>
    %12 = vector.shape_cast %9 : vector<1x8x8x256xf32> to vector<1x1x8x8x256xf32>
    tpu.vector_store %arg6[%c0_17, %c0_18, %c1_19, %c0_20, %c0_21], %12 {strides = array<i32>} : memref<3x1x10x8x256xf32, #tpu.memory_space<vmem>>, vector<1x1x8x8x256xf32>,
    %13 = vector.extract_strided_slice %3 {offsets = [0, 0, 1, 0], sizes = [1, 8, 7, 256], strides = [1, 1, 1, 1]} : vector<1x8x8x256xf32> to vector<1x8x7x256xf32>
    %14 = tpu.concatenate %13, %4 in 2 : vector<1x8x7x256xf32>, vector<1x8x1x256xf32> -> vector<1x8x8x256xf32>
    %c2 = arith.constant 2 : index
    %c0_22 = arith.constant 0 : index
    %c1_23 = arith.constant 1 : index
    %c0_24 = arith.constant 0 : index
    %c0_25 = arith.constant 0 : index
    %15 = vector.load %arg6[%c2, %c0_22, %c1_23, %c0_24, %c0_25] : memref<3x1x10x8x256xf32, #tpu.memory_space<vmem>>, vector<1x1x8x8x256xf32>
    %16 = vector.shape_cast %15 : vector<1x1x8x8x256xf32> to vector<1x8x8x256xf32>
    %17 = vector.shape_cast %14 : vector<1x8x8x256xf32> to vector<1x1x8x8x256xf32>
    tpu.vector_store %arg6[%c2, %c0_22, %c1_23, %c0_24, %c0_25], %17 {strides = array<i32>} : memref<3x1x10x8x256xf32, #tpu.memory_space<vmem>>, vector<1x1x8x8x256xf32>,
    %c0_26 = arith.constant 0 : index
    %c0_27 = arith.constant 0 : index
    %c0_28 = arith.constant 0 : index
    %c0_29 = arith.constant 0 : index
    %c0_30 = arith.constant 0 : index
    %18 = vector.load %arg6[%c0_26, %c0_27, %c0_28, %c0_29, %c0_30] : memref<3x1x10x8x256xf32, #tpu.memory_space<vmem>>, vector<1x1x8x8x256xf32>
    %19 = vector.shape_cast %18 : vector<1x1x8x8x256xf32> to vector<1x8x8x256xf32>
    %20 = vector.shape_cast %19 : vector<1x8x8x256xf32> to vector<64x256xf32>
    %21 = arith.truncf %20 : vector<64x256xf32> to vector<64x256xbf16>
    %c0_31 = arith.constant 0 : index
    %c0_32 = arith.constant 0 : index
    %c0_33 = arith.constant 0 : index
    %c0_34 = arith.constant 0 : index
    %22 = vector.load %arg2[%c0_31, %c0_32, %c0_33, %c0_34] : memref<3x3x256x256xbf16, #tpu.memory_space<vmem>>, vector<1x1x256x256xbf16>
    %23 = vector.shape_cast %22 : vector<1x1x256x256xbf16> to vector<256x256xbf16>
    %cst_35 = arith.constant dense<0.000000e+00> : vector<64x256xf32>
    %24 = tpu.matmul %21, %23, %cst_35 {dimension_numbers = #tpu.dot_dimension_numbers<[1], [0], [0], [1], [0, 0, 1, 1], [], []>} : vector<64x256xbf16>, vector<256x256xbf16>, vector<64x256xf32> -> vector<64x256xf32>
    %c1_36 = arith.constant 1 : index
    %c0_37 = arith.constant 0 : index
    %c0_38 = arith.constant 0 : index
    %c0_39 = arith.constant 0 : index
    %c0_40 = arith.constant 0 : index
    %25 = vector.load %arg6[%c1_36, %c0_37, %c0_38, %c0_39, %c0_40] : memref<3x1x10x8x256xf32, #tpu.memory_space<vmem>>, vector<1x1x8x8x256xf32>
    %26 = vector.shape_cast %25 : vector<1x1x8x8x256xf32> to vector<1x8x8x256xf32>
    %27 = vector.shape_cast %26 : vector<1x8x8x256xf32> to vector<64x256xf32>
    %28 = arith.truncf %27 : vector<64x256xf32> to vector<64x256xbf16>
    %c0_41 = arith.constant 0 : index
    %c1_42 = arith.constant 1 : index
    %c0_43 = arith.constant 0 : index
    %c0_44 = arith.constant 0 : index
    %29 = vector.load %arg2[%c0_41, %c1_42, %c0_43, %c0_44] : memref<3x3x256x256xbf16, #tpu.memory_space<vmem>>, vector<1x1x256x256xbf16>
    %30 = vector.shape_cast %29 : vector<1x1x256x256xbf16> to vector<256x256xbf16>
    %cst_45 = arith.constant dense<0.000000e+00> : vector<64x256xf32>
    %31 = tpu.matmul %28, %30, %cst_45 {dimension_numbers = #tpu.dot_dimension_numbers<[1], [0], [0], [1], [0, 0, 1, 1], [], []>} : vector<64x256xbf16>, vector<256x256xbf16>, vector<64x256xf32> -> vector<64x256xf32>
    %32 = arith.addf %24, %31 : vector<64x256xf32>
    %c2_46 = arith.constant 2 : index
    %c0_47 = arith.constant 0 : index
    %c0_48 = arith.constant 0 : index
    %c0_49 = arith.constant 0 : index
    %c0_50 = arith.constant 0 : index
    %33 = vector.load %arg6[%c2_46, %c0_47, %c0_48, %c0_49, %c0_50] : memref<3x1x10x8x256xf32, #tpu.memory_space<vmem>>, vector<1x1x8x8x256xf32>
    %34 = vector.shape_cast %33 : vector<1x1x8x8x256xf32> to vector<1x8x8x256xf32>
    %35 = vector.shape_cast %34 : vector<1x8x8x256xf32> to vector<64x256xf32>
    %36 = arith.truncf %35 : vector<64x256xf32> to vector<64x256xbf16>
    %c0_51 = arith.constant 0 : index
    %c2_52 = arith.constant 2 : index
    %c0_53 = arith.constant 0 : index
    %c0_54 = arith.constant 0 : index
    %37 = vector.load %arg2[%c0_51, %c2_52, %c0_53, %c0_54] : memref<3x3x256x256xbf16, #tpu.memory_space<vmem>>, vector<1x1x256x256xbf16>
    %38 = vector.shape_cast %37 : vector<1x1x256x256xbf16> to vector<256x256xbf16>
    %cst_55 = arith.constant dense<0.000000e+00> : vector<64x256xf32>
    %39 = tpu.matmul %36, %38, %cst_55 {dimension_numbers = #tpu.dot_dimension_numbers<[1], [0], [0], [1], [0, 0, 1, 1], [], []>} : vector<64x256xbf16>, vector<256x256xbf16>, vector<64x256xf32> -> vector<64x256xf32>
    %40 = arith.addf %32, %39 : vector<64x256xf32>
    %c0_56 = arith.constant 0 : index
    %c0_57 = arith.constant 0 : index
    %c1_58 = arith.constant 1 : index
    %c0_59 = arith.constant 0 : index
    %c0_60 = arith.constant 0 : index
    %41 = vector.load %arg6[%c0_56, %c0_57, %c1_58, %c0_59, %c0_60] : memref<3x1x10x8x256xf32, #tpu.memory_space<vmem>>, vector<1x1x8x8x256xf32>
    %42 = vector.shape_cast %41 : vector<1x1x8x8x256xf32> to vector<1x8x8x256xf32>
    %43 = vector.shape_cast %42 : vector<1x8x8x256xf32> to vector<64x256xf32>
    %44 = arith.truncf %43 : vector<64x256xf32> to vector<64x256xbf16>
    %c1_61 = arith.constant 1 : index
    %c0_62 = arith.constant 0 : index
    %c0_63 = arith.constant 0 : index
    %c0_64 = arith.constant 0 : index
    %45 = vector.load %arg2[%c1_61, %c0_62, %c0_63, %c0_64] : memref<3x3x256x256xbf16, #tpu.memory_space<vmem>>, vector<1x1x256x256xbf16>
    %46 = vector.shape_cast %45 : vector<1x1x256x256xbf16> to vector<256x256xbf16>
    %cst_65 = arith.constant dense<0.000000e+00> : vector<64x256xf32>
    %47 = tpu.matmul %44, %46, %cst_65 {dimension_numbers = #tpu.dot_dimension_numbers<[1], [0], [0], [1], [0, 0, 1, 1], [], []>} : vector<64x256xbf16>, vector<256x256xbf16>, vector<64x256xf32> -> vector<64x256xf32>
    %48 = arith.addf %40, %47 : vector<64x256xf32>
    %c1_66 = arith.constant 1 : index
    %c0_67 = arith.constant 0 : index
    %c1_68 = arith.constant 1 : index
    %c0_69 = arith.constant 0 : index
    %c0_70 = arith.constant 0 : index
    %49 = vector.load %arg6[%c1_66, %c0_67, %c1_68, %c0_69, %c0_70] : memref<3x1x10x8x256xf32, #tpu.memory_space<vmem>>, vector<1x1x8x8x256xf32>
    %50 = vector.shape_cast %49 : vector<1x1x8x8x256xf32> to vector<1x8x8x256xf32>
    %51 = vector.shape_cast %50 : vector<1x8x8x256xf32> to vector<64x256xf32>
    %52 = arith.truncf %51 : vector<64x256xf32> to vector<64x256xbf16>
    %c1_71 = arith.constant 1 : index
    %c1_72 = arith.constant 1 : index
    %c0_73 = arith.constant 0 : index
    %c0_74 = arith.constant 0 : index
    %53 = vector.load %arg2[%c1_71, %c1_72, %c0_73, %c0_74] : memref<3x3x256x256xbf16, #tpu.memory_space<vmem>>, vector<1x1x256x256xbf16>
    %54 = vector.shape_cast %53 : vector<1x1x256x256xbf16> to vector<256x256xbf16>
    %cst_75 = arith.constant dense<0.000000e+00> : vector<64x256xf32>
    %55 = tpu.matmul %52, %54, %cst_75 {dimension_numbers = #tpu.dot_dimension_numbers<[1], [0], [0], [1], [0, 0, 1, 1], [], []>} : vector<64x256xbf16>, vector<256x256xbf16>, vector<64x256xf32> -> vector<64x256xf32>
    %56 = arith.addf %48, %55 : vector<64x256xf32>
    %c2_76 = arith.constant 2 : index
    %c0_77 = arith.constant 0 : index
    %c1_78 = arith.constant 1 : index
    %c0_79 = arith.constant 0 : index
    %c0_80 = arith.constant 0 : index
    %57 = vector.load %arg6[%c2_76, %c0_77, %c1_78, %c0_79, %c0_80] : memref<3x1x10x8x256xf32, #tpu.memory_space<vmem>>, vector<1x1x8x8x256xf32>
    %58 = vector.shape_cast %57 : vector<1x1x8x8x256xf32> to vector<1x8x8x256xf32>
    %59 = vector.shape_cast %58 : vector<1x8x8x256xf32> to vector<64x256xf32>
    %60 = arith.truncf %59 : vector<64x256xf32> to vector<64x256xbf16>
    %c1_81 = arith.constant 1 : index
    %c2_82 = arith.constant 2 : index
    %c0_83 = arith.constant 0 : index
    %c0_84 = arith.constant 0 : index
    %61 = vector.load %arg2[%c1_81, %c2_82, %c0_83, %c0_84] : memref<3x3x256x256xbf16, #tpu.memory_space<vmem>>, vector<1x1x256x256xbf16>
    %62 = vector.shape_cast %61 : vector<1x1x256x256xbf16> to vector<256x256xbf16>
    %cst_85 = arith.constant dense<0.000000e+00> : vector<64x256xf32>
    %63 = tpu.matmul %60, %62, %cst_85 {dimension_numbers = #tpu.dot_dimension_numbers<[1], [0], [0], [1], [0, 0, 1, 1], [], []>} : vector<64x256xbf16>, vector<256x256xbf16>, vector<64x256xf32> -> vector<64x256xf32>
    %64 = arith.addf %56, %63 : vector<64x256xf32>
    %c0_86 = arith.constant 0 : index
    %c0_87 = arith.constant 0 : index
    %c2_88 = arith.constant 2 : index
    %c0_89 = arith.constant 0 : index
    %c0_90 = arith.constant 0 : index
    %65 = vector.load %arg6[%c0_86, %c0_87, %c2_88, %c0_89, %c0_90] : memref<3x1x10x8x256xf32, #tpu.memory_space<vmem>>, vector<1x1x8x8x256xf32>
    %66 = vector.shape_cast %65 : vector<1x1x8x8x256xf32> to vector<1x8x8x256xf32>
    %67 = vector.shape_cast %66 : vector<1x8x8x256xf32> to vector<64x256xf32>
    %68 = arith.truncf %67 : vector<64x256xf32> to vector<64x256xbf16>
    %c2_91 = arith.constant 2 : index
    %c0_92 = arith.constant 0 : index
    %c0_93 = arith.constant 0 : index
    %c0_94 = arith.constant 0 : index
    %69 = vector.load %arg2[%c2_91, %c0_92, %c0_93, %c0_94] : memref<3x3x256x256xbf16, #tpu.memory_space<vmem>>, vector<1x1x256x256xbf16>
    %70 = vector.shape_cast %69 : vector<1x1x256x256xbf16> to vector<256x256xbf16>
    %cst_95 = arith.constant dense<0.000000e+00> : vector<64x256xf32>
    %71 = tpu.matmul %68, %70, %cst_95 {dimension_numbers = #tpu.dot_dimension_numbers<[1], [0], [0], [1], [0, 0, 1, 1], [], []>} : vector<64x256xbf16>, vector<256x256xbf16>, vector<64x256xf32> -> vector<64x256xf32>
    %72 = arith.addf %64, %71 : vector<64x256xf32>
    %c1_96 = arith.constant 1 : index
    %c0_97 = arith.constant 0 : index
    %c2_98 = arith.constant 2 : index
    %c0_99 = arith.constant 0 : index
    %c0_100 = arith.constant 0 : index
    %73 = vector.load %arg6[%c1_96, %c0_97, %c2_98, %c0_99, %c0_100] : memref<3x1x10x8x256xf32, #tpu.memory_space<vmem>>, vector<1x1x8x8x256xf32>
    %74 = vector.shape_cast %73 : vector<1x1x8x8x256xf32> to vector<1x8x8x256xf32>
    %75 = vector.shape_cast %74 : vector<1x8x8x256xf32> to vector<64x256xf32>
    %76 = arith.truncf %75 : vector<64x256xf32> to vector<64x256xbf16>
    %c2_101 = arith.constant 2 : index
    %c1_102 = arith.constant 1 : index
    %c0_103 = arith.constant 0 : index
    %c0_104 = arith.constant 0 : index
    %77 = vector.load %arg2[%c2_101, %c1_102, %c0_103, %c0_104] : memref<3x3x256x256xbf16, #tpu.memory_space<vmem>>, vector<1x1x256x256xbf16>
    %78 = vector.shape_cast %77 : vector<1x1x256x256xbf16> to vector<256x256xbf16>
    %cst_105 = arith.constant dense<0.000000e+00> : vector<64x256xf32>
    %79 = tpu.matmul %76, %78, %cst_105 {dimension_numbers = #tpu.dot_dimension_numbers<[1], [0], [0], [1], [0, 0, 1, 1], [], []>} : vector<64x256xbf16>, vector<256x256xbf16>, vector<64x256xf32> -> vector<64x256xf32>
    %80 = arith.addf %72, %79 : vector<64x256xf32>
    %c2_106 = arith.constant 2 : index
    %c0_107 = arith.constant 0 : index
    %c2_108 = arith.constant 2 : index
    %c0_109 = arith.constant 0 : index
    %c0_110 = arith.constant 0 : index
    %81 = vector.load %arg6[%c2_106, %c0_107, %c2_108, %c0_109, %c0_110] : memref<3x1x10x8x256xf32, #tpu.memory_space<vmem>>, vector<1x1x8x8x256xf32>
    %82 = vector.shape_cast %81 : vector<1x1x8x8x256xf32> to vector<1x8x8x256xf32>
    %83 = vector.shape_cast %82 : vector<1x8x8x256xf32> to vector<64x256xf32>
    %84 = arith.truncf %83 : vector<64x256xf32> to vector<64x256xbf16>
    %c2_111 = arith.constant 2 : index
    %c2_112 = arith.constant 2 : index
    %c0_113 = arith.constant 0 : index
    %c0_114 = arith.constant 0 : index
    %85 = vector.load %arg2[%c2_111, %c2_112, %c0_113, %c0_114] : memref<3x3x256x256xbf16, #tpu.memory_space<vmem>>, vector<1x1x256x256xbf16>
    %86 = vector.shape_cast %85 : vector<1x1x256x256xbf16> to vector<256x256xbf16>
    %cst_115 = arith.constant dense<0.000000e+00> : vector<64x256xf32>
    %87 = tpu.matmul %84, %86, %cst_115 {dimension_numbers = #tpu.dot_dimension_numbers<[1], [0], [0], [1], [0, 0, 1, 1], [], []>} : vector<64x256xbf16>, vector<256x256xbf16>, vector<64x256xf32> -> vector<64x256xf32>
    %88 = arith.addf %80, %87 : vector<64x256xf32>
    %c0_116 = arith.constant 0 : index
    %c0_117 = arith.constant 0 : index
    %89 = vector.load %arg4[%c0_116, %c0_117] : memref<8x256xf32, #tpu.memory_space<vmem>>, vector<1x256xf32>
    %90 = vector.broadcast %89 : vector<1x256xf32> to vector<64x256xf32>
    %91 = arith.mulf %88, %90 : vector<64x256xf32>
    %c1_118 = arith.constant 1 : index
    %c0_119 = arith.constant 0 : index
    %92 = vector.load %arg4[%c1_118, %c0_119] : memref<8x256xf32, #tpu.memory_space<vmem>>, vector<1x256xf32>
    %93 = vector.broadcast %92 : vector<1x256xf32> to vector<64x256xf32>
    %94 = arith.addf %91, %93 : vector<64x256xf32>
    %cst_120 = arith.constant 0.000000e+00 : f32
    %95 = vector.broadcast %cst_120 : f32 to vector<64x256xf32>
    %96 = arith.cmpf ogt, %94, %95 : vector<64x256xf32>
    %cst_121 = arith.constant 0.00999999977 : f32
    %97 = vector.broadcast %cst_121 : f32 to vector<64x256xf32>
    %98 = arith.mulf %94, %97 : vector<64x256xf32>
    %99 = arith.select %96, %94, %98 : vector<64x256xi1>, vector<64x256xf32>
    %100 = vector.shape_cast %99 : vector<64x256xf32> to vector<1x8x8x256xf32>
    %cst_122 = arith.constant 0.000000e+00 : f32
    %101 = vector.broadcast %cst_122 : f32 to vector<1x8x1x256xf32>
    %c1_123 = arith.constant 1 : index
    %c0_124 = arith.constant 0 : index
    %c1_125 = arith.constant 1 : index
    %c0_126 = arith.constant 0 : index
    %c0_127 = arith.constant 0 : index
    %102 = vector.load %arg6[%c1_123, %c0_124, %c1_125, %c0_126, %c0_127] : memref<3x1x10x8x256xf32, #tpu.memory_space<vmem>>, vector<1x1x8x8x256xf32>
    %103 = vector.shape_cast %102 : vector<1x1x8x8x256xf32> to vector<1x8x8x256xf32>
    %104 = vector.shape_cast %100 : vector<1x8x8x256xf32> to vector<1x1x8x8x256xf32>
    tpu.vector_store %arg6[%c1_123, %c0_124, %c1_125, %c0_126, %c0_127], %104 {strides = array<i32>} : memref<3x1x10x8x256xf32, #tpu.memory_space<vmem>>, vector<1x1x8x8x256xf32>,
    %105 = vector.extract_strided_slice %100 {offsets = [0, 0, 0, 0], sizes = [1, 8, 7, 256], strides = [1, 1, 1, 1]} : vector<1x8x8x256xf32> to vector<1x8x7x256xf32>
    %106 = tpu.concatenate %101, %105 in 2 : vector<1x8x1x256xf32>, vector<1x8x7x256xf32> -> vector<1x8x8x256xf32>
    %c0_128 = arith.constant 0 : index
    %c0_129 = arith.constant 0 : index
    %c1_130 = arith.constant 1 : index
    %c0_131 = arith.constant 0 : index
    %c0_132 = arith.constant 0 : index
    %107 = vector.load %arg6[%c0_128, %c0_129, %c1_130, %c0_131, %c0_132] : memref<3x1x10x8x256xf32, #tpu.memory_space<vmem>>, vector<1x1x8x8x256xf32>
    %108 = vector.shape_cast %107 : vector<1x1x8x8x256xf32> to vector<1x8x8x256xf32>
    %109 = vector.shape_cast %106 : vector<1x8x8x256xf32> to vector<1x1x8x8x256xf32>
    tpu.vector_store %arg6[%c0_128, %c0_129, %c1_130, %c0_131, %c0_132], %109 {strides = array<i32>} : memref<3x1x10x8x256xf32, #tpu.memory_space<vmem>>, vector<1x1x8x8x256xf32>,
    %110 = vector.extract_strided_slice %100 {offsets = [0, 0, 1, 0], sizes = [1, 8, 7, 256], strides = [1, 1, 1, 1]} : vector<1x8x8x256xf32> to vector<1x8x7x256xf32>
    %111 = tpu.concatenate %110, %101 in 2 : vector<1x8x7x256xf32>, vector<1x8x1x256xf32> -> vector<1x8x8x256xf32>
    %c2_133 = arith.constant 2 : index
    %c0_134 = arith.constant 0 : index
    %c1_135 = arith.constant 1 : index
    %c0_136 = arith.constant 0 : index
    %c0_137 = arith.constant 0 : index
    %112 = vector.load %arg6[%c2_133, %c0_134, %c1_135, %c0_136, %c0_137] : memref<3x1x10x8x256xf32, #tpu.memory_space<vmem>>, vector<1x1x8x8x256xf32>
    %113 = vector.shape_cast %112 : vector<1x1x8x8x256xf32> to vector<1x8x8x256xf32>
    %114 = vector.shape_cast %111 : vector<1x8x8x256xf32> to vector<1x1x8x8x256xf32>
    tpu.vector_store %arg6[%c2_133, %c0_134, %c1_135, %c0_136, %c0_137], %114 {strides = array<i32>} : memref<3x1x10x8x256xf32, #tpu.memory_space<vmem>>, vector<1x1x8x8x256xf32>,
    %c0_138 = arith.constant 0 : index
    %c0_139 = arith.constant 0 : index
    %c0_140 = arith.constant 0 : index
    %c0_141 = arith.constant 0 : index
    %c0_142 = arith.constant 0 : index
    %115 = vector.load %arg6[%c0_138, %c0_139, %c0_140, %c0_141, %c0_142] : memref<3x1x10x8x256xf32, #tpu.memory_space<vmem>>, vector<1x1x8x8x256xf32>
    %116 = vector.shape_cast %115 : vector<1x1x8x8x256xf32> to vector<1x8x8x256xf32>
    %117 = vector.shape_cast %116 : vector<1x8x8x256xf32> to vector<64x256xf32>
    %118 = arith.truncf %117 : vector<64x256xf32> to vector<64x256xbf16>
    %c0_143 = arith.constant 0 : index
    %c0_144 = arith.constant 0 : index
    %c0_145 = arith.constant 0 : index
    %c0_146 = arith.constant 0 : index
    %119 = vector.load %arg3[%c0_143, %c0_144, %c0_145, %c0_146] : memref<3x3x256x256xbf16, #tpu.memory_space<vmem>>, vector<1x1x256x256xbf16>
    %120 = vector.shape_cast %119 : vector<1x1x256x256xbf16> to vector<256x256xbf16>
    %cst_147 = arith.constant dense<0.000000e+00> : vector<64x256xf32>
    %121 = tpu.matmul %118, %120, %cst_147 {dimension_numbers = #tpu.dot_dimension_numbers<[1], [0], [0], [1], [0, 0, 1, 1], [], []>} : vector<64x256xbf16>, vector<256x256xbf16>, vector<64x256xf32> -> vector<64x256xf32>
    %c1_148 = arith.constant 1 : index
    %c0_149 = arith.constant 0 : index
    %c0_150 = arith.constant 0 : index
    %c0_151 = arith.constant 0 : index
    %c0_152 = arith.constant 0 : index
    %122 = vector.load %arg6[%c1_148, %c0_149, %c0_150, %c0_151, %c0_152] : memref<3x1x10x8x256xf32, #tpu.memory_space<vmem>>, vector<1x1x8x8x256xf32>
    %123 = vector.shape_cast %122 : vector<1x1x8x8x256xf32> to vector<1x8x8x256xf32>
    %124 = vector.shape_cast %123 : vector<1x8x8x256xf32> to vector<64x256xf32>
    %125 = arith.truncf %124 : vector<64x256xf32> to vector<64x256xbf16>
    %c0_153 = arith.constant 0 : index
    %c1_154 = arith.constant 1 : index
    %c0_155 = arith.constant 0 : index
    %c0_156 = arith.constant 0 : index
    %126 = vector.load %arg3[%c0_153, %c1_154, %c0_155, %c0_156] : memref<3x3x256x256xbf16, #tpu.memory_space<vmem>>, vector<1x1x256x256xbf16>
    %127 = vector.shape_cast %126 : vector<1x1x256x256xbf16> to vector<256x256xbf16>
    %cst_157 = arith.constant dense<0.000000e+00> : vector<64x256xf32>
    %128 = tpu.matmul %125, %127, %cst_157 {dimension_numbers = #tpu.dot_dimension_numbers<[1], [0], [0], [1], [0, 0, 1, 1], [], []>} : vector<64x256xbf16>, vector<256x256xbf16>, vector<64x256xf32> -> vector<64x256xf32>
    %129 = arith.addf %121, %128 : vector<64x256xf32>
    %c2_158 = arith.constant 2 : index
    %c0_159 = arith.constant 0 : index
    %c0_160 = arith.constant 0 : index
    %c0_161 = arith.constant 0 : index
    %c0_162 = arith.constant 0 : index
    %130 = vector.load %arg6[%c2_158, %c0_159, %c0_160, %c0_161, %c0_162] : memref<3x1x10x8x256xf32, #tpu.memory_space<vmem>>, vector<1x1x8x8x256xf32>
    %131 = vector.shape_cast %130 : vector<1x1x8x8x256xf32> to vector<1x8x8x256xf32>
    %132 = vector.shape_cast %131 : vector<1x8x8x256xf32> to vector<64x256xf32>
    %133 = arith.truncf %132 : vector<64x256xf32> to vector<64x256xbf16>
    %c0_163 = arith.constant 0 : index
    %c2_164 = arith.constant 2 : index
    %c0_165 = arith.constant 0 : index
    %c0_166 = arith.constant 0 : index
    %134 = vector.load %arg3[%c0_163, %c2_164, %c0_165, %c0_166] : memref<3x3x256x256xbf16, #tpu.memory_space<vmem>>, vector<1x1x256x256xbf16>
    %135 = vector.shape_cast %134 : vector<1x1x256x256xbf16> to vector<256x256xbf16>
    %cst_167 = arith.constant dense<0.000000e+00> : vector<64x256xf32>
    %136 = tpu.matmul %133, %135, %cst_167 {dimension_numbers = #tpu.dot_dimension_numbers<[1], [0], [0], [1], [0, 0, 1, 1], [], []>} : vector<64x256xbf16>, vector<256x256xbf16>, vector<64x256xf32> -> vector<64x256xf32>
    %137 = arith.addf %129, %136 : vector<64x256xf32>
    %c0_168 = arith.constant 0 : index
    %c0_169 = arith.constant 0 : index
    %c1_170 = arith.constant 1 : index
    %c0_171 = arith.constant 0 : index
    %c0_172 = arith.constant 0 : index
    %138 = vector.load %arg6[%c0_168, %c0_169, %c1_170, %c0_171, %c0_172] : memref<3x1x10x8x256xf32, #tpu.memory_space<vmem>>, vector<1x1x8x8x256xf32>
    %139 = vector.shape_cast %138 : vector<1x1x8x8x256xf32> to vector<1x8x8x256xf32>
    %140 = vector.shape_cast %139 : vector<1x8x8x256xf32> to vector<64x256xf32>
    %141 = arith.truncf %140 : vector<64x256xf32> to vector<64x256xbf16>
    %c1_173 = arith.constant 1 : index
    %c0_174 = arith.constant 0 : index
    %c0_175 = arith.constant 0 : index
    %c0_176 = arith.constant 0 : index
    %142 = vector.load %arg3[%c1_173, %c0_174, %c0_175, %c0_176] : memref<3x3x256x256xbf16, #tpu.memory_space<vmem>>, vector<1x1x256x256xbf16>
    %143 = vector.shape_cast %142 : vector<1x1x256x256xbf16> to vector<256x256xbf16>
    %cst_177 = arith.constant dense<0.000000e+00> : vector<64x256xf32>
    %144 = tpu.matmul %141, %143, %cst_177 {dimension_numbers = #tpu.dot_dimension_numbers<[1], [0], [0], [1], [0, 0, 1, 1], [], []>} : vector<64x256xbf16>, vector<256x256xbf16>, vector<64x256xf32> -> vector<64x256xf32>
    %145 = arith.addf %137, %144 : vector<64x256xf32>
    %c1_178 = arith.constant 1 : index
    %c0_179 = arith.constant 0 : index
    %c1_180 = arith.constant 1 : index
    %c0_181 = arith.constant 0 : index
    %c0_182 = arith.constant 0 : index
    %146 = vector.load %arg6[%c1_178, %c0_179, %c1_180, %c0_181, %c0_182] : memref<3x1x10x8x256xf32, #tpu.memory_space<vmem>>, vector<1x1x8x8x256xf32>
    %147 = vector.shape_cast %146 : vector<1x1x8x8x256xf32> to vector<1x8x8x256xf32>
    %148 = vector.shape_cast %147 : vector<1x8x8x256xf32> to vector<64x256xf32>
    %149 = arith.truncf %148 : vector<64x256xf32> to vector<64x256xbf16>
    %c1_183 = arith.constant 1 : index
    %c1_184 = arith.constant 1 : index
    %c0_185 = arith.constant 0 : index
    %c0_186 = arith.constant 0 : index
    %150 = vector.load %arg3[%c1_183, %c1_184, %c0_185, %c0_186] : memref<3x3x256x256xbf16, #tpu.memory_space<vmem>>, vector<1x1x256x256xbf16>
    %151 = vector.shape_cast %150 : vector<1x1x256x256xbf16> to vector<256x256xbf16>
    %cst_187 = arith.constant dense<0.000000e+00> : vector<64x256xf32>
    %152 = tpu.matmul %149, %151, %cst_187 {dimension_numbers = #tpu.dot_dimension_numbers<[1], [0], [0], [1], [0, 0, 1, 1], [], []>} : vector<64x256xbf16>, vector<256x256xbf16>, vector<64x256xf32> -> vector<64x256xf32>
    %153 = arith.addf %145, %152 : vector<64x256xf32>
    %c2_188 = arith.constant 2 : index
    %c0_189 = arith.constant 0 : index
    %c1_190 = arith.constant 1 : index
    %c0_191 = arith.constant 0 : index
    %c0_192 = arith.constant 0 : index
    %154 = vector.load %arg6[%c2_188, %c0_189, %c1_190, %c0_191, %c0_192] : memref<3x1x10x8x256xf32, #tpu.memory_space<vmem>>, vector<1x1x8x8x256xf32>
    %155 = vector.shape_cast %154 : vector<1x1x8x8x256xf32> to vector<1x8x8x256xf32>
    %156 = vector.shape_cast %155 : vector<1x8x8x256xf32> to vector<64x256xf32>
    %157 = arith.truncf %156 : vector<64x256xf32> to vector<64x256xbf16>
    %c1_193 = arith.constant 1 : index
    %c2_194 = arith.constant 2 : index
    %c0_195 = arith.constant 0 : index
    %c0_196 = arith.constant 0 : index
    %158 = vector.load %arg3[%c1_193, %c2_194, %c0_195, %c0_196] : memref<3x3x256x256xbf16, #tpu.memory_space<vmem>>, vector<1x1x256x256xbf16>
    %159 = vector.shape_cast %158 : vector<1x1x256x256xbf16> to vector<256x256xbf16>
    %cst_197 = arith.constant dense<0.000000e+00> : vector<64x256xf32>
    %160 = tpu.matmul %157, %159, %cst_197 {dimension_numbers = #tpu.dot_dimension_numbers<[1], [0], [0], [1], [0, 0, 1, 1], [], []>} : vector<64x256xbf16>, vector<256x256xbf16>, vector<64x256xf32> -> vector<64x256xf32>
    %161 = arith.addf %153, %160 : vector<64x256xf32>
    %c0_198 = arith.constant 0 : index
    %c0_199 = arith.constant 0 : index
    %c2_200 = arith.constant 2 : index
    %c0_201 = arith.constant 0 : index
    %c0_202 = arith.constant 0 : index
    %162 = vector.load %arg6[%c0_198, %c0_199, %c2_200, %c0_201, %c0_202] : memref<3x1x10x8x256xf32, #tpu.memory_space<vmem>>, vector<1x1x8x8x256xf32>
    %163 = vector.shape_cast %162 : vector<1x1x8x8x256xf32> to vector<1x8x8x256xf32>
    %164 = vector.shape_cast %163 : vector<1x8x8x256xf32> to vector<64x256xf32>
    %165 = arith.truncf %164 : vector<64x256xf32> to vector<64x256xbf16>
    %c2_203 = arith.constant 2 : index
    %c0_204 = arith.constant 0 : index
    %c0_205 = arith.constant 0 : index
    %c0_206 = arith.constant 0 : index
    %166 = vector.load %arg3[%c2_203, %c0_204, %c0_205, %c0_206] : memref<3x3x256x256xbf16, #tpu.memory_space<vmem>>, vector<1x1x256x256xbf16>
    %167 = vector.shape_cast %166 : vector<1x1x256x256xbf16> to vector<256x256xbf16>
    %cst_207 = arith.constant dense<0.000000e+00> : vector<64x256xf32>
    %168 = tpu.matmul %165, %167, %cst_207 {dimension_numbers = #tpu.dot_dimension_numbers<[1], [0], [0], [1], [0, 0, 1, 1], [], []>} : vector<64x256xbf16>, vector<256x256xbf16>, vector<64x256xf32> -> vector<64x256xf32>
    %169 = arith.addf %161, %168 : vector<64x256xf32>
    %c1_208 = arith.constant 1 : index
    %c0_209 = arith.constant 0 : index
    %c2_210 = arith.constant 2 : index
    %c0_211 = arith.constant 0 : index
    %c0_212 = arith.constant 0 : index
    %170 = vector.load %arg6[%c1_208, %c0_209, %c2_210, %c0_211, %c0_212] : memref<3x1x10x8x256xf32, #tpu.memory_space<vmem>>, vector<1x1x8x8x256xf32>
    %171 = vector.shape_cast %170 : vector<1x1x8x8x256xf32> to vector<1x8x8x256xf32>
    %172 = vector.shape_cast %171 : vector<1x8x8x256xf32> to vector<64x256xf32>
    %173 = arith.truncf %172 : vector<64x256xf32> to vector<64x256xbf16>
    %c2_213 = arith.constant 2 : index
    %c1_214 = arith.constant 1 : index
    %c0_215 = arith.constant 0 : index
    %c0_216 = arith.constant 0 : index
    %174 = vector.load %arg3[%c2_213, %c1_214, %c0_215, %c0_216] : memref<3x3x256x256xbf16, #tpu.memory_space<vmem>>, vector<1x1x256x256xbf16>
    %175 = vector.shape_cast %174 : vector<1x1x256x256xbf16> to vector<256x256xbf16>
    %cst_217 = arith.constant dense<0.000000e+00> : vector<64x256xf32>
    %176 = tpu.matmul %173, %175, %cst_217 {dimension_numbers = #tpu.dot_dimension_numbers<[1], [0], [0], [1], [0, 0, 1, 1], [], []>} : vector<64x256xbf16>, vector<256x256xbf16>, vector<64x256xf32> -> vector<64x256xf32>
    %177 = arith.addf %169, %176 : vector<64x256xf32>
    %c2_218 = arith.constant 2 : index
    %c0_219 = arith.constant 0 : index
    %c2_220 = arith.constant 2 : index
    %c0_221 = arith.constant 0 : index
    %c0_222 = arith.constant 0 : index
    %178 = vector.load %arg6[%c2_218, %c0_219, %c2_220, %c0_221, %c0_222] : memref<3x1x10x8x256xf32, #tpu.memory_space<vmem>>, vector<1x1x8x8x256xf32>
    %179 = vector.shape_cast %178 : vector<1x1x8x8x256xf32> to vector<1x8x8x256xf32>
    %180 = vector.shape_cast %179 : vector<1x8x8x256xf32> to vector<64x256xf32>
    %181 = arith.truncf %180 : vector<64x256xf32> to vector<64x256xbf16>
    %c2_223 = arith.constant 2 : index
    %c2_224 = arith.constant 2 : index
    %c0_225 = arith.constant 0 : index
    %c0_226 = arith.constant 0 : index
    %182 = vector.load %arg3[%c2_223, %c2_224, %c0_225, %c0_226] : memref<3x3x256x256xbf16, #tpu.memory_space<vmem>>, vector<1x1x256x256xbf16>
    %183 = vector.shape_cast %182 : vector<1x1x256x256xbf16> to vector<256x256xbf16>
    %cst_227 = arith.constant dense<0.000000e+00> : vector<64x256xf32>
    %184 = tpu.matmul %181, %183, %cst_227 {dimension_numbers = #tpu.dot_dimension_numbers<[1], [0], [0], [1], [0, 0, 1, 1], [], []>} : vector<64x256xbf16>, vector<256x256xbf16>, vector<64x256xf32> -> vector<64x256xf32>
    %185 = arith.addf %177, %184 : vector<64x256xf32>
    %c2_228 = arith.constant 2 : index
    %c0_229 = arith.constant 0 : index
    %186 = vector.load %arg4[%c2_228, %c0_229] : memref<8x256xf32, #tpu.memory_space<vmem>>, vector<1x256xf32>
    %187 = vector.broadcast %186 : vector<1x256xf32> to vector<64x256xf32>
    %188 = arith.mulf %185, %187 : vector<64x256xf32>
    %c3 = arith.constant 3 : index
    %c0_230 = arith.constant 0 : index
    %189 = vector.load %arg4[%c3, %c0_230] : memref<8x256xf32, #tpu.memory_space<vmem>>, vector<1x256xf32>
    %190 = vector.broadcast %189 : vector<1x256xf32> to vector<64x256xf32>
    %191 = arith.addf %188, %190 : vector<64x256xf32>
    %c0_231 = arith.constant 0 : index
    %c0_232 = arith.constant 0 : index
    %c0_233 = arith.constant 0 : index
    %c0_234 = arith.constant 0 : index
    %192 = vector.load %arg1[%c0_231, %c0_232, %c0_233, %c0_234] : memref<1x8x8x256xf32, #tpu.memory_space<vmem>>, vector<1x8x8x256xf32>
    %193 = vector.shape_cast %192 : vector<1x8x8x256xf32> to vector<64x256xf32>
    %194 = arith.addf %193, %191 : vector<64x256xf32>
    %cst_235 = arith.constant 0.000000e+00 : f32
    %195 = vector.broadcast %cst_235 : f32 to vector<64x256xf32>
    %196 = arith.cmpf ogt, %194, %195 : vector<64x256xf32>
    %cst_236 = arith.constant 0.00999999977 : f32
    %197 = vector.broadcast %cst_236 : f32 to vector<64x256xf32>
    %198 = arith.mulf %194, %197 : vector<64x256xf32>
    %199 = arith.select %196, %194, %198 : vector<64x256xi1>, vector<64x256xf32>
    %200 = vector.shape_cast %199 : vector<64x256xf32> to vector<1x8x8x256xf32>
    %c0_237 = arith.constant 0 : index
    %c0_238 = arith.constant 0 : index
    %c0_239 = arith.constant 0 : index
    %c0_240 = arith.constant 0 : index
    %201 = vector.load %arg5[%c0_237, %c0_238, %c0_239, %c0_240] : memref<1x8x8x256xf32, #tpu.memory_space<vmem>>, vector<1x8x8x256xf32>
    tpu.vector_store %arg5[%c0_237, %c0_238, %c0_239, %c0_240], %200 {strides = array<i32>} : memref<1x8x8x256xf32, #tpu.memory_space<vmem>>, vector<1x8x8x256xf32>,
    return
  }
  func.func @transform_0(%arg0: i32) -> (i32, i32, i32, i32) {
    %c0_i32 = arith.constant 0 : i32
    %c0_i32_0 = arith.constant 0 : i32
    %c0_i32_1 = arith.constant 0 : i32
    %c0_i32_2 = arith.constant 0 : i32
    return %arg0, %c0_i32, %c0_i32_0, %c0_i32_1 : i32, i32, i32, i32
  }
  func.func @transform_1(%arg0: i32) -> (i32, i32, i32, i32) {
    %c0_i32 = arith.constant 0 : i32
    %c0_i32_0 = arith.constant 0 : i32
    %c0_i32_1 = arith.constant 0 : i32
    %c0_i32_2 = arith.constant 0 : i32
    %c0_i32_3 = arith.constant 0 : i32
    return %c0_i32, %c0_i32_0, %c0_i32_1, %c0_i32_2 : i32, i32, i32, i32
  }
  func.func @transform_2(%arg0: i32) -> (i32, i32, i32, i32) {
    %c0_i32 = arith.constant 0 : i32
    %c0_i32_0 = arith.constant 0 : i32
    %c0_i32_1 = arith.constant 0 : i32
    %c0_i32_2 = arith.constant 0 : i32
    %c0_i32_3 = arith.constant 0 : i32
    return %c0_i32, %c0_i32_0, %c0_i32_1, %c0_i32_2 : i32, i32, i32, i32
  }
  func.func @transform_3(%arg0: i32) -> (i32, i32) {
    %c0_i32 = arith.constant 0 : i32
    %c0_i32_0 = arith.constant 0 : i32
    %c0_i32_1 = arith.constant 0 : i32
    return %c0_i32, %c0_i32_0 : i32, i32
  }
  func.func @transform_4(%arg0: i32) -> (i32, i32, i32, i32) {
    %c0_i32 = arith.constant 0 : i32
    %c0_i32_0 = arith.constant 0 : i32
    %c0_i32_1 = arith.constant 0 : i32
    %c0_i32_2 = arith.constant 0 : i32
    return %arg0, %c0_i32, %c0_i32_0, %c0_i32_1 : i32, i32, i32, i32
  }
}

</mosaic_0001>

<bundles_post_ra>
// kernel: tile.23
= control target key start
LH: loop header
LB: loop body
LE: loop exit
PB: predicated region body
PF: predicated region fallthrough
CT: control target
= control target key end

     0   :  { %s22_s0 = inlined_call_operand.vmem [shape: f32[32], index: 0, kind: input, shape index: {}]   ;;  %s23_s1 = inlined_call_operand.vmem [shape: f32[8,32], index: 1, kind: output, shape index: {}]  }
   0x1   :  { %v4_v0 = vld [vmem:[%s22_s0] ss:$0 sm:$0xff] }
   0x2   :  { %5 = vst [vmem:[%s23_s1] sm:$0xff] %v4_v0 }

// kernel: tile.36
= control target key start
LH: loop header
LB: loop body
LE: loop exit
PB: predicated region body
PF: predicated region fallthrough
CT: control target
= control target key end

     0   :  { %s7_s6 = smov 3  ;;  %s14_s9 = smov 3  ;;  %vm4_vm0 = vcmask 261120   ;;  %vm11_vm1 = vcmask 1048320   ;;  %vm18_vm2 = vcmask 785920   ;;  %vm25_vm3 = vcmask 523520   ;;  %s76_s0 = inlined_call_operand.vmem [shape: f32[8,32], index: 0, kind: input, shape index: {}]   ;;  %s77_s1 = inlined_call_operand.vmem [shape: f32[1,256], index: 1, kind: output, shape index: {}]  }
   0x1   :  { %v38_v0 = vld [vmem:[%s76_s0 + $0x3] ss:$4 sm:%s7_s6]   ;;  %s45_s10 = smov 96   ;;  %s21_s11 = smov 3  ;;  %v39_v1 = vld [vmem:[%s76_s0 + $0x2] ss:$4 sm:%s14_s9]  }
   0x2   :  { %9 = vrot.lane.b32.xlu0 %v38_v0, %s45_s10  ;;  %v40_v2 = vld [vmem:[%s76_s0 + $0x1] ss:$4 sm:%s21_s11]   ;;  %s2_s16 = smov 3  ;;  %s46_s17 = smov 32  }
   0x3   :  { %23 = vrot.lane.b32.xlu1 %v40_v2, %s46_s17  ;;  %v3_v3 = vld [vmem:[%s76_s0] ss:$4 sm:%s2_s16]   ;;  %s47_s0 = smov 64  }
   0x4   :  { %5 = vst.msk [vmem:[#allocation0] ss:$8 sm:$0x3] %vm4_vm0, %v3_v3  }
   0x6   :  { %16 = vrot.lane.b32.xlu0 %v39_v1, %s47_s0 }
  0x74   :  { %v10_v4 = vpop.permute.xlu0 %9  }
  0x75   :  { %12 = vst.msk [vmem:[#allocation0] ss:$8 sm:$0x3] %vm11_vm1, %v10_v4   ;;  %v24_v5 = vpop.permute.xlu1 %23  }
  0x78   :  { %v17_v6 = vpop.permute.xlu0 %16  }
  0x79   :  { %19 = vst.msk [vmem:[#allocation0] ss:$8 sm:$0x3] %vm18_vm2, %v17_v6  }
  0x7a   :  { %26 = vst.msk [vmem:[#allocation0] ss:$8 sm:$0x3] %vm25_vm3, %v24_v5  }
  0x81   :  { %v30_v7 = vld [vmem:[#allocation0] sm:$0x1]  ;;  %v34_v8 = vld [vmem:[#allocation0 + $0x8] sm:$0x1] }
  0x82   :  { %32 = vst [vmem:[%s77_s1] sm:$0x1] %v30_v7  ;;  %41 = vst [vmem:[%s77_s1 + $0x1] sm:$0x1] %v34_v8 }

// kernel: residual_block_forward.1
= control target key start
LH: loop header
LB: loop body
LE: loop exit
PB: predicated region body
PF: predicated region fallthrough
CT: control target
= control target key end

     0   :  { %s8972_s15 = smov 0   ;;  %s11764_s0 = inlined_call_operand.vmem [shape: f32[2,8,8,256], index: 0, kind: input, shape index: {}]   ;;  %s11765_s1 = inlined_call_operand.vmem [shape: bf16[3,3,256,256], index: 1, kind: input, shape index: {}]   ;;  %s11766_s2 = inlined_call_operand.vmem [shape: bf16[3,3,256,256], index: 2, kind: input, shape index: {}]   ;;  %s11767_s3 = inlined_call_operand.vmem [shape: f32[8,256], index: 3, kind: input, shape index: {}]   ;;  %s11768_s4 = inlined_call_operand.vmem [shape: f32[2,8,8,256], index: 4, kind: output, shape index: {}]  }
   0x1 LB: > { %s6313_s16 = sadd.s32 4294967295, %s8943_s15   ;;  %p6317_p0 = scmp.ge.s32.totalorder %s8943_s15, 1  ;;  %s8943_s15 = sphi %s8972_s15, %s14_s15  }
   0x2   : > { %p162_p1 = scmp.lt.s32.totalorder %s8943_s15, 3 }
   0x4   : > { %p163_p2 = pnand %p6317_p0, %p162_p1 }
   0x6   : > { %166 = sbr.rel (%p163_p2) target bundleno = 1575 (0x627), region = 36 }
   0xd   : > { %v8059_v0 = vld [vmem:[%s11765_s1 + $0x104] ss:$8 sps:$4 sm:$0xff]   ;;  %v8061_v1 = vld [vmem:[%s11765_s1 + $0x100] ss:$8 sps:$4 sm:$0xff]   ;;  %v8062_v2 = vld [vmem:[%s11765_s1 + $0x114] ss:$8 sps:$4 sm:$0xff]  }
   0xe   : > { %666 = vmatprep.subr.bf16.mxu0 %v8059_v0  ;;  %v8064_v3 = vld [vmem:[%s11765_s1 + $0x110] ss:$8 sps:$4 sm:$0xff]   ;;  %v8065_v4 = vld [vmem:[%s11765_s1 + $0x124] ss:$8 sps:$4 sm:$0xff]   ;;  %v8067_v5 = vld [vmem:[%s11765_s1 + $0x120] ss:$8 sps:$4 sm:$0xff]  }
   0xf   : > { %667 = vmatpush1.bf16.msra.mxu0 %v8061_v1  ;;  %p188_p3 = scmp.lt.s32.totalorder %s6313_s16, 1  ;;  %v8068_v6 = vld [vmem:[%s11765_s1 + $0x134] ss:$8 sps:$4 sm:$0xff]   ;;  %v8070_v7 = vld [vmem:[%s11765_s1 + $0x130] ss:$8 sps:$4 sm:$0xff]   ;;  %v11769_v14 = vmov 0.0  }
  0x10   : > { %668 = vmatprep.subr.bf16.mxu0 %v8062_v2  ;;  %v8071_v8 = vld [vmem:[%s11765_s1 + $0x144] ss:$8 sps:$4 sm:$0xff]   ;;  %v8073_v9 = vld [vmem:[%s11765_s1 + $0x140] ss:$8 sps:$4 sm:$0xff]   ;;  %v8074_v10 = vld [vmem:[%s11765_s1 + $0x154] ss:$8 sps:$4 sm:$0xff]  }
  0x11   : > { %s11869_s16 = smov (!%p188_p3, %s6313_s16), 1  ;;  %v8076_v11 = vld [vmem:[%s11765_s1 + $0x150] ss:$8 sps:$4 sm:$0xff]   ;;  %v8077_v12 = vld [vmem:[%s11765_s1 + $0x164] ss:$8 sps:$4 sm:$0xff]   ;;  %vm292_vm0 = vcmask 1040384  }
  0x12   : > { %s7415_s11 = sshll.u32 %s11869_s16, 7  ;;  %v8079_v16 = vld [vmem:[%s11765_s1 + $0x160] ss:$8 sps:$4 sm:$0xff]   ;;  %v8080_v17 = vld [vmem:[%s11765_s1 + $0x174] ss:$8 sps:$4 sm:$0xff]   ;;  %vm9205_vm1 = vmneg %vm292_vm0  ;;  %vm8946_vm2 = vmmov 1  }
  0x13   : > { %669 = vmatpush1.bf16.msra.mxu0 %v8064_v3  ;;  %s9021_s18 = scalar_lea.vmem %s11764_s0, %s7415_s11  ;;  %v8082_v18 = vld [vmem:[%s11765_s1 + $0x170] ss:$8 sps:$4 sm:$0xff]   ;;  %v8083_v19 = vld [vmem:[%s11765_s1 + $0x184] ss:$8 sps:$4 sm:$0xff]   ;;  %v8085_v20 = vld [vmem:[%s11765_s1 + $0x180] ss:$8 sps:$4 sm:$0xff]   ;;  %s11707_s12 = scalar_lea.vmem %s11768_s4, %s7415_s11 }
  0x14   : > { %670 = vmatprep.subr.bf16.mxu0 %v8065_v4  ;;  %v9030_v13 = vld [vmem:[%s9021_s18 + $0x8] sm:$0xff]  ;;  %v8086_v21 = vld [vmem:[%s11765_s1 + $0x194] ss:$8 sps:$4 sm:$0xff]   ;;  %v8088_v22 = vld [vmem:[%s11765_s1 + $0x190] ss:$8 sps:$4 sm:$0xff]   ;;  %vm358_vm5 = vcmask 1046528  }
  0x15   : > { %v466_v15 = vpack.c.bf16 %v9030_v13, %v11769_v14  ;;  %v8089_v23 = vld [vmem:[%s11765_s1 + $0x1a4] ss:$8 sps:$4 sm:$0xff]   ;;  %v9062_v25 = vld [vmem:[%s9021_s18 + $0x10] sm:$0xff]  ;;  %v8091_v26 = vld [vmem:[%s11765_s1 + $0x1a0] ss:$8 sps:$4 sm:$0xff]  }
  0x16   : > { %v9059_v24 = vld [vmem:[%s9021_s18] sm:$0xff]  ;;  %v262_v28 = vrot.slane %v9062_v25, 7  ;;  %v8092_v29 = vld [vmem:[%s11765_s1 + $0x1b4] ss:$8 sps:$4 sm:$0xff]   ;;  %v8094_v31 = vld [vmem:[%s11765_s1 + $0x1b0] ss:$8 sps:$4 sm:$0xff]  }
  0x17   : > { %671 = vmatpush1.bf16.msra.mxu0 %v8067_v5  ;;  %698 = vmatprep.mubr.bf16.mxu0 %v466_v15  ;;  %v260_v27 = vrot.slane %v9059_v24, 7  ;;  %v8095_v32 = vld [vmem:[%s11765_s1 + $0x1c4] ss:$8 sps:$4 sm:$0xff]   ;;  %v8097_v33 = vld [vmem:[%s11765_s1 + $0x1c0] ss:$8 sps:$4 sm:$0xff]   ;;  %v9109_v41 = vld [vmem:[%s9021_s18 + $0x18] sm:$0xff]  ;;  %v465_v43 = vpack.c.bf16 %v9059_v24, %v11769_v14 }
  0x18   : > { %672 = vmatprep.subr.bf16.mxu0 %v8068_v6  ;;  %v8098_v34 = vld [vmem:[%s11765_s1 + $0x1d4] ss:$8 sps:$4 sm:$0xff]   ;;  %v8100_v35 = vld [vmem:[%s11765_s1 + $0x1d0] ss:$8 sps:$4 sm:$0xff]   ;;  %v8101_v36 = vld [vmem:[%s11765_s1 + $0x1e4] ss:$8 sps:$4 sm:$0xff]  }
  0x19   : > { %v9076_v30 = vpack.c.bf16 %v262_v28, %v260_v27  ;;  %v8103_v37 = vld [vmem:[%s11765_s1 + $0x1e0] ss:$8 sps:$4 sm:$0xff]   ;;  %v8104_v38 = vld [vmem:[%s11765_s1 + $0x1f4] ss:$8 sps:$4 sm:$0xff]   ;;  %v8106_v39 = vld [vmem:[%s11765_s1 + $0x1f0] ss:$8 sps:$4 sm:$0xff]  }
  0x1a   : > { %v8109_v40 = vld [vmem:[%s11765_s1 + $0x4] ss:$8 sps:$4 sm:$0xff]   ;;  %v8107_v44 = vld [vmem:[%s11765_s1] ss:$8 sps:$4 sm:$0xff]   ;;  %v8112_v46 = vld [vmem:[%s11765_s1 + $0x14] ss:$8 sps:$4 sm:$0xff]  }
  0x1b   : > { %673 = vmatpush1.bf16.msra.mxu0 %v8070_v7  ;;  %v9112_v42 = vld [vmem:[%s9021_s18 + $0x28] sm:$0xff]  ;;  %v8110_v47 = vld [vmem:[%s11765_s1 + $0x10] ss:$8 sps:$4 sm:$0xff]   ;;  %v9133_v49 = vld [vmem:[%s9021_s18 + $0x20] sm:$0xff]  ;;  %v261_v5 = vrot.slane %v9030_v13, 7 }
  0x1c   : > { %674 = vmatprep.subr.bf16.mxu0 %v8071_v8  ;;  %v9121_v45 = vpack.c.bf16 %v9112_v42, %v9109_v41  ;;  %v8115_v48 = vld [vmem:[%s11765_s1 + $0x24] ss:$8 sps:$4 sm:$0xff]   ;;  %v9137_v50 = vld [vmem:[%s9021_s18 + $0x38] sm:$0xff]  ;;  %v9144_v52 = vpack.c.bf16 %v9133_v49, %v9062_v25  ;;  %v8113_v53 = vld [vmem:[%s11765_s1 + $0x20] ss:$8 sps:$4 sm:$0xff]   ;;  %v264_v24 = vrot.slane %v9133_v49, 7 }
  0x1d   : > { %v9140_v51 = vld [vmem:[%s9021_s18 + $0x48] sm:$0xff]  ;;  %v8118_v55 = vld [vmem:[%s11765_s1 + $0x34] ss:$8 sps:$4 sm:$0xff]   ;;  %v8116_v56 = vld [vmem:[%s11765_s1 + $0x30] ss:$8 sps:$4 sm:$0xff]  }
  0x1e   : > { %v9151_v54 = vpack.c.bf16 %v9140_v51, %v9137_v50  ;;  %v9160_v57 = vld [vmem:[%s9021_s18 + $0x30] sm:$0xff]  ;;  %v8121_v58 = vld [vmem:[%s11765_s1 + $0x44] ss:$8 sps:$4 sm:$0xff]   ;;  %v9171_v60 = vld [vmem:[%s9021_s18 + $0x58] sm:$0xff] }
  0x1f   : > { %675 = vmatpush1.bf16.msra.mxu0 %v8073_v9  ;;  %v9167_v59 = vld [vmem:[%s9021_s18 + $0x40] sm:$0xff]  ;;  %v9174_v61 = vld [vmem:[%s9021_s18 + $0x68] sm:$0xff]  ;;  %v8124_v0 = vld [vmem:[%s11765_s1 + $0x54] ss:$8 sps:$4 sm:$0xff]  }
  0x20   : > { %676 = vmatprep.subr.bf16.mxu0 %v8074_v10  ;;  %v9178_v62 = vpack.c.bf16 %v9167_v59, %v9160_v57  ;;  %v8119_v63 = vld [vmem:[%s11765_s1 + $0x40] ss:$8 sps:$4 sm:$0xff]   ;;  %v9188_v1 = vpack.c.bf16 %v9174_v61, %v9171_v60  ;;  %v8122_v2 = vld [vmem:[%s11765_s1 + $0x50] ss:$8 sps:$4 sm:$0xff]   ;;  %v8127_v4 = vld [vmem:[%s11765_s1 + $0x64] ss:$8 sps:$4 sm:$0xff]  }
  0x21   : > { %v9194_v3 = vld [vmem:[%s9021_s18 + $0x50] sm:$0xff]  ;;  %v9203_v6 = vld [vmem:[%s9021_s18 + $0x60] sm:$0xff]  ;;  %vm9222_vm3 = vmpackc.low %vm9205_vm1, %vm8946_vm2 }
  0x22   : > { %v8125_v8 = vld [vmem:[%s11765_s1 + $0x60] ss:$8 sps:$4 sm:$0xff]   ;;  %v9214_v9 = vpack.c.bf16 %v9203_v6, %v9194_v3  ;;  %v8130_v10 = vld [vmem:[%s11765_s1 + $0x74] ss:$8 sps:$4 sm:$0xff]   ;;  %v8128_v15 = vld [vmem:[%s11765_s1 + $0x70] ss:$8 sps:$4 sm:$0xff]  }
  0x23   : > { %677 = vmatpush1.bf16.msra.mxu0 %v8076_v11  ;;  %vm9297_vm4 = vmpackc.low %vm9205_vm1, %vm9205_vm1  ;;  %v8164_v25 = vld [vmem:[%s11765_s1 + $0x230] ss:$8 sps:$4 sm:$0xff]   ;;  %v8415_v7 = vld [vmem:[%s11765_s1 + $0x764] ss:$8 sps:$4 sm:$0xff]  }
  0x24   : > { %678 = vmatprep.subr.bf16.mxu0 %v8077_v12  ;;  %v7419_v12 = vpack.c.bf16 %v261_v5, %v11769_v14  ;;  %vm9405_vm6 = vmpackc.low %vm358_vm5, %vm8946_vm2  ;;  %v8593_v11 = vld [vmem:[%s11766_s2 + $0x220] ss:$8 sps:$4 sm:$0xff]  }
  0x25   : > { %vm9474_vm7 = vmpackc.low %vm358_vm5, %vm358_vm5 }
  0x26   : > { %vm10109_vm8 = vmpackc.low %vm8946_vm2, %vm9205_vm1 }
  0x27   : > { %679 = vmatpush1.bf16.msra.mxu0 %v8079_v16  ;;  %v8133_v16 = vld [vmem:[%s11765_s1 + $0x84] ss:$8 sps:$4 sm:$0xff]   ;;  %vm10393_vm9 = vmpackc.low %vm8946_vm2, %vm358_vm5 }
  0x28   : > { %680 = vmatprep.subr.bf16.mxu0 %v8080_v17  ;;  %v8131_v17 = vld [vmem:[%s11765_s1 + $0x80] ss:$8 sps:$4 sm:$0xff]  }
  0x2b   : > { %681 = vmatpush1.bf16.msra.mxu0 %v8082_v18  ;;  %v8136_v18 = vld [vmem:[%s11765_s1 + $0x94] ss:$8 sps:$4 sm:$0xff]  }
  0x2c   : > { %682 = vmatprep.subr.bf16.mxu0 %v8083_v19  ;;  %v8134_v19 = vld [vmem:[%s11765_s1 + $0x90] ss:$8 sps:$4 sm:$0xff]  }
  0x2f   : > { %683 = vmatpush1.bf16.msra.mxu0 %v8085_v20  ;;  %v8139_v20 = vld [vmem:[%s11765_s1 + $0xa4] ss:$8 sps:$4 sm:$0xff]  }
  0x30   : > { %684 = vmatprep.subr.bf16.mxu0 %v8086_v21  ;;  %v8137_v21 = vld [vmem:[%s11765_s1 + $0xa0] ss:$8 sps:$4 sm:$0xff]  }
  0x33   : > { %685 = vmatpush1.bf16.msra.mxu0 %v8088_v22  ;;  %v8142_v22 = vld [vmem:[%s11765_s1 + $0xb4] ss:$8 sps:$4 sm:$0xff]  }
  0x34   : > { %686 = vmatprep.subr.bf16.mxu0 %v8089_v23  ;;  %v8140_v23 = vld [vmem:[%s11765_s1 + $0xb0] ss:$8 sps:$4 sm:$0xff]  }
  0x37   : > { %687 = vmatpush1.bf16.msra.mxu0 %v8091_v26  ;;  %v8145_v26 = vld [vmem:[%s11765_s1 + $0xc4] ss:$8 sps:$4 sm:$0xff]  }
  0x38   : > { %688 = vmatprep.subr.bf16.mxu0 %v8092_v29  ;;  %v8143_v29 = vld [vmem:[%s11765_s1 + $0xc0] ss:$8 sps:$4 sm:$0xff]  }
  0x3b   : > { %689 = vmatpush1.bf16.msra.mxu0 %v8094_v31  ;;  %v8148_v31 = vld [vmem:[%s11765_s1 + $0xd4] ss:$8 sps:$4 sm:$0xff]  }
  0x3c   : > { %690 = vmatprep.subr.bf16.mxu0 %v8095_v32  ;;  %v8146_v32 = vld [vmem:[%s11765_s1 + $0xd0] ss:$8 sps:$4 sm:$0xff]  }
  0x3f   : > { %691 = vmatpush1.bf16.msra.mxu0 %v8097_v33  ;;  %v8151_v33 = vld [vmem:[%s11765_s1 + $0xe4] ss:$8 sps:$4 sm:$0xff]  }
  0x40   : > { %692 = vmatprep.subr.bf16.mxu0 %v8098_v34  ;;  %v8149_v34 = vld [vmem:[%s11765_s1 + $0xe0] ss:$8 sps:$4 sm:$0xff]  }
  0x43   : > { %693 = vmatpush1.bf16.msra.mxu0 %v8100_v35  ;;  %v8154_v35 = vld [vmem:[%s11765_s1 + $0xf4] ss:$8 sps:$4 sm:$0xff]  }
  0x44   : > { %694 = vmatprep.subr.bf16.mxu0 %v8101_v36  ;;  %v263_v36 = vrot.slane %v9109_v41, 7 }
  0x47   : > { %695 = vmatpush1.bf16.msra.mxu0 %v8103_v37  ;;  %v8152_v37 = vld [vmem:[%s11765_s1 + $0xf0] ss:$8 sps:$4 sm:$0xff]  }
  0x48   : > { %696 = vmatprep.subr.bf16.mxu0 %v8104_v38  ;;  %v8157_v38 = vld [vmem:[%s11765_s1 + $0x204] ss:$8 sps:$4 sm:$0xff]  }
  0x4b   : > { %697 = vmatpush1.bf16.msra.mxu0 %v8106_v39  ;;  %v265_v39 = vrot.slane %v9112_v42, 7 }
  0x4c   : > { %899 = vmatprep.subr.bf16.mxu0 %v8109_v40  ;;  %v8155_v40 = vld [vmem:[%s11765_s1 + $0x200] ss:$8 sps:$4 sm:$0xff]  }
  0x4e   : > { %699 = vmatmul.mubr.bf16.vlgmr.msra.gmra.mrb[0].mxu0 %v465_v43  ;;  %v7423_v43 = vpack.c.bf16 %v260_v27, %v11769_v14  ;;  %v267_v27 = vrot.slane %v9137_v50, 7 }
  0x4f   : > { %900 = vmatpush1.bf16.msra.mxu0 %v8107_v44  ;;  %708 = vmatprep.mubr.bf16.mxu0 %v9121_v45 }
  0x50   : > { %901 = vmatprep.subr.bf16.mxu0 %v8112_v46  ;;  %v8160_v46 = vld [vmem:[%s11765_s1 + $0x214] ss:$8 sps:$4 sm:$0xff]  }
  0x53   : > { %902 = vmatpush1.bf16.msra.mxu0 %v8110_v47  ;;  %v9308_v47 = vpack.c.bf16 %v265_v39, %v263_v36 }
  0x54   : > { %903 = vmatprep.subr.bf16.mxu0 %v8115_v48  ;;  %v8158_v48 = vld [vmem:[%s11765_s1 + $0x210] ss:$8 sps:$4 sm:$0xff]  }
  0x56   : > { %709 = vmatmul.mubr.bf16.gmra.mrb[4].mxu0 %v9144_v52 }
  0x57   : > { %904 = vmatpush1.bf16.msra.mxu0 %v8113_v53  ;;  %718 = vmatprep.mubr.bf16.mxu0 %v9151_v54  ;;  %v8163_v53 = vld [vmem:[%s11765_s1 + $0x224] ss:$8 sps:$4 sm:$0xff]  }
  0x58   : > { %905 = vmatprep.subr.bf16.mxu0 %v8118_v55  ;;  %v269_v55 = vrot.slane %v9140_v51, 7 }
  0x5b   : > { %906 = vmatpush1.bf16.msra.mxu0 %v8116_v56  ;;  %v9328_v56 = vpack.c.bf16 %v264_v24, %v262_v28  ;;  %v266_v28 = vrot.slane %v9160_v57, 7 }
  0x5c   : > { %907 = vmatprep.subr.bf16.mxu0 %v8121_v58  ;;  %v8161_v58 = vld [vmem:[%s11765_s1 + $0x220] ss:$8 sps:$4 sm:$0xff]  }
  0x5e   : > { %719 = vmatmul.mubr.bf16.gmra.mrb[8].mxu0 %v9178_v62 }
  0x5f   : > { %908 = vmatpush1.bf16.msra.mxu0 %v8119_v63  ;;  %728 = vmatprep.mubr.bf16.mxu0 %v9188_v1  ;;  %v8166_v63 = vld [vmem:[%s11765_s1 + $0x234] ss:$8 sps:$4 sm:$0xff]  }
  0x60   : > { %909 = vmatprep.subr.bf16.mxu0 %v8124_v0  ;;  %v9340_v0 = vpack.c.bf16 %v269_v55, %v267_v27 }
  0x63   : > { %910 = vmatpush1.bf16.msra.mxu0 %v8122_v2  ;;  %v268_v2 = vrot.slane %v9167_v59, 7 }
  0x64   : > { %911 = vmatprep.subr.bf16.mxu0 %v8127_v4  ;;  %v8169_v4 = vld [vmem:[%s11765_s1 + $0x244] ss:$8 sps:$4 sm:$0xff]  }
  0x66   : > { %729 = vmatmul.mubr.bf16.gmra.mrb[12].mxu0 %v9214_v9 }
  0x67   : > { %912 = vmatpush1.bf16.msra.mxu0 %v8125_v8  ;;  %7420 = vmatprep.mubr.msk.bf16.mxu0 %vm9222_vm3, %v7419_v12  ;;  %v271_v8 = vrot.slane %v9171_v60, 7  ;;  %v9362_v12 = vpack.c.bf16 %v268_v2, %v266_v28 }
  0x68   : > { %913 = vmatprep.subr.bf16.mxu0 %v8130_v10  ;;  %v273_v10 = vrot.slane %v9174_v61, 7 }
  0x6b   : > { %914 = vmatpush1.bf16.msra.mxu0 %v8128_v15  ;;  %v8167_v15 = vld [vmem:[%s11765_s1 + $0x240] ss:$8 sps:$4 sm:$0xff]  }
  0x6c   : > { %915 = vmatprep.subr.bf16.mxu0 %v8133_v16  ;;  %v8172_v16 = vld [vmem:[%s11765_s1 + $0x254] ss:$8 sps:$4 sm:$0xff]  }
  0x6f   : > { %916 = vmatpush1.bf16.msra.mxu0 %v8131_v17  ;;  %v9374_v17 = vpack.c.bf16 %v273_v10, %v271_v8 }
  0x70   : > { %917 = vmatprep.subr.bf16.mxu0 %v8136_v18  ;;  %v270_v18 = vrot.slane %v9194_v3, 7 }
  0x73   : > { %918 = vmatpush1.bf16.msra.mxu0 %v8134_v19  ;;  %v272_v19 = vrot.slane %v9203_v6, 7 }
  0x74   : > { %919 = vmatprep.subr.bf16.mxu0 %v8139_v20  ;;  %v327_v20 = vrot.slane %v9030_v13, 1  ;;  %v8325_v13 = vld [vmem:[%s11765_s1 + $0x584] ss:$8 sps:$4 sm:$0xff]  }
  0x77   : > { %920 = vmatpush1.bf16.msra.mxu0 %v8137_v21  ;;  %v8170_v21 = vld [vmem:[%s11765_s1 + $0x250] ss:$8 sps:$4 sm:$0xff]  }
  0x78   : > { %921 = vmatprep.subr.bf16.mxu0 %v8142_v22  ;;  %v8175_v22 = vld [vmem:[%s11765_s1 + $0x264] ss:$8 sps:$4 sm:$0xff]  }
  0x7b   : > { %922 = vmatpush1.bf16.msra.mxu0 %v8140_v23  ;;  %v8173_v23 = vld [vmem:[%s11765_s1 + $0x260] ss:$8 sps:$4 sm:$0xff]  }
  0x7c   : > { %923 = vmatprep.subr.bf16.mxu0 %v8145_v26  ;;  %v9398_v26 = vpack.c.bf16 %v272_v19, %v270_v18 }
  0x7f   : > { %924 = vmatpush1.bf16.msra.mxu0 %v8143_v29  ;;  %v8178_v29 = vld [vmem:[%s11765_s1 + $0x274] ss:$8 sps:$4 sm:$0xff]  }
  0x80   : > { %925 = vmatprep.subr.bf16.mxu0 %v8148_v31  ;;  %v8641_v31 = vld [vmem:[%s11766_s2 + $0x320] ss:$8 sps:$4 sm:$0xff]  }
  0x83   : > { %926 = vmatpush1.bf16.msra.mxu0 %v8146_v32  ;;  %v7456_v32 = vpack.c.bf16 %v327_v20, %v11769_v14 }
  0x84   : > { %927 = vmatprep.subr.bf16.mxu0 %v8151_v33  ;;  %v8176_v33 = vld [vmem:[%s11765_s1 + $0x270] ss:$8 sps:$4 sm:$0xff]  }
  0x87   : > { %928 = vmatpush1.bf16.msra.mxu0 %v8149_v34  ;;  %v8181_v34 = vld [vmem:[%s11765_s1 + $0x284] ss:$8 sps:$4 sm:$0xff]  }
  0x88   : > { %929 = vmatprep.subr.bf16.mxu0 %v8154_v35  ;;  %v8179_v35 = vld [vmem:[%s11765_s1 + $0x280] ss:$8 sps:$4 sm:$0xff]  }
  0x8b   : > { %930 = vmatpush1.bf16.msra.mxu0 %v8152_v37  ;;  %v8184_v37 = vld [vmem:[%s11765_s1 + $0x294] ss:$8 sps:$4 sm:$0xff]  }
  0x8c   : > { %1190 = vmatprep.subr.bf16.mxu0 %v8157_v38  ;;  %v8182_v38 = vld [vmem:[%s11765_s1 + $0x290] ss:$8 sps:$4 sm:$0xff]  }
  0x8e   : > { %7424 = vmatmul.mubr.msk.bf16.vlgmr.msra.gmra.mrb[0].mxu0 %vm9222_vm3, %v7423_v43  ;;  %v8185_v43 = vld [vmem:[%s11765_s1 + $0x2a0] ss:$8 sps:$4 sm:$0xff]  }
  0x8f   : > { %1191 = vmatpush1.bf16.msra.mxu0 %v8155_v40  ;;  %7429 = vmatprep.mubr.msk.bf16.mxu0 %vm9297_vm4, %v9308_v47  ;;  %v8187_v40 = vld [vmem:[%s11765_s1 + $0x2a4] ss:$8 sps:$4 sm:$0xff]  }
  0x90   : > { %1192 = vmatprep.subr.bf16.mxu0 %v8160_v46  ;;  %v8190_v46 = vld [vmem:[%s11765_s1 + $0x2b4] ss:$8 sps:$4 sm:$0xff]  }
  0x93   : > { %1193 = vmatpush1.bf16.msra.mxu0 %v8158_v48  ;;  %v8188_v48 = vld [vmem:[%s11765_s1 + $0x2b0] ss:$8 sps:$4 sm:$0xff]  }
  0x94   : > { %1194 = vmatprep.subr.bf16.mxu0 %v8163_v53  ;;  %v8193_v53 = vld [vmem:[%s11765_s1 + $0x2c4] ss:$8 sps:$4 sm:$0xff]  }
  0x96   : > { %7434 = vmatmul.mubr.msk.bf16.gmra.mrb[4].mxu0 %vm9297_vm4, %v9328_v56 }
  0x97   : > { %1195 = vmatpush1.bf16.msra.mxu0 %v8161_v58  ;;  %7439 = vmatprep.mubr.msk.bf16.mxu0 %vm9297_vm4, %v9340_v0  ;;  %v8191_v58 = vld [vmem:[%s11765_s1 + $0x2c0] ss:$8 sps:$4 sm:$0xff]  }
  0x98   : > { %1196 = vmatprep.subr.bf16.mxu0 %v8166_v63  ;;  %v8196_v63 = vld [vmem:[%s11765_s1 + $0x2d4] ss:$8 sps:$4 sm:$0xff]  }
  0x9b   : > { %1197 = vmatpush1.bf16.msra.mxu0 %v8164_v25  ;;  %v8194_v25 = vld [vmem:[%s11765_s1 + $0x2d0] ss:$8 sps:$4 sm:$0xff]  }
  0x9c   : > { %1198 = vmatprep.subr.bf16.mxu0 %v8169_v4  ;;  %v8199_v4 = vld [vmem:[%s11765_s1 + $0x2e4] ss:$8 sps:$4 sm:$0xff]  }
  0x9e   : > { %7444 = vmatmul.mubr.msk.bf16.gmra.mrb[8].mxu0 %vm9297_vm4, %v9362_v12 }
  0x9f   : > { %1199 = vmatpush1.bf16.msra.mxu0 %v8167_v15  ;;  %7449 = vmatprep.mubr.msk.bf16.mxu0 %vm9297_vm4, %v9374_v17  ;;  %v8197_v15 = vld [vmem:[%s11765_s1 + $0x2e0] ss:$8 sps:$4 sm:$0xff]  }
  0xa0   : > { %1200 = vmatprep.subr.bf16.mxu0 %v8172_v16  ;;  %v8202_v16 = vld [vmem:[%s11765_s1 + $0x2f4] ss:$8 sps:$4 sm:$0xff]  }
  0xa3   : > { %1201 = vmatpush1.bf16.msra.mxu0 %v8170_v21  ;;  %v8200_v21 = vld [vmem:[%s11765_s1 + $0x2f0] ss:$8 sps:$4 sm:$0xff]  }
  0xa4   : > { %1202 = vmatprep.subr.bf16.mxu0 %v8175_v22  ;;  %v9469_v22 = vld [vmem:[%s9021_s18] sm:$0xff] }
  0xa6   : > { %7454 = vmatmul.mubr.msk.bf16.gmra.mrb[12].mxu0 %vm9297_vm4, %v9398_v26 }
  0xa7   : > { %1203 = vmatpush1.bf16.msra.mxu0 %v8173_v23  ;;  %7457 = vmatprep.mubr.msk.bf16.mxu0 %vm9405_vm6, %v7456_v32  ;;  %v326_v23 = vrot.slane %v9469_v22, 1  ;;  %v8205_v32 = vld [vmem:[%s11765_s1 + $0x304] ss:$8 sps:$4 sm:$0xff]  }
  0xa8   : > { %1204 = vmatprep.subr.bf16.mxu0 %v8178_v29  ;;  %v7412_v29 = vld [vmem:[%s11767_s3 + $0x3] ss:$8 sm:$0x3] }
  0xab   : > { %1205 = vmatpush1.bf16.msra.mxu0 %v8176_v33  ;;  %v329_v33 = vrot.slane %v9109_v41, 1  ;;  %v8323_v41 = vld [vmem:[%s11765_s1 + $0x580] ss:$8 sps:$4 sm:$0xff]  }
  0xac   : > { %1206 = vmatprep.subr.bf16.mxu0 %v8181_v34  ;;  %v331_v34 = vrot.slane %v9112_v42, 1  ;;  %v8355_v42 = vld [vmem:[%s11765_s1 + $0x624] ss:$8 sps:$4 sm:$0xff]  }
  0xaf   : > { %1207 = vmatpush1.bf16.msra.mxu0 %v8179_v35  ;;  %v7459_v35 = vpack.c.bf16 %v326_v23, %v11769_v14 }
  0xb0   : > { %1208 = vmatprep.subr.bf16.mxu0 %v8184_v37  ;;  %v8203_v37 = vld [vmem:[%s11765_s1 + $0x300] ss:$8 sps:$4 sm:$0xff]  }
  0xb3   : > { %1209 = vmatpush1.bf16.msra.mxu0 %v8182_v38  ;;  %v8208_v38 = vld [vmem:[%s11765_s1 + $0x314] ss:$8 sps:$4 sm:$0xff]  }
  0xb4   : > { %1210 = vmatprep.subr.bf16.mxu0 %v8187_v40  ;;  %v9496_v40 = vpack.c.bf16 %v331_v34, %v329_v33 }
  0xb7   : > { %1211 = vmatpush1.bf16.msra.mxu0 %v8185_v43  ;;  %v8206_v43 = vld [vmem:[%s11765_s1 + $0x310] ss:$8 sps:$4 sm:$0xff]  }
  0xb8   : > { %1212 = vmatprep.subr.bf16.mxu0 %v8190_v46  ;;  %v9504_v46 = vld [vmem:[%s9021_s18 + $0x10] sm:$0xff] }
  0xbb   : > { %1213 = vmatpush1.bf16.msra.mxu0 %v8188_v48  ;;  %v328_v48 = vrot.slane %v9504_v46, 1 }
  0xbc   : > { %1214 = vmatprep.subr.bf16.mxu0 %v8193_v53  ;;  %v11774_v53 = vrot.slane %v9133_v49, 1 }
  0xbf   : > { %1215 = vmatpush1.bf16.msra.mxu0 %v8191_v58  ;;  %v8211_v58 = vld [vmem:[%s11765_s1 + $0x324] ss:$8 sps:$4 sm:$0xff]  }
  0xc0   : > { %1216 = vmatprep.subr.bf16.mxu0 %v8196_v63  ;;  %v333_v63 = vrot.slane %v9137_v50, 1  ;;  %v11813_v50 = vrot.slane %v9133_v49, 1  ;;  %v8356_v49 = vld [vmem:[%s11765_s1 + $0x630] ss:$8 sps:$4 sm:$0xff]  }
  0xc3   : > { %1217 = vmatpush1.bf16.msra.mxu0 %v8194_v25  ;;  %v11771_v25 = vrot.slane %v9140_v51, 1 }
  0xc4   : > { %1218 = vmatprep.subr.bf16.mxu0 %v8199_v4  ;;  %v9520_v4 = vpack.c.bf16 %v11774_v53, %v328_v48  ;;  %v8223_v53 = vld [vmem:[%s11765_s1 + $0x364] ss:$8 sps:$4 sm:$0xff]  }
  0xc7   : > { %1219 = vmatpush1.bf16.msra.mxu0 %v8197_v15  ;;  %v8209_v15 = vld [vmem:[%s11765_s1 + $0x320] ss:$8 sps:$4 sm:$0xff]  }
  0xc8   : > { %1220 = vmatprep.subr.bf16.mxu0 %v8202_v16  ;;  %v8214_v16 = vld [vmem:[%s11765_s1 + $0x334] ss:$8 sps:$4 sm:$0xff]  }
  0xcb   : > { %1221 = vmatpush1.bf16.msra.mxu0 %v8200_v21  ;;  %v9532_v21 = vpack.c.bf16 %v11771_v25, %v333_v63  ;;  %v8220_v25 = vld [vmem:[%s11765_s1 + $0x354] ss:$8 sps:$4 sm:$0xff]  }
  0xcc   : > { %1496 = vmatprep.subr.bf16.mxu0 %v8205_v32  ;;  %v8212_v32 = vld [vmem:[%s11765_s1 + $0x330] ss:$8 sps:$4 sm:$0xff]  }
  0xce   : > { %7460 = vmatmul.mubr.msk.bf16.vlgmr.msra.gmra.mrb[0].mxu0 %vm9405_vm6, %v7459_v35  ;;  %v11773_v35 = vrot.slane %v9160_v57, 1 }
  0xcf   : > { %1497 = vmatpush1.bf16.msra.mxu0 %v8203_v37  ;;  %7463 = vmatprep.mubr.msk.bf16.mxu0 %vm9474_vm7, %v9496_v40  ;;  %v11772_v37 = vrot.slane %v9167_v59, 1 }
  0xd0   : > { %1498 = vmatprep.subr.bf16.mxu0 %v8208_v38  ;;  %v8217_v38 = vld [vmem:[%s11765_s1 + $0x344] ss:$8 sps:$4 sm:$0xff]  }
  0xd1   : > { %v9554_v14 = vpack.c.bf16 %v11772_v37, %v11773_v35  ;;  %v11776_v37 = vrot.slane %v9203_v6, 1  ;;  %v8218_v35 = vld [vmem:[%s11765_s1 + $0x350] ss:$8 sps:$4 sm:$0xff]  }
  0xd3   : > { %1499 = vmatpush1.bf16.msra.mxu0 %v8206_v43  ;;  %v337_v43 = vrot.slane %v9171_v60, 1  ;;  %v11816_v60 = vrot.slane %v9167_v59, 1 }
  0xd4   : > { %1500 = vmatprep.subr.bf16.mxu0 %v8211_v58  ;;  %v11775_v58 = vrot.slane %v9174_v61, 1 }
  0xd6   : > { %7466 = vmatmul.mubr.msk.bf16.gmra.mrb[4].mxu0 %vm9474_vm7, %v9520_v4 }
  0xd7   : > { %1501 = vmatpush1.bf16.msra.mxu0 %v8209_v15  ;;  %7469 = vmatprep.mubr.msk.bf16.mxu0 %vm9474_vm7, %v9532_v21  ;;  %v8215_v15 = vld [vmem:[%s11765_s1 + $0x340] ss:$8 sps:$4 sm:$0xff]  }
  0xd8   : > { %1502 = vmatprep.subr.bf16.mxu0 %v8214_v16  ;;  %v9566_v16 = vpack.c.bf16 %v11775_v58, %v337_v43  ;;  %v8226_v58 = vld [vmem:[%s11765_s1 + $0x374] ss:$8 sps:$4 sm:$0xff]  }
  0xdb   : > { %1503 = vmatpush1.bf16.msra.mxu0 %v8212_v32  ;;  %v336_v32 = vrot.slane %v9194_v3, 1  ;;  %v8362_v3 = vld [vmem:[%s11765_s1 + $0x650] ss:$8 sps:$4 sm:$0xff]  }
  0xdc   : > { %1504 = vmatprep.subr.bf16.mxu0 %v8217_v38 }
  0xdd   : > { %v9586_v38 = vpack.c.bf16 %v11776_v37, %v336_v32  ;;  %v8229_v37 = vld [vmem:[%s11765_s1 + $0x384] ss:$8 sps:$4 sm:$0xff]  }
  0xde   : > { %7472 = vmatmul.mubr.msk.bf16.gmra.mrb[8].mxu0 %vm9474_vm7, %v9554_v14 }
  0xdf   : > { %1505 = vmatpush1.bf16.msra.mxu0 %v8215_v15  ;;  %7475 = vmatprep.mubr.msk.bf16.mxu0 %vm9474_vm7, %v9566_v16  ;;  %v8221_v15 = vld [vmem:[%s11765_s1 + $0x360] ss:$8 sps:$4 sm:$0xff]  }
  0xe0   : > { %1506 = vmatprep.subr.bf16.mxu0 %v8220_v25  ;;  %v7482_v25 = vpack.c.bf16 %v263_v36, %v261_v5  ;;  %v8227_v5 = vld [vmem:[%s11765_s1 + $0x380] ss:$8 sps:$4 sm:$0xff]   ;;  %v8232_v36 = vld [vmem:[%s11765_s1 + $0x394] ss:$8 sps:$4 sm:$0xff]  }
  0xe3   : > { %1507 = vmatpush1.bf16.msra.mxu0 %v8218_v35  ;;  %v8224_v35 = vld [vmem:[%s11765_s1 + $0x370] ss:$8 sps:$4 sm:$0xff]  }
  0xe4   : > { %1508 = vmatprep.subr.bf16.mxu0 %v8223_v53  ;;  %v8230_v53 = vld [vmem:[%s11765_s1 + $0x390] ss:$8 sps:$4 sm:$0xff]  }
  0xe6   : > { %7478 = vmatmul.mubr.msk.bf16.gmra.mrb[12].mxu0 %vm9474_vm7, %v9586_v38 }
  0xe7   : > { %1509 = vmatpush1.bf16.msra.mxu0 %v8221_v15  ;;  %7483 = vmatprep.mubr.msk.bf16.mxu0 %vm9297_vm4, %v7482_v25  ;;  %v8235_v15 = vld [vmem:[%s11765_s1 + $0x3a4] ss:$8 sps:$4 sm:$0xff]   ;;  %v8238_v25 = vld [vmem:[%s11765_s1 + $0x3b4] ss:$8 sps:$4 sm:$0xff]  }
  0xe8   : > { %1510 = vmatprep.subr.bf16.mxu0 %v8226_v58  ;;  %v8233_v58 = vld [vmem:[%s11765_s1 + $0x3a0] ss:$8 sps:$4 sm:$0xff]  }
  0xeb   : > { %1511 = vmatpush1.bf16.msra.mxu0 %v8224_v35  ;;  %v8241_v35 = vld [vmem:[%s11765_s1 + $0x3c4] ss:$8 sps:$4 sm:$0xff]  }
  0xec   : > { %1512 = vmatprep.subr.bf16.mxu0 %v8229_v37  ;;  %v8236_v37 = vld [vmem:[%s11765_s1 + $0x3b0] ss:$8 sps:$4 sm:$0xff]  }
  0xef   : > { %1513 = vmatpush1.bf16.msra.mxu0 %v8227_v5  ;;  %v8239_v5 = vld [vmem:[%s11765_s1 + $0x3c0] ss:$8 sps:$4 sm:$0xff]  }
  0xf0   : > { %1514 = vmatprep.subr.bf16.mxu0 %v8232_v36  ;;  %v8244_v36 = vld [vmem:[%s11765_s1 + $0x3d4] ss:$8 sps:$4 sm:$0xff]  }
  0xf3   : > { %1515 = vmatpush1.bf16.msra.mxu0 %v8230_v53  ;;  %v8242_v53 = vld [vmem:[%s11765_s1 + $0x3d0] ss:$8 sps:$4 sm:$0xff]  }
  0xf4   : > { %1516 = vmatprep.subr.bf16.mxu0 %v8235_v15  ;;  %v8247_v15 = vld [vmem:[%s11765_s1 + $0x3e4] ss:$8 sps:$4 sm:$0xff]  }
  0xf7   : > { %1517 = vmatpush1.bf16.msra.mxu0 %v8233_v58  ;;  %v8245_v58 = vld [vmem:[%s11765_s1 + $0x3e0] ss:$8 sps:$4 sm:$0xff]  }
  0xf8   : > { %1518 = vmatprep.subr.bf16.mxu0 %v8238_v25  ;;  %v8250_v25 = vld [vmem:[%s11765_s1 + $0x3f4] ss:$8 sps:$4 sm:$0xff]  }
  0xfb   : > { %1519 = vmatpush1.bf16.msra.mxu0 %v8236_v37  ;;  %v8248_v37 = vld [vmem:[%s11765_s1 + $0x3f0] ss:$8 sps:$4 sm:$0xff]  }
  0xfc   : > { %1520 = vmatprep.subr.bf16.mxu0 %v8241_v35  ;;  %v8253_v35 = vld [vmem:[%s11765_s1 + $0x404] ss:$8 sps:$4 sm:$0xff]  }
  0xff   : > { %1521 = vmatpush1.bf16.msra.mxu0 %v8239_v5  ;;  %v8251_v5 = vld [vmem:[%s11765_s1 + $0x400] ss:$8 sps:$4 sm:$0xff]  }
 0x100   : > { %1522 = vmatprep.subr.bf16.mxu0 %v8244_v36  ;;  %v8256_v36 = vld [vmem:[%s11765_s1 + $0x414] ss:$8 sps:$4 sm:$0xff]  }
 0x103   : > { %1523 = vmatpush1.bf16.msra.mxu0 %v8242_v53  ;;  %v7492_v53 = vpack.c.bf16 %v267_v27, %v265_v39  ;;  %v8257_v39 = vld [vmem:[%s11765_s1 + $0x420] ss:$8 sps:$4 sm:$0xff]   ;;  %v8262_v27 = vld [vmem:[%s11765_s1 + $0x434] ss:$8 sps:$4 sm:$0xff]  }
 0x104   : > { %1524 = vmatprep.subr.bf16.mxu0 %v8247_v15  ;;  %v8254_v15 = vld [vmem:[%s11765_s1 + $0x410] ss:$8 sps:$4 sm:$0xff]  }
 0x107   : > { %1525 = vmatpush1.bf16.msra.mxu0 %v8245_v58  ;;  %v8259_v58 = vld [vmem:[%s11765_s1 + $0x424] ss:$8 sps:$4 sm:$0xff]  }
 0x108   : > { %1526 = vmatprep.subr.bf16.mxu0 %v8250_v25  ;;  %v7502_v25 = vpack.c.bf16 %v271_v8, %v269_v55  ;;  %v8265_v55 = vld [vmem:[%s11765_s1 + $0x444] ss:$8 sps:$4 sm:$0xff]   ;;  %v7507_v8 = vpack.c.bf16 %v270_v18, %v268_v2  ;;  %v8266_v18 = vld [vmem:[%s11765_s1 + $0x450] ss:$8 sps:$4 sm:$0xff]  }
 0x10b   : > { %1527 = vmatpush1.bf16.msra.mxu0 %v8248_v37  ;;  %v9693_v37 = vld [vmem:[%s9021_s18 + $0x78] sm:$0xff] }
 0x10c   : > { %1802 = vmatprep.subr.bf16.mxu0 %v8253_v35  ;;  %v8263_v35 = vld [vmem:[%s11765_s1 + $0x440] ss:$8 sps:$4 sm:$0xff]  }
 0x10e   : > { %7488 = vmatmul.mubr.msk.bf16.vlgmr.msra.gmra.mrb[0].mxu0 %vm9297_vm4, %v9076_v30  ;;  %v7497_v30 = vpack.c.bf16 %v266_v28, %v264_v24  ;;  %v8260_v24 = vld [vmem:[%s11765_s1 + $0x430] ss:$8 sps:$4 sm:$0xff]   ;;  %v275_v28 = vrot.slane %v9693_v37, 7 }
 0x10f   : > { %1803 = vmatpush1.bf16.msra.mxu0 %v8251_v5  ;;  %7493 = vmatprep.mubr.msk.bf16.mxu0 %vm9297_vm4, %v7492_v53  ;;  %v8268_v53 = vld [vmem:[%s11765_s1 + $0x454] ss:$8 sps:$4 sm:$0xff]  }
 0x110   : > { %1804 = vmatprep.subr.bf16.mxu0 %v8256_v36  ;;  %v7512_v5 = vpack.c.bf16 %v275_v28, %v273_v10  ;;  %v9718_v36 = vld [vmem:[%s9021_s18 + $0x70] sm:$0xff]  ;;  %v8271_v10 = vld [vmem:[%s11765_s1 + $0x464] ss:$8 sps:$4 sm:$0xff]  }
 0x111   : > { %v274_v2 = vrot.slane %v9718_v36, 7  ;;  %v340_v59 = vrot.slane %v9718_v36, 1 }
 0x113   : > { %1805 = vmatpush1.bf16.msra.mxu0 %v8254_v15  ;;  %v7517_v15 = vpack.c.bf16 %v274_v2, %v272_v19  ;;  %v8272_v19 = vld [vmem:[%s11765_s1 + $0x470] ss:$8 sps:$4 sm:$0xff]  }
 0x114   : > { %1806 = vmatprep.subr.bf16.mxu0 %v8259_v58  ;;  %v8269_v58 = vld [vmem:[%s11765_s1 + $0x460] ss:$8 sps:$4 sm:$0xff]  }
 0x116   : > { %7498 = vmatmul.mubr.msk.bf16.gmra.mrb[4].mxu0 %vm9297_vm4, %v7497_v30  ;;  %v8926_v30 = vld [vmem:[%s9021_s18 + $0x18] sm:$0xff] }
 0x117   : > { %1807 = vmatpush1.bf16.msra.mxu0 %v8257_v39  ;;  %7503 = vmatprep.mubr.msk.bf16.mxu0 %vm9297_vm4, %v7502_v25  ;;  %v8925_v39 = vld [vmem:[%s9021_s18 + $0x8] sm:$0xff]  ;;  %v8274_v25 = vld [vmem:[%s11765_s1 + $0x474] ss:$8 sps:$4 sm:$0xff]  }
 0x118   : > { %1808 = vmatprep.subr.bf16.mxu0 %v8262_v27  ;;  %v1602_v27 = vpack.c.bf16 %v8926_v30, %v8925_v39  ;;  %v8292_v39 = vld [vmem:[%s11765_s1 + $0x4d4] ss:$8 sps:$4 sm:$0xff]   ;;  %v8290_v30 = vld [vmem:[%s11765_s1 + $0x4d0] ss:$8 sps:$4 sm:$0xff]  }
 0x11b   : > { %1809 = vmatpush1.bf16.msra.mxu0 %v8260_v24  ;;  %v8277_v24 = vld [vmem:[%s11765_s1 + $0x484] ss:$8 sps:$4 sm:$0xff]  }
 0x11c   : > { %1810 = vmatprep.subr.bf16.mxu0 %v8265_v55  ;;  %v8275_v55 = vld [vmem:[%s11765_s1 + $0x480] ss:$8 sps:$4 sm:$0xff]  }
 0x11e   : > { %7508 = vmatmul.mubr.msk.bf16.gmra.mrb[8].mxu0 %vm9297_vm4, %v7507_v8  ;;  %v8280_v8 = vld [vmem:[%s11765_s1 + $0x494] ss:$8 sps:$4 sm:$0xff]  }
 0x11f   : > { %1811 = vmatpush1.bf16.msra.mxu0 %v8263_v35  ;;  %7513 = vmatprep.mubr.msk.bf16.mxu0 %vm9297_vm4, %v7512_v5  ;;  %v8278_v35 = vld [vmem:[%s11765_s1 + $0x490] ss:$8 sps:$4 sm:$0xff]   ;;  %v8283_v5 = vld [vmem:[%s11765_s1 + $0x4a4] ss:$8 sps:$4 sm:$0xff]  }
 0x120   : > { %1812 = vmatprep.subr.bf16.mxu0 %v8268_v53  ;;  %v8281_v53 = vld [vmem:[%s11765_s1 + $0x4a0] ss:$8 sps:$4 sm:$0xff]  }
 0x123   : > { %1813 = vmatpush1.bf16.msra.mxu0 %v8266_v18  ;;  %v8286_v18 = vld [vmem:[%s11765_s1 + $0x4b4] ss:$8 sps:$4 sm:$0xff]  }
 0x124   : > { %1814 = vmatprep.subr.bf16.mxu0 %v8271_v10  ;;  %v8284_v10 = vld [vmem:[%s11765_s1 + $0x4b0] ss:$8 sps:$4 sm:$0xff]  }
 0x126   : > { %7518 = vmatmul.mubr.msk.bf16.gmra.mrb[12].mxu0 %vm9297_vm4, %v7517_v15  ;;  %v8289_v15 = vld [vmem:[%s11765_s1 + $0x4c4] ss:$8 sps:$4 sm:$0xff]  }
 0x127   : > { %1815 = vmatpush1.bf16.msra.mxu0 %v8269_v58  ;;  %1834 = vmatprep.mubr.bf16.mxu0 %v1602_v27  ;;  %v8287_v58 = vld [vmem:[%s11765_s1 + $0x4c0] ss:$8 sps:$4 sm:$0xff]   ;;  %v8295_v27 = vld [vmem:[%s11765_s1 + $0x4e4] ss:$8 sps:$4 sm:$0xff]  }
 0x128   : > { %1816 = vmatprep.subr.bf16.mxu0 %v8274_v25  ;;  %v8293_v25 = vld [vmem:[%s11765_s1 + $0x4e0] ss:$8 sps:$4 sm:$0xff]  }
 0x12b   : > { %1817 = vmatpush1.bf16.msra.mxu0 %v8272_v19  ;;  %v8298_v19 = vld [vmem:[%s11765_s1 + $0x4f4] ss:$8 sps:$4 sm:$0xff]  }
 0x12c   : > { %1818 = vmatprep.subr.bf16.mxu0 %v8277_v24  ;;  %v8296_v24 = vld [vmem:[%s11765_s1 + $0x4f0] ss:$8 sps:$4 sm:$0xff]  }
 0x12f   : > { %1819 = vmatpush1.bf16.msra.mxu0 %v8275_v55  ;;  %v8301_v55 = vld [vmem:[%s11765_s1 + $0x504] ss:$8 sps:$4 sm:$0xff]  }
 0x130   : > { %1820 = vmatprep.subr.bf16.mxu0 %v8280_v8  ;;  %v1601_v8 = vpack.c.bf16 %v9504_v46, %v9469_v22  ;;  %v8350_v22 = vld [vmem:[%s11765_s1 + $0x610] ss:$8 sps:$4 sm:$0xff]   ;;  %v8353_v46 = vld [vmem:[%s11765_s1 + $0x620] ss:$8 sps:$4 sm:$0xff]  }
 0x133   : > { %1821 = vmatpush1.bf16.msra.mxu0 %v8278_v35  ;;  %v8299_v35 = vld [vmem:[%s11765_s1 + $0x500] ss:$8 sps:$4 sm:$0xff]  }
 0x134   : > { %1822 = vmatprep.subr.bf16.mxu0 %v8283_v5  ;;  %v8927_v5 = vld [vmem:[%s9021_s18 + $0x28] sm:$0xff] }
 0x137   : > { %1823 = vmatpush1.bf16.msra.mxu0 %v8281_v53  ;;  %v8928_v53 = vld [vmem:[%s9021_s18 + $0x38] sm:$0xff] }
 0x138   : > { %1824 = vmatprep.subr.bf16.mxu0 %v8286_v18  ;;  %v1604_v18 = vpack.c.bf16 %v8928_v53, %v8927_v5  ;;  %v8313_v5 = vld [vmem:[%s11765_s1 + $0x544] ss:$8 sps:$4 sm:$0xff]  }
 0x139   : > { %v8933_v53 = vld [vmem:[%s9021_s18 + $0x40] sm:$0xff] }
 0x13b   : > { %1825 = vmatpush1.bf16.msra.mxu0 %v8284_v10  ;;  %v8304_v10 = vld [vmem:[%s11765_s1 + $0x514] ss:$8 sps:$4 sm:$0xff]  }
 0x13c   : > { %1826 = vmatprep.subr.bf16.mxu0 %v8289_v15  ;;  %v8302_v15 = vld [vmem:[%s11765_s1 + $0x510] ss:$8 sps:$4 sm:$0xff]  }
 0x13f   : > { %1827 = vmatpush1.bf16.msra.mxu0 %v8287_v58  ;;  %v8307_v58 = vld [vmem:[%s11765_s1 + $0x524] ss:$8 sps:$4 sm:$0xff]  }
 0x140   : > { %1828 = vmatprep.subr.bf16.mxu0 %v8292_v39  ;;  %v8929_v39 = vld [vmem:[%s9021_s18 + $0x20] sm:$0xff] }
 0x143   : > { %1829 = vmatpush1.bf16.msra.mxu0 %v8290_v30  ;;  %v8930_v30 = vld [vmem:[%s9021_s18 + $0x30] sm:$0xff] }
 0x144   : > { %1830 = vmatprep.subr.bf16.mxu0 %v8295_v27  ;;  %v1603_v27 = vpack.c.bf16 %v8930_v30, %v8929_v39  ;;  %v8316_v30 = vld [vmem:[%s11765_s1 + $0x554] ss:$8 sps:$4 sm:$0xff]  }
 0x147   : > { %1831 = vmatpush1.bf16.msra.mxu0 %v8293_v25  ;;  %v8305_v25 = vld [vmem:[%s11765_s1 + $0x520] ss:$8 sps:$4 sm:$0xff]  }
 0x148   : > { %1832 = vmatprep.subr.bf16.mxu0 %v8298_v19  ;;  %v8931_v19 = vld [vmem:[%s9021_s18 + $0x48] sm:$0xff] }
 0x14b   : > { %1833 = vmatpush1.bf16.msra.mxu0 %v8296_v24  ;;  %v8932_v24 = vld [vmem:[%s9021_s18 + $0x58] sm:$0xff] }
 0x14c   : > { %2108 = vmatprep.subr.bf16.mxu0 %v8301_v55  ;;  %v1606_v55 = vpack.c.bf16 %v8932_v24, %v8931_v19  ;;  %v8936_v19 = vld [vmem:[%s9021_s18 + $0x60] sm:$0xff] }
 0x14d   : > { %v1607_v24 = vpack.c.bf16 %v9718_v36, %v8936_v19  ;;  %v8341_v19 = vld [vmem:[%s11765_s1 + $0x5e0] ss:$8 sps:$4 sm:$0xff]  }
 0x14e   : > { %1835 = vmatmul.mubr.bf16.vlgmr.msra.gmra.mrb[0].mxu0 %v1601_v8  ;;  %v8310_v8 = vld [vmem:[%s11765_s1 + $0x534] ss:$8 sps:$4 sm:$0xff]  }
 0x14f   : > { %2109 = vmatpush1.bf16.msra.mxu0 %v8299_v35  ;;  %1844 = vmatprep.mubr.bf16.mxu0 %v1604_v18  ;;  %v8308_v35 = vld [vmem:[%s11765_s1 + $0x530] ss:$8 sps:$4 sm:$0xff]  }
 0x150   : > { %2110 = vmatprep.subr.bf16.mxu0 %v8304_v10  ;;  %v8934_v18 = vld [vmem:[%s9021_s18 + $0x50] sm:$0xff] }
 0x151   : > { %v1605_v10 = vpack.c.bf16 %v8934_v18, %v8933_v53  ;;  %v8331_v53 = vld [vmem:[%s11765_s1 + $0x5a4] ss:$8 sps:$4 sm:$0xff]   ;;  %v8329_v18 = vld [vmem:[%s11765_s1 + $0x5a0] ss:$8 sps:$4 sm:$0xff]  }
 0x153   : > { %2111 = vmatpush1.bf16.msra.mxu0 %v8302_v15  ;;  %v8311_v15 = vld [vmem:[%s11765_s1 + $0x540] ss:$8 sps:$4 sm:$0xff]  }
 0x154   : > { %2112 = vmatprep.subr.bf16.mxu0 %v8307_v58  ;;  %v8935_v58 = vld [vmem:[%s9021_s18 + $0x68] sm:$0xff] }
 0x155   : > { %v1608_v39 = vpack.c.bf16 %v9693_v37, %v8935_v58  ;;  %v8337_v58 = vld [vmem:[%s11765_s1 + $0x5c4] ss:$8 sps:$4 sm:$0xff]  }
 0x156   : > { %1845 = vmatmul.mubr.bf16.gmra.mrb[4].mxu0 %v1603_v27  ;;  %v8314_v27 = vld [vmem:[%s11765_s1 + $0x550] ss:$8 sps:$4 sm:$0xff]  }
 0x157   : > { %2113 = vmatpush1.bf16.msra.mxu0 %v8305_v25  ;;  %1854 = vmatprep.mubr.bf16.mxu0 %v1606_v55  ;;  %v8319_v25 = vld [vmem:[%s11765_s1 + $0x564] ss:$8 sps:$4 sm:$0xff]   ;;  %v8317_v55 = vld [vmem:[%s11765_s1 + $0x560] ss:$8 sps:$4 sm:$0xff]  }
 0x158   : > { %2114 = vmatprep.subr.bf16.mxu0 %v8310_v8  ;;  %v7520_v8 = vpack.c.bf16 %v329_v33, %v327_v20  ;;  %v8328_v20 = vld [vmem:[%s11765_s1 + $0x594] ss:$8 sps:$4 sm:$0xff]   ;;  %v8326_v33 = vld [vmem:[%s11765_s1 + $0x590] ss:$8 sps:$4 sm:$0xff]  }
 0x15b   : > { %2115 = vmatpush1.bf16.msra.mxu0 %v8308_v35  ;;  %v8322_v35 = vld [vmem:[%s11765_s1 + $0x574] ss:$8 sps:$4 sm:$0xff]  }
 0x15c   : > { %2116 = vmatprep.subr.bf16.mxu0 %v8313_v5  ;;  %v8320_v5 = vld [vmem:[%s11765_s1 + $0x570] ss:$8 sps:$4 sm:$0xff]  }
 0x15e   : > { %1855 = vmatmul.mubr.bf16.gmra.mrb[8].mxu0 %v1605_v10  ;;  %v8334_v10 = vld [vmem:[%s11765_s1 + $0x5b4] ss:$8 sps:$4 sm:$0xff]  }
 0x15f   : > { %2117 = vmatpush1.bf16.msra.mxu0 %v8311_v15  ;;  %1864 = vmatprep.mubr.bf16.mxu0 %v1608_v39  ;;  %v8332_v15 = vld [vmem:[%s11765_s1 + $0x5b0] ss:$8 sps:$4 sm:$0xff]   ;;  %v8335_v39 = vld [vmem:[%s11765_s1 + $0x5c0] ss:$8 sps:$4 sm:$0xff]  }
 0x160   : > { %2118 = vmatprep.subr.bf16.mxu0 %v8316_v30  ;;  %v8340_v30 = vld [vmem:[%s11765_s1 + $0x5d4] ss:$8 sps:$4 sm:$0xff]  }
 0x163   : > { %2119 = vmatpush1.bf16.msra.mxu0 %v8314_v27  ;;  %v8338_v27 = vld [vmem:[%s11765_s1 + $0x5d0] ss:$8 sps:$4 sm:$0xff]  }
 0x164   : > { %2120 = vmatprep.subr.bf16.mxu0 %v8319_v25  ;;  %v8343_v25 = vld [vmem:[%s11765_s1 + $0x5e4] ss:$8 sps:$4 sm:$0xff]  }
 0x166   : > { %1865 = vmatmul.mubr.bf16.gmra.mrb[12].mxu0 %v1607_v24  ;;  %v8346_v24 = vld [vmem:[%s11765_s1 + $0x5f4] ss:$8 sps:$4 sm:$0xff]  }
 0x167   : > { %2121 = vmatpush1.bf16.msra.mxu0 %v8317_v55  ;;  %7521 = vmatprep.mubr.msk.bf16.mxu0 %vm9474_vm7, %v7520_v8  ;;  %v8344_v55 = vld [vmem:[%s11765_s1 + $0x5f0] ss:$8 sps:$4 sm:$0xff]   ;;  %v8349_v8 = vld [vmem:[%s11765_s1 + $0x604] ss:$8 sps:$4 sm:$0xff]  }
 0x168   : > { %2122 = vmatprep.subr.bf16.mxu0 %v8322_v35  ;;  %v7523_v35 = vpack.c.bf16 %v328_v48, %v326_v23  ;;  %v11814_v23 = vrot.slane %v9160_v57, 1  ;;  %v11815_v48 = vrot.slane %v9140_v51, 1  ;;  %v341_v51 = vrot.slane %v9693_v37, 1  ;;  %v8361_v57 = vld [vmem:[%s11765_s1 + $0x644] ss:$8 sps:$4 sm:$0xff]  }
 0x16b   : > { %2123 = vmatpush1.bf16.msra.mxu0 %v8320_v5  ;;  %v8347_v5 = vld [vmem:[%s11765_s1 + $0x600] ss:$8 sps:$4 sm:$0xff]  }
 0x16c   : > { %2124 = vmatprep.subr.bf16.mxu0 %v8325_v13  ;;  %v7526_v13 = vpack.c.bf16 %v333_v63, %v331_v34  ;;  %v7529_v34 = vpack.c.bf16 %v11814_v23, %v11813_v50  ;;  %v7532_v63 = vpack.c.bf16 %v337_v43, %v11815_v48  ;;  %v7535_v43 = vpack.c.bf16 %v336_v32, %v11816_v60  ;;  %v8394_v50 = vld [vmem:[%s11765_s1 + $0x6f4] ss:$8 sps:$4 sm:$0xff]   ;;  %v8392_v23 = vld [vmem:[%s11765_s1 + $0x6f0] ss:$8 sps:$4 sm:$0xff]   ;;  %v8407_v60 = vld [vmem:[%s11765_s1 + $0x740] ss:$8 sps:$4 sm:$0xff]  }
 0x16d   : > { %v11818_v32 = vrot.slane %v9203_v6, 1  ;;  %v8368_v6 = vld [vmem:[%s11765_s1 + $0x670] ss:$8 sps:$4 sm:$0xff]   ;;  %v8400_v48 = vld [vmem:[%s11765_s1 + $0x714] ss:$8 sps:$4 sm:$0xff]  }
 0x16f   : > { %2125 = vmatpush1.bf16.msra.mxu0 %v8323_v41  ;;  %v8352_v41 = vld [vmem:[%s11765_s1 + $0x614] ss:$8 sps:$4 sm:$0xff]  }
 0x170   : > { %2126 = vmatprep.subr.bf16.mxu0 %v8328_v20  ;;  %v8358_v20 = vld [vmem:[%s11765_s1 + $0x634] ss:$8 sps:$4 sm:$0xff]  }
 0x173   : > { %2127 = vmatpush1.bf16.msra.mxu0 %v8326_v33  ;;  %v8359_v33 = vld [vmem:[%s11765_s1 + $0x640] ss:$8 sps:$4 sm:$0xff]  }
 0x174   : > { %2128 = vmatprep.subr.bf16.mxu0 %v8331_v53  ;;  %v11817_v53 = vrot.slane %v9174_v61, 1  ;;  %v8367_v61 = vld [vmem:[%s11765_s1 + $0x664] ss:$8 sps:$4 sm:$0xff]  }
 0x177   : > { %2129 = vmatpush1.bf16.msra.mxu0 %v8329_v18  ;;  %v7538_v18 = vpack.c.bf16 %v341_v51, %v11817_v53 }
 0x178   : > { %2130 = vmatprep.subr.bf16.mxu0 %v8334_v10  ;;  %v8364_v10 = vld [vmem:[%s11765_s1 + $0x654] ss:$8 sps:$4 sm:$0xff]  }
 0x17b   : > { %2131 = vmatpush1.bf16.msra.mxu0 %v8332_v15  ;;  %v7541_v15 = vpack.c.bf16 %v340_v59, %v11818_v32  ;;  %v8421_v32 = vld [vmem:[%s11765_s1 + $0x784] ss:$8 sps:$4 sm:$0xff]  }
 0x17c   : > { %2132 = vmatprep.subr.bf16.mxu0 %v8337_v58  ;;  %v8365_v58 = vld [vmem:[%s11765_s1 + $0x660] ss:$8 sps:$4 sm:$0xff]  }
 0x17f   : > { %2133 = vmatpush1.bf16.msra.mxu0 %v8335_v39  ;;  %v8370_v39 = vld [vmem:[%s11765_s1 + $0x674] ss:$8 sps:$4 sm:$0xff]  }
 0x180   : > { %2134 = vmatprep.subr.bf16.mxu0 %v8340_v30  ;;  %v8373_v30 = vld [vmem:[%s11765_s1 + $0x684] ss:$8 sps:$4 sm:$0xff]  }
 0x183   : > { %2135 = vmatpush1.bf16.msra.mxu0 %v8338_v27  ;;  %v8371_v27 = vld [vmem:[%s11765_s1 + $0x680] ss:$8 sps:$4 sm:$0xff]  }
 0x184   : > { %2136 = vmatprep.subr.bf16.mxu0 %v8343_v25  ;;  %v8376_v25 = vld [vmem:[%s11765_s1 + $0x694] ss:$8 sps:$4 sm:$0xff]  }
 0x187   : > { %2137 = vmatpush1.bf16.msra.mxu0 %v8341_v19  ;;  %v8379_v19 = vld [vmem:[%s11765_s1 + $0x6a4] ss:$8 sps:$4 sm:$0xff]  }
 0x188   : > { %2138 = vmatprep.subr.bf16.mxu0 %v8346_v24  ;;  %v8377_v24 = vld [vmem:[%s11765_s1 + $0x6a0] ss:$8 sps:$4 sm:$0xff]  }
 0x18b   : > { %2139 = vmatpush1.bf16.msra.mxu0 %v8344_v55  ;;  %v8382_v55 = vld [vmem:[%s11765_s1 + $0x6b4] ss:$8 sps:$4 sm:$0xff]  }
 0x18c   : > { %2415 = vmatprep.subr.bf16.mxu0 %v8349_v8  ;;  %v8380_v8 = vld [vmem:[%s11765_s1 + $0x6b0] ss:$8 sps:$4 sm:$0xff]  }
 0x18e   : > { %7524 = vmatmul.mubr.msk.bf16.vlgmr.msra.gmra.mrb[0].mxu0 %vm9474_vm7, %v7523_v35  ;;  %v8385_v35 = vld [vmem:[%s11765_s1 + $0x6c4] ss:$8 sps:$4 sm:$0xff]  }
 0x18f   : > { %2416 = vmatpush1.bf16.msra.mxu0 %v8347_v5  ;;  %7527 = vmatprep.mubr.msk.bf16.mxu0 %vm9474_vm7, %v7526_v13  ;;  %v8383_v5 = vld [vmem:[%s11765_s1 + $0x6c0] ss:$8 sps:$4 sm:$0xff]   ;;  %v8388_v13 = vld [vmem:[%s11765_s1 + $0x6d4] ss:$8 sps:$4 sm:$0xff]  }
 0x190   : > { %2417 = vmatprep.subr.bf16.mxu0 %v8352_v41  ;;  %v8386_v41 = vld [vmem:[%s11765_s1 + $0x6d0] ss:$8 sps:$4 sm:$0xff]  }
 0x193   : > { %2418 = vmatpush1.bf16.msra.mxu0 %v8350_v22  ;;  %v8391_v22 = vld [vmem:[%s11765_s1 + $0x6e4] ss:$8 sps:$4 sm:$0xff]  }
 0x194   : > { %2419 = vmatprep.subr.bf16.mxu0 %v8355_v42  ;;  %v8389_v42 = vld [vmem:[%s11765_s1 + $0x6e0] ss:$8 sps:$4 sm:$0xff]  }
 0x196   : > { %7530 = vmatmul.mubr.msk.bf16.gmra.mrb[4].mxu0 %vm9474_vm7, %v7529_v34  ;;  %v8397_v34 = vld [vmem:[%s11765_s1 + $0x704] ss:$8 sps:$4 sm:$0xff]  }
 0x197   : > { %2420 = vmatpush1.bf16.msra.mxu0 %v8353_v46  ;;  %7533 = vmatprep.mubr.msk.bf16.mxu0 %vm9474_vm7, %v7532_v63  ;;  %v8395_v46 = vld [vmem:[%s11765_s1 + $0x700] ss:$8 sps:$4 sm:$0xff]   ;;  %v8398_v63 = vld [vmem:[%s11765_s1 + $0x710] ss:$8 sps:$4 sm:$0xff]  }
 0x198   : > { %2421 = vmatprep.subr.bf16.mxu0 %v8358_v20  ;;  %v8403_v20 = vld [vmem:[%s11765_s1 + $0x724] ss:$8 sps:$4 sm:$0xff]  }
 0x19b   : > { %2422 = vmatpush1.bf16.msra.mxu0 %v8356_v49  ;;  %v8401_v49 = vld [vmem:[%s11765_s1 + $0x720] ss:$8 sps:$4 sm:$0xff]  }
 0x19c   : > { %2423 = vmatprep.subr.bf16.mxu0 %v8361_v57  ;;  %v8409_v57 = vld [vmem:[%s11765_s1 + $0x744] ss:$8 sps:$4 sm:$0xff]  }
 0x19e   : > { %7536 = vmatmul.mubr.msk.bf16.gmra.mrb[8].mxu0 %vm9474_vm7, %v7535_v43 }
 0x19f   : > { %2424 = vmatpush1.bf16.msra.mxu0 %v8359_v33  ;;  %7539 = vmatprep.mubr.msk.bf16.mxu0 %vm9474_vm7, %v7538_v18  ;;  %v8412_v33 = vld [vmem:[%s11765_s1 + $0x754] ss:$8 sps:$4 sm:$0xff]  }
 0x1a0   : > { %2425 = vmatprep.subr.bf16.mxu0 %v8364_v10  ;;  %v8418_v18 = vld [vmem:[%s11765_s1 + $0x774] ss:$8 sps:$4 sm:$0xff]   ;;  %v8491_v10 = vld [vmem:[%s11766_s2 + $0x104] ss:$8 sps:$4 sm:$0xff]  }
 0x1a1   : > { %3656 = vmatprep.subr.bf16.mxu1 %v8491_v10  ;;  %v8446_v10 = vld [vmem:[%s11765_s1 + $0x810] ss:$8 sps:$4 sm:$0xff]  }
 0x1a3   : > { %2426 = vmatpush1.bf16.msra.mxu0 %v8362_v3  ;;  %v8494_v3 = vld [vmem:[%s11766_s2 + $0x114] ss:$8 sps:$4 sm:$0xff]  }
 0x1a4   : > { %2427 = vmatprep.subr.bf16.mxu0 %v8367_v61  ;;  %v8416_v61 = vld [vmem:[%s11765_s1 + $0x770] ss:$8 sps:$4 sm:$0xff]  }
 0x1a6   : > { %7542 = vmatmul.mubr.msk.bf16.gmra.mrb[12].mxu0 %vm9474_vm7, %v7541_v15  ;;  %v8496_v15 = vld [vmem:[%s11766_s2 + $0x110] ss:$8 sps:$4 sm:$0xff]  }
 0x1a7   : > { %2428 = vmatpush1.bf16.msra.mxu0 %v8365_v58  ;;  %7547 = vmatprep.mubr.msk.bf16.mxu0 %vm9297_vm4, %v9308_v47  ;;  %v8374_v47 = vld [vmem:[%s11765_s1 + $0x690] ss:$8 sps:$4 sm:$0xff]   ;;  %v8497_v58 = vld [vmem:[%s11766_s2 + $0x124] ss:$8 sps:$4 sm:$0xff]  }
 0x1a8   : > { %2429 = vmatprep.subr.bf16.mxu0 %v8370_v39  ;;  %v8424_v39 = vld [vmem:[%s11765_s1 + $0x794] ss:$8 sps:$4 sm:$0xff]  }
 0x1ab   : > { %2430 = vmatpush1.bf16.msra.mxu0 %v8368_v6  ;;  %v8499_v6 = vld [vmem:[%s11766_s2 + $0x120] ss:$8 sps:$4 sm:$0xff]  }
 0x1ac   : > { %2431 = vmatprep.subr.bf16.mxu0 %v8373_v30  ;;  %v8500_v30 = vld [vmem:[%s11766_s2 + $0x134] ss:$8 sps:$4 sm:$0xff]  }
 0x1af   : > { %2432 = vmatpush1.bf16.msra.mxu0 %v8371_v27  ;;  %v8422_v27 = vld [vmem:[%s11765_s1 + $0x790] ss:$8 sps:$4 sm:$0xff]  }
 0x1b0   : > { %2433 = vmatprep.subr.bf16.mxu0 %v8376_v25  ;;  %v8427_v25 = vld [vmem:[%s11765_s1 + $0x7a4] ss:$8 sps:$4 sm:$0xff]  }
 0x1b3   : > { %2434 = vmatpush1.bf16.msra.mxu0 %v8374_v47  ;;  %v8502_v47 = vld [vmem:[%s11766_s2 + $0x130] ss:$8 sps:$4 sm:$0xff]  }
 0x1b4   : > { %2435 = vmatprep.subr.bf16.mxu0 %v8379_v19  ;;  %v8503_v19 = vld [vmem:[%s11766_s2 + $0x144] ss:$8 sps:$4 sm:$0xff]  }
 0x1b7   : > { %2436 = vmatpush1.bf16.msra.mxu0 %v8377_v24  ;;  %v8425_v24 = vld [vmem:[%s11765_s1 + $0x7a0] ss:$8 sps:$4 sm:$0xff]  }
 0x1b8   : > { %2437 = vmatprep.subr.bf16.mxu0 %v8382_v55  ;;  %v8430_v55 = vld [vmem:[%s11765_s1 + $0x7b4] ss:$8 sps:$4 sm:$0xff]  }
 0x1bb   : > { %2438 = vmatpush1.bf16.msra.mxu0 %v8380_v8  ;;  %v8505_v8 = vld [vmem:[%s11766_s2 + $0x140] ss:$8 sps:$4 sm:$0xff]  }
 0x1bc   : > { %2439 = vmatprep.subr.bf16.mxu0 %v8385_v35  ;;  %v8506_v35 = vld [vmem:[%s11766_s2 + $0x154] ss:$8 sps:$4 sm:$0xff]  }
 0x1bf   : > { %2440 = vmatpush1.bf16.msra.mxu0 %v8383_v5  ;;  %v8428_v5 = vld [vmem:[%s11765_s1 + $0x7b0] ss:$8 sps:$4 sm:$0xff]  }
 0x1c0   : > { %2441 = vmatprep.subr.bf16.mxu0 %v8388_v13  ;;  %v8433_v13 = vld [vmem:[%s11765_s1 + $0x7c4] ss:$8 sps:$4 sm:$0xff]  }
 0x1c3   : > { %2442 = vmatpush1.bf16.msra.mxu0 %v8386_v41  ;;  %v8508_v41 = vld [vmem:[%s11766_s2 + $0x150] ss:$8 sps:$4 sm:$0xff]  }
 0x1c4   : > { %2443 = vmatprep.subr.bf16.mxu0 %v8391_v22  ;;  %v8509_v22 = vld [vmem:[%s11766_s2 + $0x164] ss:$8 sps:$4 sm:$0xff]  }
 0x1c7   : > { %2444 = vmatpush1.bf16.msra.mxu0 %v8389_v42  ;;  %v8431_v42 = vld [vmem:[%s11765_s1 + $0x7c0] ss:$8 sps:$4 sm:$0xff]  }
 0x1c8   : > { %2445 = vmatprep.subr.bf16.mxu0 %v8394_v50  ;;  %v8436_v50 = vld [vmem:[%s11765_s1 + $0x7d4] ss:$8 sps:$4 sm:$0xff]  }
 0x1cb   : > { %2446 = vmatpush1.bf16.msra.mxu0 %v8392_v23  ;;  %v8511_v23 = vld [vmem:[%s11766_s2 + $0x160] ss:$8 sps:$4 sm:$0xff]  }
 0x1cc   : > { %2722 = vmatprep.subr.bf16.mxu0 %v8397_v34  ;;  %v8512_v34 = vld [vmem:[%s11766_s2 + $0x174] ss:$8 sps:$4 sm:$0xff]  }
 0x1ce   : > { %7552 = vmatmul.mubr.msk.bf16.vlgmr.msra.gmra.mrb[0].mxu0 %vm9297_vm4, %v9328_v56  ;;  %v8406_v56 = vld [vmem:[%s11765_s1 + $0x734] ss:$8 sps:$4 sm:$0xff]  }
 0x1cf   : > { %2723 = vmatpush1.bf16.msra.mxu0 %v8395_v46  ;;  %7557 = vmatprep.mubr.msk.bf16.mxu0 %vm9297_vm4, %v9340_v0  ;;  %v8404_v0 = vld [vmem:[%s11765_s1 + $0x730] ss:$8 sps:$4 sm:$0xff]  }
 0x1d0   : > { %2724 = vmatprep.subr.bf16.mxu0 %v8400_v48  ;;  %v8434_v46 = vld [vmem:[%s11765_s1 + $0x7d0] ss:$8 sps:$4 sm:$0xff]   ;;  %v8439_v48 = vld [vmem:[%s11765_s1 + $0x7e4] ss:$8 sps:$4 sm:$0xff]  }
 0x1d3   : > { %2725 = vmatpush1.bf16.msra.mxu0 %v8398_v63  ;;  %v8514_v63 = vld [vmem:[%s11766_s2 + $0x170] ss:$8 sps:$4 sm:$0xff]  }
 0x1d4   : > { %2726 = vmatprep.subr.bf16.mxu0 %v8403_v20  ;;  %v8515_v20 = vld [vmem:[%s11766_s2 + $0x184] ss:$8 sps:$4 sm:$0xff]  }
 0x1d6   : > { %7562 = vmatmul.mubr.msk.bf16.gmra.mrb[4].mxu0 %vm9297_vm4, %v9362_v12  ;;  %v11819_v12 = vmov 0.0  }
 0x1d7   : > { %2727 = vmatpush1.bf16.msra.mxu0 %v8401_v49  ;;  %7567 = vmatprep.mubr.msk.bf16.mxu0 %vm9297_vm4, %v9374_v17  ;;  %v7575_v43 = vpack.c.bf16 %v11819_v12, %v275_v28  ;;  %v11820_v17 = vmov 0  ;;  %v8410_v28 = vld [vmem:[%s11765_s1 + $0x750] ss:$8 sps:$4 sm:$0xff]   ;;  %v7579_v53 = vpack.c.bf16 %v11819_v12, %v274_v2  ;;  %v8493_v2 = vld [vmem:[%s11766_s2 + $0x100] ss:$8 sps:$4 sm:$0xff]  }
 0x1d8   : > { %2728 = vmatprep.subr.bf16.mxu0 %v8406_v56  ;;  %v11821_v17 = vsel %vm10109_vm8, 4294967295, %v11820_v17  ;;  %3657 = vmatpush1.bf16.msra.mxu1 %v8493_v2  ;;  %v8437_v49 = vld [vmem:[%s11765_s1 + $0x7e0] ss:$8 sps:$4 sm:$0xff]   ;;  %v8442_v56 = vld [vmem:[%s11765_s1 + $0x7f4] ss:$8 sps:$4 sm:$0xff]  }
 0x1d9   : > { %11822 = vst [vmem:[#allocation3_spill] sm:$0xff] %v11821_v17  ;;  %3658 = vmatprep.subr.bf16.mxu1 %v8494_v3  ;;  %v8451_v2 = vld [vmem:[%s11765_s1 + $0x824] ss:$8 sps:$4 sm:$0xff]  }
 0x1da   : > { %v8527_v3 = vld [vmem:[%s11766_s2 + $0x1c4] ss:$8 sps:$4 sm:$0xff]  }
 0x1db   : > { %2729 = vmatpush1.bf16.msra.mxu0 %v8404_v0  ;;  %v8517_v0 = vld [vmem:[%s11766_s2 + $0x180] ss:$8 sps:$4 sm:$0xff]  }
 0x1dc   : > { %2730 = vmatprep.subr.bf16.mxu0 %v8409_v57  ;;  %3659 = vmatpush1.bf16.msra.mxu1 %v8496_v15  ;;  %v8518_v57 = vld [vmem:[%s11766_s2 + $0x194] ss:$8 sps:$4 sm:$0xff]  }
 0x1dd   : > { %3660 = vmatprep.subr.bf16.mxu1 %v8497_v58  ;;  %v8530_v15 = vld [vmem:[%s11766_s2 + $0x1d4] ss:$8 sps:$4 sm:$0xff]   ;;  %v8452_v58 = vld [vmem:[%s11765_s1 + $0x830] ss:$8 sps:$4 sm:$0xff]  }
 0x1de   : > { %7572 = vmatmul.mubr.msk.bf16.gmra.mrb[8].mxu0 %vm9297_vm4, %v9398_v26  ;;  %v8413_v26 = vld [vmem:[%s11765_s1 + $0x760] ss:$8 sps:$4 sm:$0xff]  }
 0x1df   : > { %2731 = vmatpush1.bf16.msra.mxu0 %v8407_v60  ;;  %7576 = vmatprep.mubr.msk.bf16.mxu0 %vm10109_vm8, %v7575_v43  ;;  %v8440_v60 = vld [vmem:[%s11765_s1 + $0x7f0] ss:$8 sps:$4 sm:$0xff]   ;;  %v8445_v43 = vld [vmem:[%s11765_s1 + $0x804] ss:$8 sps:$4 sm:$0xff]  }
 0x1e0   : > { %2732 = vmatprep.subr.bf16.mxu0 %v8412_v33  ;;  %3661 = vmatpush1.bf16.msra.mxu1 %v8499_v6  ;;  %v8520_v33 = vld [vmem:[%s11766_s2 + $0x190] ss:$8 sps:$4 sm:$0xff]  }
 0x1e1   : > { %3662 = vmatprep.subr.bf16.mxu1 %v8500_v30  ;;  %v8458_v6 = vld [vmem:[%s11765_s1 + $0x850] ss:$8 sps:$4 sm:$0xff]   ;;  %v8463_v30 = vld [vmem:[%s11765_s1 + $0x864] ss:$8 sps:$4 sm:$0xff]  }
 0x1e3   : > { %2733 = vmatpush1.bf16.msra.mxu0 %v8410_v28  ;;  %v8521_v28 = vld [vmem:[%s11766_s2 + $0x1a4] ss:$8 sps:$4 sm:$0xff]  }
 0x1e4   : > { %2734 = vmatprep.subr.bf16.mxu0 %v8415_v7  ;;  %3663 = vmatpush1.bf16.msra.mxu1 %v8502_v47  ;;  %v8443_v7 = vld [vmem:[%s11765_s1 + $0x800] ss:$8 sps:$4 sm:$0xff]   ;;  %v8464_v47 = vld [vmem:[%s11765_s1 + $0x870] ss:$8 sps:$4 sm:$0xff]  }
 0x1e5   : > { %3664 = vmatprep.subr.bf16.mxu1 %v8503_v19  ;;  %v8469_v19 = vld [vmem:[%s11765_s1 + $0x884] ss:$8 sps:$4 sm:$0xff]  }
 0x1e6   : > { %7580 = vmatmul.mubr.msk.bf16.gmra.mrb[12].mxu0 %vm10109_vm8, %v7579_v53  ;;  %v8448_v53 = vld [vmem:[%s11765_s1 + $0x814] ss:$8 sps:$4 sm:$0xff]  }
 0x1e7   : > { %2735 = vmatpush1.bf16.msra.mxu0 %v8413_v26  ;;  %2754 = vmatprep.mubr.bf16.mxu0 %v9121_v45  ;;  %v8419_v45 = vld [vmem:[%s11765_s1 + $0x780] ss:$8 sps:$4 sm:$0xff]  }
 0x1e8   : > { %2736 = vmatprep.subr.bf16.mxu0 %v8418_v18  ;;  %3665 = vmatpush1.bf16.msra.mxu1 %v8505_v8  ;;  %v8523_v26 = vld [vmem:[%s11766_s2 + $0x1a0] ss:$8 sps:$4 sm:$0xff]   ;;  %v8524_v18 = vld [vmem:[%s11766_s2 + $0x1b4] ss:$8 sps:$4 sm:$0xff]   ;;  %v8475_v8 = vld [vmem:[%s11765_s1 + $0x8a4] ss:$8 sps:$4 sm:$0xff]  }
 0x1e9   : > { %3666 = vmatprep.subr.bf16.mxu1 %v8506_v35  ;;  %v8473_v35 = vld [vmem:[%s11765_s1 + $0x8a0] ss:$8 sps:$4 sm:$0xff]  }
 0x1eb   : > { %2737 = vmatpush1.bf16.msra.mxu0 %v8416_v61  ;;  %v8454_v61 = vld [vmem:[%s11765_s1 + $0x834] ss:$8 sps:$4 sm:$0xff]  }
 0x1ec   : > { %2738 = vmatprep.subr.bf16.mxu0 %v8421_v32  ;;  %3667 = vmatpush1.bf16.msra.mxu1 %v8508_v41  ;;  %v8529_v32 = vld [vmem:[%s11766_s2 + $0x1c0] ss:$8 sps:$4 sm:$0xff]   ;;  %v8481_v41 = vld [vmem:[%s11765_s1 + $0x8c4] ss:$8 sps:$4 sm:$0xff]  }
 0x1ed   : > { %3668 = vmatprep.subr.bf16.mxu1 %v8509_v22  ;;  %v8479_v22 = vld [vmem:[%s11765_s1 + $0x8c0] ss:$8 sps:$4 sm:$0xff]  }
 0x1ef   : > { %2739 = vmatpush1.bf16.msra.mxu0 %v8419_v45  ;;  %v8457_v45 = vld [vmem:[%s11765_s1 + $0x844] ss:$8 sps:$4 sm:$0xff]  }
 0x1f0   : > { %2740 = vmatprep.subr.bf16.mxu0 %v8424_v39  ;;  %3669 = vmatpush1.bf16.msra.mxu1 %v8511_v23  ;;  %v2528_v39 = vpack.c.bf16 %v11819_v12, %v9693_v37  ;;  %v8487_v23 = vld [vmem:[%s11765_s1 + $0x8e4] ss:$8 sps:$4 sm:$0xff]   ;;  %v8536_v37 = vld [vmem:[%s11766_s2 + $0x1f4] ss:$8 sps:$4 sm:$0xff]  }
 0x1f1   : > { %3670 = vmatprep.subr.bf16.mxu1 %v8512_v34  ;;  %v8485_v34 = vld [vmem:[%s11765_s1 + $0x8e0] ss:$8 sps:$4 sm:$0xff]  }
 0x1f3   : > { %2741 = vmatpush1.bf16.msra.mxu0 %v8422_v27  ;;  %v2527_v27 = vpack.c.bf16 %v11819_v12, %v9718_v36  ;;  %v8538_v36 = vld [vmem:[%s11766_s2 + $0x1f0] ss:$8 sps:$4 sm:$0xff]  }
 0x1f4   : > { %2742 = vmatprep.subr.bf16.mxu0 %v8427_v25  ;;  %3671 = vmatpush1.bf16.msra.mxu1 %v8514_v63  ;;  %v8461_v25 = vld [vmem:[%s11765_s1 + $0x860] ss:$8 sps:$4 sm:$0xff]   ;;  %v7600_v63 = vpack.c.bf16 %v11819_v12, %v341_v51  ;;  %v8541_v51 = vld [vmem:[%s11766_s2 + $0x4] ss:$8 sps:$4 sm:$0xff]  }
 0x1f5   : > { %3672 = vmatprep.subr.bf16.mxu1 %v8515_v20 }
 0x1f7   : > { %2743 = vmatpush1.bf16.msra.mxu0 %v8425_v24  ;;  %v8467_v24 = vld [vmem:[%s11765_s1 + $0x880] ss:$8 sps:$4 sm:$0xff]  }
 0x1f8   : > { %2744 = vmatprep.subr.bf16.mxu0 %v8430_v55  ;;  %3673 = vmatpush1.bf16.msra.mxu1 %v8517_v0  ;;  %v8472_v55 = vld [vmem:[%s11765_s1 + $0x894] ss:$8 sps:$4 sm:$0xff]  }
 0x1f9   : > { %3674 = vmatprep.subr.bf16.mxu1 %v8518_v57  ;;  %v6866_v57 = vld [vmem:[%s11767_s3 + $0x1] ss:$8 sm:$0x3] }
 0x1fb   : > { %2745 = vmatpush1.bf16.msra.mxu0 %v8428_v5  ;;  %v8478_v5 = vld [vmem:[%s11765_s1 + $0x8b4] ss:$8 sps:$4 sm:$0xff]  }
 0x1fc   : > { %2746 = vmatprep.subr.bf16.mxu0 %v8433_v13  ;;  %3675 = vmatpush1.bf16.msra.mxu1 %v8520_v33  ;;  %v8476_v13 = vld [vmem:[%s11765_s1 + $0x8b0] ss:$8 sps:$4 sm:$0xff]  }
 0x1fd   : > { %3676 = vmatprep.subr.bf16.mxu1 %v8521_v28 }
 0x1ff   : > { %2747 = vmatpush1.bf16.msra.mxu0 %v8431_v42  ;;  %v8484_v42 = vld [vmem:[%s11765_s1 + $0x8d4] ss:$8 sps:$4 sm:$0xff]  }
 0x200   : > { %2748 = vmatprep.subr.bf16.mxu0 %v8436_v50  ;;  %3677 = vmatpush1.bf16.msra.mxu1 %v8523_v26  ;;  %v8482_v50 = vld [vmem:[%s11765_s1 + $0x8d0] ss:$8 sps:$4 sm:$0xff]  }
 0x201   : > { %3678 = vmatprep.subr.bf16.mxu1 %v8524_v18 }
 0x203   : > { %2749 = vmatpush1.bf16.msra.mxu0 %v8434_v46  ;;  %v8490_v46 = vld [vmem:[%s11765_s1 + $0x8f4] ss:$8 sps:$4 sm:$0xff]  }
 0x204   : > { %2750 = vmatprep.subr.bf16.mxu0 %v8439_v48  ;;  %v8488_v48 = vld [vmem:[%s11765_s1 + $0x8f0] ss:$8 sps:$4 sm:$0xff]  }
 0x207   : > { %2751 = vmatpush1.bf16.msra.mxu0 %v8437_v49 }
 0x208   : > { %2752 = vmatprep.subr.bf16.mxu0 %v8442_v56  ;;  %v3118_v56 = vld [vmem:[%s11767_s3] ss:$8 sm:$0x3] }
 0x20b   : > { %2753 = vmatpush1.bf16.msra.mxu0 %v8440_v60 }
 0x20c   : > { %3029 = vmatprep.subr.bf16.mxu0 %v8445_v43 }
 0x20e   : > { %2755 = vmatmul.mubr.bf16.vlgmr.msra.gmra.mrb[0].mxu0 %v9144_v52  ;;  %v8526_v52 = vld [vmem:[%s11766_s2 + $0x1b0] ss:$8 sps:$4 sm:$0xff]  }
 0x20f   : > { %3030 = vmatpush1.bf16.msra.mxu0 %v8443_v7  ;;  %2764 = vmatprep.mubr.bf16.mxu0 %v9151_v54  ;;  %v8449_v54 = vld [vmem:[%s11765_s1 + $0x820] ss:$8 sps:$4 sm:$0xff]  }
 0x210   : > { %3031 = vmatprep.subr.bf16.mxu0 %v8448_v53  ;;  %3679 = vmatpush1.bf16.msra.mxu1 %v8526_v52 }
 0x211   : > { %3680 = vmatprep.subr.bf16.mxu1 %v8527_v3 }
 0x213   : > { %3032 = vmatpush1.bf16.msra.mxu0 %v8446_v10 }
 0x214   : > { %3033 = vmatprep.subr.bf16.mxu0 %v8451_v2  ;;  %3681 = vmatpush1.bf16.msra.mxu1 %v8529_v32 }
 0x215   : > { %3682 = vmatprep.subr.bf16.mxu1 %v8530_v15 }
 0x216   : > { %2765 = vmatmul.mubr.bf16.gmra.mrb[4].mxu0 %v9178_v62  ;;  %v8455_v62 = vld [vmem:[%s11765_s1 + $0x840] ss:$8 sps:$4 sm:$0xff]  }
 0x217   : > { %3034 = vmatpush1.bf16.msra.mxu0 %v8449_v54  ;;  %2774 = vmatprep.mubr.bf16.mxu0 %v9188_v1  ;;  %v8460_v1 = vld [vmem:[%s11765_s1 + $0x854] ss:$8 sps:$4 sm:$0xff]  }
 0x218   : > { %3035 = vmatprep.subr.bf16.mxu0 %v8454_v61 }
 0x21b   : > { %3036 = vmatpush1.bf16.msra.mxu0 %v8452_v58 }
 0x21c   : > { %3037 = vmatprep.subr.bf16.mxu0 %v8457_v45 }
 0x21e   : > { %2775 = vmatmul.mubr.bf16.gmra.mrb[8].mxu0 %v9214_v9  ;;  %v8466_v9 = vld [vmem:[%s11765_s1 + $0x874] ss:$8 sps:$4 sm:$0xff]  }
 0x21f   : > { %3038 = vmatpush1.bf16.msra.mxu0 %v8455_v62  ;;  %2784 = vmatprep.mubr.bf16.mxu0 %v2528_v39 }
 0x220   : > { %3039 = vmatprep.subr.bf16.mxu0 %v8460_v1 }
 0x223   : > { %3040 = vmatpush1.bf16.msra.mxu0 %v8458_v6 }
 0x224   : > { %3041 = vmatprep.subr.bf16.mxu0 %v8463_v30 }
 0x226   : > { %2785 = vmatmul.mubr.bf16.gmra.mrb[12].mxu0 %v2527_v27 }
 0x227   : > { %3042 = vmatpush1.bf16.msra.mxu0 %v8461_v25  ;;  %7583 = vmatprep.mubr.msk.bf16.mxu0 %vm9474_vm7, %v9496_v40  ;;  %v8470_v40 = vld [vmem:[%s11765_s1 + $0x890] ss:$8 sps:$4 sm:$0xff]  }
 0x228   : > { %3043 = vmatprep.subr.bf16.mxu0 %v8466_v9 }
 0x22b   : > { %3044 = vmatpush1.bf16.msra.mxu0 %v8464_v47 }
 0x22c   : > { %3045 = vmatprep.subr.bf16.mxu0 %v8469_v19 }
 0x22f   : > { %3046 = vmatpush1.bf16.msra.mxu0 %v8467_v24 }
 0x230   : > { %3047 = vmatprep.subr.bf16.mxu0 %v8472_v55 }
 0x233   : > { %3048 = vmatpush1.bf16.msra.mxu0 %v8470_v40 }
 0x234   : > { %3049 = vmatprep.subr.bf16.mxu0 %v8475_v8 }
 0x237   : > { %3050 = vmatpush1.bf16.msra.mxu0 %v8473_v35 }
 0x238   : > { %3051 = vmatprep.subr.bf16.mxu0 %v8478_v5 }
 0x23b   : > { %3052 = vmatpush1.bf16.msra.mxu0 %v8476_v13 }
 0x23c   : > { %3053 = vmatprep.subr.bf16.mxu0 %v8481_v41 }
 0x23f   : > { %3054 = vmatpush1.bf16.msra.mxu0 %v8479_v22 }
 0x240   : > { %3055 = vmatprep.subr.bf16.mxu0 %v8484_v42 }
 0x243   : > { %3056 = vmatpush1.bf16.msra.mxu0 %v8482_v50 }
 0x244   : > { %3057 = vmatprep.subr.bf16.mxu0 %v8487_v23  ;;  %v8539_v23 = vld [vmem:[%s11766_s2] ss:$8 sps:$4 sm:$0xff]  }
 0x247   : > { %3058 = vmatpush1.bf16.msra.mxu0 %v8485_v34 }
 0x248   : > { %3059 = vmatprep.subr.bf16.mxu0 %v8490_v46 }
 0x24b   : > { %3060 = vmatpush1.bf16.msra.mxu0 %v8488_v48 }
 0x24e   : > { %7586 = vmatmul.mubr.msk.bf16.vlgmr.msra.gmra.mrb[0].mxu0 %vm9474_vm7, %v9520_v4  ;;  %v11823_v4 = vmov 0 }
 0x24f   : > { %7589 = vmatprep.mubr.msk.bf16.mxu0 %vm9474_vm7, %v9532_v21  ;;  %v11824_v4 = vsel %vm10393_vm9, 4294967295, %v11823_v4  ;;  %v8532_v21 = vld [vmem:[%s11766_s2 + $0x1d0] ss:$8 sps:$4 sm:$0xff]  }
 0x250   : > { %11825 = vst [vmem:[#allocation4_spill] sm:$0xff] %v11824_v4  ;;  %3683 = vmatpush1.bf16.msra.mxu1 %v8532_v21 }
 0x256   : > { %7592 = vmatmul.mubr.msk.bf16.gmra.mrb[4].mxu0 %vm9474_vm7, %v9554_v14  ;;  %v7603_v14 = vpack.c.bf16 %v11819_v12, %v340_v59  ;;  %v3120_v59 = vlaneseq }
 0x257   : > { %7595 = vmatprep.mubr.msk.bf16.mxu0 %vm9474_vm7, %v9566_v16  ;;  %v8533_v16 = vld [vmem:[%s11766_s2 + $0x1e4] ss:$8 sps:$4 sm:$0xff]  }
 0x258   : > { %3684 = vmatprep.subr.bf16.mxu1 %v8533_v16  ;;  %v3121_v20 = vshrl.u32 %v3120_v59, 7  ;;  %v8542_v59 = vld [vmem:[%s11766_s2 + $0x10] ss:$8 sps:$4 sm:$0xff]  }
 0x25a   : > { %v10425_v49 = vsub.s32 0, %v3121_v20  ;;  %v10430_v0 = vsub.s32 1, %v3121_v20 }
 0x25c   : > { %11826 = vst [vmem:[#allocation5_spill] sm:$0xff] %v10425_v49  ;;  %11827 = vst [vmem:[#allocation6_spill] sm:$0xff] %v10430_v0  ;;  %v10436_v60 = vrot.slane %v3118_v56, %v10425_v49  ;;  %v10439_v43 = vrot.slane %v3118_v56, %v10430_v0  ;;  %v10442_v33 = vrot.slane %v6866_v57, %v10425_v49 }
 0x25d   : > { %v10445_v7 = vrot.slane %v6866_v57, %v10430_v0 }
 0x25e   : > { %7598 = vmatmul.mubr.msk.bf16.gmra.mrb[8].mxu0 %vm9474_vm7, %v9586_v38  ;;  %v8535_v38 = vld [vmem:[%s11766_s2 + $0x1e0] ss:$8 sps:$4 sm:$0xff]  }
 0x25f   : > { %7601 = vmatprep.mubr.msk.bf16.mxu0 %vm10393_vm9, %v7600_v63  ;;  %3685 = vmatpush1.bf16.msra.mxu1 %v8535_v38 }
 0x260   : > { %3686 = vmatprep.subr.bf16.mxu1 %v8536_v37 }
 0x263   : > { %3687 = vmatpush1.bf16.msra.mxu1 %v8538_v36 }
 0x264   : > { %3889 = vmatprep.subr.bf16.mxu1 %v8541_v51 }
 0x266   : > { %7604 = vmatmul.mubr.msk.bf16.gmra.mrb[12].mxu0 %vm10393_vm9, %v7603_v14  ;;  %v8544_v14 = vld [vmem:[%s11766_s2 + $0x14] ss:$8 sps:$4 sm:$0xff]  }
 0x321   : > { %v3063_v28 = vpop.f32.mrb[0].mxu0 }
 0x322   : > { %v3130_v53 = vmul.f32 %v10436_v60, %v3063_v28  ;;  %v3065_v26 = vpop.f32.mrb[1].mxu0 }
 0x323   : > { %v3131_v18 = vmul.f32 %v10439_v43, %v3065_v26  ;;  %v3067_v10 = vpop.f32.mrb[2].mxu0 }
 0x324   : > { %v3159_v2 = vadd.f32 %v10442_v33, %v3130_v53  ;;  %v3132_v52 = vmul.f32 %v10436_v60, %v3067_v10  ;;  %v3069_v3 = vpop.f32.mrb[3].mxu0  ;;  %v8547_v10 = vld [vmem:[%s11766_s2 + $0x24] ss:$8 sps:$4 sm:$0xff]  }
 0x325   : > { %v3160_v54 = vadd.f32 %v10445_v7, %v3131_v18  ;;  %v3133_v61 = vmul.f32 %v10439_v43, %v3069_v3 }
 0x326   : > { %vm3175_vm10 = vcmp.gt.f32.partialorder %v3159_v2, 0.0  ;;  %v3191_v32 = vmul.f32 0.01, %v3159_v2  ;;  %v3161_v15 = vadd.f32 %v10442_v33, %v3132_v52 }
 0x327   : > { %v3192_v58 = vmul.f32 0.01, %v3160_v54  ;;  %v3162_v45 = vadd.f32 %v10445_v7, %v3133_v61  ;;  %vm3176_vm11 = vcmp.gt.f32.partialorder %v3160_v54, 0.0 }
 0x328   : > { %v10455_v62 = vsel %vm3175_vm10, %v3159_v2, %v3191_v32  ;;  %vm3177_vm12 = vcmp.gt.f32.partialorder %v3161_v15, 0.0  ;;  %v3193_v39 = vmul.f32 0.01, %v3161_v15 }
 0x329   : > { %vm3178_vm13 = vcmp.gt.f32.partialorder %v3162_v45, 0.0  ;;  %v3194_v1 = vmul.f32 0.01, %v3162_v45  ;;  %v3073_v6 = vpop.f32.mrb[4].mxu0  ;;  %v10460_v9 = vsel %vm3176_vm11, %v3160_v54, %v3192_v58  ;;  %v11778_v47 = vrot.slane %v10455_v62, 7 }
 0x32a   : > { %v10457_v30 = vsel %vm3177_vm12, %v3161_v15, %v3193_v39  ;;  %v3134_v27 = vmul.f32 %v10436_v60, %v3073_v6  ;;  %v3075_v25 = vpop.f32.mrb[5].mxu0  ;;  %v11777_v19 = vrot.slane %v10455_v62, 1  ;;  %v3256_v41 = vrot.slane %v10460_v9, 7 }
 0x32b   : > { %v10466_v55 = vsel %vm3178_vm13, %v3162_v45, %v3194_v1  ;;  %v3077_v40 = vpop.f32.mrb[6].mxu0  ;;  %v3135_v35 = vmul.f32 %v10439_v43, %v3075_v25  ;;  %v3456_v50 = vpack.c.bf16 %v10460_v9, %v11819_v12  ;;  %v3455_v34 = vpack.c.bf16 %v10455_v62, %v11819_v12 }
 0x32c   : > { %v3163_v8 = vadd.f32 %v10442_v33, %v3134_v27  ;;  %v3136_v5 = vmul.f32 %v10436_v60, %v3077_v40  ;;  %v3079_v13 = vpop.f32.mrb[7].mxu0  ;;  %v10490_v16 = vpack.c.bf16 %v3256_v41, %v11819_v12  ;;  %v3258_v38 = vrot.slane %v10466_v55, 7  ;;  %v8545_v40 = vld [vmem:[%s11766_s2 + $0x20] ss:$8 sps:$4 sm:$0xff]  }
 0x32d   : > { %v3137_v22 = vmul.f32 %v10439_v43, %v3079_v13  ;;  %v3164_v48 = vadd.f32 %v10445_v7, %v3135_v35  ;;  %3688 = vmatprep.mubr.bf16.mxu1 %v3456_v50  ;;  %v3257_v37 = vrot.slane %v10457_v30, 7 }
 0x32e   : > { %vm3179_vm14 = vcmp.gt.f32.partialorder %v3163_v8, 0.0  ;;  %v3195_v46 = vmul.f32 0.01, %v3163_v8  ;;  %v3165_v63 = vadd.f32 %v10442_v33, %v3136_v5  ;;  %3689 = vmatmul.mubr.bf16.vlgmr.msra.gmra.mrb[0].mxu1 %v3455_v34 }
 0x32f   : > { %v3166_v21 = vadd.f32 %v10445_v7, %v3137_v22  ;;  %vm3180_vm15 = vcmp.gt.f32.partialorder %v3164_v48, 0.0  ;;  %v3196_v51 = vmul.f32 0.01, %v3164_v48  ;;  %3890 = vmatpush1.bf16.msra.mxu1 %v8539_v23  ;;  %v10512_v52 = vpack.c.bf16 %v3257_v37, %v11778_v47  ;;  %v8550_v22 = vld [vmem:[%s11766_s2 + $0x34] ss:$8 sps:$4 sm:$0xff]  }
 0x330   : > { %v10494_v36 = vsel %vm3179_vm14, %v3163_v8, %v3195_v46  ;;  %vm3181_vm0 = vcmp.gt.f32.partialorder %v3165_v63, 0.0  ;;  %v3197_v20 = vmul.f32 0.01, %v3165_v63  ;;  %3891 = vmatprep.subr.bf16.mxu1 %v8544_v14  ;;  %v11780_v46 = vrot.slane %v10466_v55, 1 }
 0x331   : > { %vm3182_vm1 = vcmp.gt.f32.partialorder %v3166_v21, 0.0  ;;  %v3198_v56 = vmul.f32 0.01, %v3166_v21  ;;  %v3083_v57 = vpop.f32.mrb[8].mxu0  ;;  %v10501_v28 = vpack.c.bf16 %v10494_v36, %v10457_v30  ;;  %v10503_v53 = vsel %vm3180_vm15, %v3164_v48, %v3196_v51  ;;  %v8548_v51 = vld [vmem:[%s11766_s2 + $0x30] ss:$8 sps:$4 sm:$0xff]  }
 0x332   : > { %v3138_v26 = vmul.f32 %v10436_v60, %v3083_v57  ;;  %v3085_v18 = vpop.f32.mrb[9].mxu0  ;;  %v11786_v2 = vrot.slane %v10494_v36, 7  ;;  %v10515_v3 = vsel %vm3181_vm0, %v3165_v63, %v3197_v20  ;;  %v10522_v15 = vpack.c.bf16 %v10503_v53, %v10466_v55 }
 0x333   : > { %11828 = vst [vmem:[#allocation7_spill] sm:$0xff] %v10501_v28  ;;  %v10517_v54 = vsel %vm3182_vm1, %v3166_v21, %v3198_v56  ;;  %v3139_v61 = vmul.f32 %v10439_v43, %v3085_v18  ;;  %v3087_v32 = vpop.f32.mrb[10].mxu0  ;;  %v3260_v1 = vrot.slane %v10503_v53, 7  ;;  %3892 = vmatpush1.bf16.msra.mxu1 %v8542_v59  ;;  %v11785_v35 = vrot.slane %v10515_v3, 7 }
 0x334   : > { %11829 = vst [vmem:[#allocation8_spill] sm:$0xff] %v10522_v15  ;;  %v3167_v58 = vadd.f32 %v10442_v33, %v3138_v26  ;;  %v3140_v45 = vmul.f32 %v10436_v60, %v3087_v32  ;;  %v3089_v39 = vpop.f32.mrb[11].mxu0  ;;  %v10529_v6 = vpack.c.bf16 %v11786_v2, %v3257_v37  ;;  %3698 = vmatprep.mubr.bf16.mxu1 %v10522_v15  ;;  %v3262_v8 = vrot.slane %v10517_v54, 7 }
 0x335   : > { %v3168_v27 = vadd.f32 %v10445_v7, %v3139_v61  ;;  %v3141_v25 = vmul.f32 %v10439_v43, %v3089_v39  ;;  %3893 = vmatprep.subr.bf16.mxu1 %v8547_v10  ;;  %v10547_v50 = vpack.c.bf16 %v3260_v1, %v3258_v38  ;;  %v11779_v14 = vrot.slane %v10503_v53, 1  ;;  %v8553_v10 = vld [vmem:[%s11766_s2 + $0x44] ss:$8 sps:$4 sm:$0xff]  }
 0x336   : > { %vm3183_vm2 = vcmp.gt.f32.partialorder %v3167_v58, 0.0  ;;  %v3199_v5 = vmul.f32 0.01, %v3167_v58  ;;  %v3169_v13 = vadd.f32 %v10442_v33, %v3140_v45  ;;  %3699 = vmatmul.mubr.bf16.gmra.mrb[4].mxu1 %v10501_v28  ;;  %v10682_v2 = vpack.c.bf16 %v3262_v8, %v3260_v1 }
 0x337   : > { %vm3184_vm5 = vcmp.gt.f32.partialorder %v3168_v27, 0.0  ;;  %v3200_v23 = vmul.f32 0.01, %v3168_v27  ;;  %v3170_v34 = vadd.f32 %v10445_v7, %v3141_v25  ;;  %3894 = vmatpush1.bf16.msra.mxu1 %v8545_v40  ;;  %v11834_v0 = vrot.slane %v10494_v36, 7 }
 0x338   : > { %v10551_v48 = vsel %vm3183_vm2, %v3167_v58, %v3199_v5  ;;  %vm3185_vm10 = vcmp.gt.f32.partialorder %v3169_v13, 0.0  ;;  %v3201_v63 = vmul.f32 0.01, %v3169_v13  ;;  %3895 = vmatprep.subr.bf16.mxu1 %v8550_v22  ;;  %v11835_v49 = vrot.slane %v10515_v3, 7 }
 0x339   : > { %v10555_v21 = vsel %vm3184_vm5, %v3168_v27, %v3200_v23  ;;  %vm3186_vm11 = vcmp.gt.f32.partialorder %v3170_v34, 0.0  ;;  %v3202_v37 = vmul.f32 0.01, %v3170_v34  ;;  %v3093_v59 = vpop.f32.mrb[12].mxu0  ;;  %v10562_v20 = vpack.c.bf16 %v10551_v48, %v10515_v3 }
 0x33a   : > { %v10564_v56 = vsel %vm3185_vm10, %v3169_v13, %v3201_v63  ;;  %v3142_v57 = vmul.f32 %v10436_v60, %v3093_v59  ;;  %v3095_v26 = vpop.f32.mrb[13].mxu0  ;;  %v10569_v18 = vpack.c.bf16 %v10555_v21, %v10517_v54  ;;  %v11784_v61 = vrot.slane %v10555_v21, 7  ;;  %v8556_v59 = vld [vmem:[%s11766_s2 + $0x54] ss:$8 sps:$4 sm:$0xff]  }
 0x33b   : > { %11830 = vst [vmem:[#allocation9_spill] sm:$0xff] %v10562_v20  ;;  %v10575_v32 = vsel %vm3186_vm11, %v3170_v34, %v3202_v37  ;;  %v3143_v58 = vmul.f32 %v10439_v43, %v3095_v26  ;;  %v3097_v45 = vpop.f32.mrb[14].mxu0  ;;  %v11782_v39 = vrot.slane %v10551_v48, 7  ;;  %v11783_v27 = vrot.slane %v10564_v56, 7  ;;  %3896 = vmatpush1.bf16.msra.mxu1 %v8548_v51 }
 0x33c   : > { %11831 = vst [vmem:[#allocation10_spill] sm:$0xff] %v10569_v18  ;;  %v3171_v25 = vadd.f32 %v10442_v33, %v3142_v57  ;;  %v3144_v40 = vmul.f32 %v10436_v60, %v3097_v45  ;;  %v3099_v5 = vpop.f32.mrb[15].mxu0  ;;  %3708 = vmatprep.mubr.bf16.mxu1 %v10569_v18  ;;  %v10587_v13 = vpack.c.bf16 %v11784_v61, %v3262_v8  ;;  %v3266_v22 = vrot.slane %v10575_v32, 7  ;;  %v8551_v60 = vld [vmem:[%s11766_s2 + $0x40] ss:$8 sps:$4 sm:$0xff]  }
 0x33d   : > { %v3172_v23 = vadd.f32 %v10445_v7, %v3143_v58  ;;  %v3145_v34 = vmul.f32 %v10439_v43, %v3099_v5  ;;  %v10599_v63 = vpack.c.bf16 %v11782_v39, %v11785_v35  ;;  %v10605_v37 = vpack.c.bf16 %v11779_v14, %v11780_v46  ;;  %3897 = vmatprep.subr.bf16.mxu1 %v8553_v10 }
 0x33e   : > { %vm3187_vm12 = vcmp.gt.f32.partialorder %v3171_v25, 0.0  ;;  %v3203_v51 = vmul.f32 0.01, %v3171_v25  ;;  %v3173_v43 = vadd.f32 %v10442_v33, %v3144_v40  ;;  %v3321_v57 = vrot.slane %v10457_v30, 1  ;;  %3709 = vmatmul.mubr.bf16.gmra.mrb[8].mxu1 %v10562_v20 }
 0x33f   : > { %vm3188_vm13 = vcmp.gt.f32.partialorder %v3172_v23, 0.0  ;;  %v3204_v26 = vmul.f32 0.01, %v3172_v23  ;;  %v3174_v58 = vadd.f32 %v10445_v7, %v3145_v34  ;;  %v11781_v45 = vrot.slane %v10494_v36, 1  ;;  %3898 = vmatpush1.bf16.msra.mxu1 %v8551_v60  ;;  %v8554_v7 = vld [vmem:[%s11766_s2 + $0x50] ss:$8 sps:$4 sm:$0xff]  }
 0x340   : > { %v10614_v5 = vsel %vm3187_vm12, %v3171_v25, %v3203_v51  ;;  %vm3189_vm14 = vcmp.gt.f32.partialorder %v3173_v43, 0.0  ;;  %v3205_v24 = vmul.f32 0.01, %v3173_v43  ;;  %v10619_v33 = vpack.c.bf16 %v3321_v57, %v11777_v19  ;;  %3899 = vmatprep.subr.bf16.mxu1 %v8556_v59 }
 0x341   : > { %v10621_v10 = vsel %vm3188_vm13, %v3172_v23, %v3204_v26  ;;  %vm3190_vm15 = vcmp.gt.f32.partialorder %v3174_v58, 0.0  ;;  %v3206_v40 = vmul.f32 0.01, %v3174_v58  ;;  %v10628_v25 = vpack.c.bf16 %v10614_v5, %v10564_v56  ;;  %v8559_v23 = vld [vmem:[%s11766_s2 + $0x64] ss:$8 sps:$4 sm:$0xff]  }
 0x342   : > { %v10630_v34 = vsel %vm3189_vm14, %v3173_v43, %v3205_v24  ;;  %v10634_v51 = vpack.c.bf16 %v10621_v10, %v10575_v32  ;;  %v3268_v60 = vrot.slane %v10621_v10, 7  ;;  %v3267_v26 = vrot.slane %v10614_v5, 7 }
 0x343   : > { %11832 = vst [vmem:[#allocation11_spill] sm:$0xff] %v10628_v25  ;;  %v10641_v19 = vsel %vm3190_vm15, %v3174_v58, %v3206_v40  ;;  %v10645_v47 = vpack.c.bf16 %v11781_v45, %v3321_v57  ;;  %v3326_v24 = vrot.slane %v10517_v54, 1  ;;  %v3328_v43 = vrot.slane %v10555_v21, 1  ;;  %3900 = vmatpush1.bf16.msra.mxu1 %v8554_v7  ;;  %v8557_v57 = vld [vmem:[%s11766_s2 + $0x60] ss:$8 sps:$4 sm:$0xff]  }
 0x344   : > { %11833 = vst [vmem:[#allocation12_spill] sm:$0xff] %v10634_v51  ;;  %3718 = vmatprep.mubr.bf16.mxu1 %v10634_v51  ;;  %v10650_v59 = vpack.c.bf16 %v3268_v60, %v3266_v22  ;;  %v10654_v14 = vpack.c.bf16 %v3267_v26, %v11783_v27  ;;  %v3325_v46 = vrot.slane %v10515_v3, 1  ;;  %v3327_v58 = vrot.slane %v10551_v48, 1  ;;  %3901 = vmatprep.subr.bf16.mxu1 %v8559_v23  ;;  %v8562_v27 = vld [vmem:[%s11766_s2 + $0x74] ss:$8 sps:$4 sm:$0xff]  }
 0x345   : > { %v10661_v40 = vpack.c.bf16 %v3328_v43, %v3326_v24  ;;  %v3330_v45 = vrot.slane %v10575_v32, 1  ;;  %v3332_v42 = vrot.slane %v10621_v10, 1  ;;  %v3329_v39 = vrot.slane %v10564_v56, 1 }
 0x346   : > { %v10669_v61 = vpack.c.bf16 %v3327_v58, %v3325_v46  ;;  %v3331_v7 = vrot.slane %v10614_v5, 1  ;;  %v10676_v35 = vpack.c.bf16 %v3258_v38, %v3256_v41  ;;  %v10690_v4 = vpack.c.bf16 %v11835_v49, %v11834_v0  ;;  %3719 = vmatmul.mubr.bf16.gmra.mrb[12].mxu1 %v10628_v25  ;;  %v8560_v0 = vld [vmem:[%s11766_s2 + $0x70] ss:$8 sps:$4 sm:$0xff]  }
 0x347   : > { %v10684_v23 = vpack.c.bf16 %v3332_v42, %v3330_v45  ;;  %v11836_v51 = vrot.slane %v10555_v21, 7  ;;  %v11837_v41 = vrot.slane %v10551_v48, 7  ;;  %v11838_v38 = vrot.slane %v10564_v56, 7  ;;  %3902 = vmatpush1.bf16.msra.mxu1 %v8557_v57  ;;  %7608 = vmatprep.mubr.msk.bf16.mxu1 %vm9222_vm3, %v10490_v16  ;;  %v8565_v16 = vld [vmem:[%s11766_s2 + $0x84] ss:$8 sps:$4 sm:$0xff]  }
 0x348   : > { %v10703_v1 = vpack.c.bf16 %v3331_v7, %v3329_v39  ;;  %v11798_v8 = vrot.slane %v10641_v19, 7  ;;  %v11799_v28 = vrot.slane %v10630_v34, 7  ;;  %3903 = vmatprep.subr.bf16.mxu1 %v8562_v27  ;;  %v11839_v49 = vrot.slane %v10460_v9, 1 }
 0x349   : > { %v10694_v20 = vpack.c.bf16 %v3266_v22, %v11836_v51  ;;  %v10700_v18 = vpack.c.bf16 %v11838_v38, %v11837_v41  ;;  %v11840_v38 = vrot.slane %v10466_v55, 1  ;;  %v10753_v51 = vpack.c.bf16 %v3330_v45, %v3328_v43  ;;  %v8571_v45 = vld [vmem:[%s11766_s2 + $0xa4] ss:$8 sps:$4 sm:$0xff]   ;;  %v8569_v43 = vld [vmem:[%s11766_s2 + $0xa0] ss:$8 sps:$4 sm:$0xff]  }
 0x34a   : > { %v10727_v57 = vpack.c.bf16 %v11798_v8, %v3268_v60  ;;  %v10731_v22 = vpack.c.bf16 %v11799_v28, %v3267_v26  ;;  %v11841_v60 = vrot.slane %v10503_v53, 1  ;;  %v11842_v26 = vrot.slane %v10494_v36, 1 }
 0x34b   : > { %v10743_v25 = vpack.c.bf16 %v11840_v38, %v11839_v49  ;;  %v10755_v41 = vpack.c.bf16 %v3329_v39, %v3327_v58  ;;  %v11843_v27 = vrot.slane %v10641_v19, 1  ;;  %v3333_v17 = vrot.slane %v10630_v34, 1  ;;  %3904 = vmatpush1.bf16.msra.mxu1 %v8560_v0  ;;  %v8574_v58 = vld [vmem:[%s11766_s2 + $0xb4] ss:$8 sps:$4 sm:$0xff]   ;;  %v8577_v49 = vld [vmem:[%s11766_s2 + $0xc4] ss:$8 sps:$4 sm:$0xff]  }
 0x34c   : > { %v10747_v8 = vpack.c.bf16 %v3326_v24, %v11841_v60  ;;  %v10751_v28 = vpack.c.bf16 %v3325_v46, %v11842_v26  ;;  %v8563_v24 = vld [vmem:[%s11766_s2 + $0x80] ss:$8 sps:$4 sm:$0xff]   ;;  %3905 = vmatprep.subr.bf16.mxu1 %v8565_v16  ;;  %v8568_v46 = vld [vmem:[%s11766_s2 + $0x94] ss:$8 sps:$4 sm:$0xff]   ;;  %v8578_v16 = vld [vmem:[%s11766_s2 + $0xd0] ss:$8 sps:$4 sm:$0xff]  }
 0x34d   : > { %v10759_v15 = vpack.c.bf16 %v11843_v27, %v3332_v42  ;;  %v10770_v39 = vpack.c.bf16 %v3333_v17, %v3331_v7  ;;  %v8566_v42 = vld [vmem:[%s11766_s2 + $0x90] ss:$8 sps:$4 sm:$0xff]   ;;  %v8575_v0 = vld [vmem:[%s11766_s2 + $0xc0] ss:$8 sps:$4 sm:$0xff]   ;;  %v8580_v38 = vld [vmem:[%s11766_s2 + $0xd4] ss:$8 sps:$4 sm:$0xff]  }
 0x34e   : > { %v8572_v7 = vld [vmem:[%s11766_s2 + $0xb0] ss:$8 sps:$4 sm:$0xff]   ;;  %v8583_v27 = vld [vmem:[%s11766_s2 + $0xe4] ss:$8 sps:$4 sm:$0xff]   ;;  %v8581_v60 = vld [vmem:[%s11766_s2 + $0xe0] ss:$8 sps:$4 sm:$0xff]  }
 0x34f   : > { %3906 = vmatpush1.bf16.msra.mxu1 %v8563_v24  ;;  %v8586_v26 = vld [vmem:[%s11766_s2 + $0xf4] ss:$8 sps:$4 sm:$0xff]   ;;  %v8584_v24 = vld [vmem:[%s11766_s2 + $0xf0] ss:$8 sps:$4 sm:$0xff]   ;;  %v11857_v44 = vrot.slane %v10630_v34, 7 }
 0x350   : > { %3907 = vmatprep.subr.bf16.mxu1 %v8568_v46  ;;  %v8589_v46 = vld [vmem:[%s11766_s2 + $0x204] ss:$8 sps:$4 sm:$0xff]  }
 0x353   : > { %3908 = vmatpush1.bf16.msra.mxu1 %v8566_v42  ;;  %v8587_v42 = vld [vmem:[%s11766_s2 + $0x200] ss:$8 sps:$4 sm:$0xff]  }
 0x354   : > { %3909 = vmatprep.subr.bf16.mxu1 %v8571_v45  ;;  %v11844_v45 = vrot.slane %v10455_v62, 7 }
 0x357   : > { %3910 = vmatpush1.bf16.msra.mxu1 %v8569_v43  ;;  %v7611_v43 = vpack.c.bf16 %v11844_v45, %v11819_v12  ;;  %v11845_v45 = vrot.slane %v10460_v9, 1 }
 0x358   : > { %3911 = vmatprep.subr.bf16.mxu1 %v8574_v58  ;;  %v8592_v58 = vld [vmem:[%s11766_s2 + $0x214] ss:$8 sps:$4 sm:$0xff]  }
 0x35b   : > { %3912 = vmatpush1.bf16.msra.mxu1 %v8572_v7  ;;  %v8590_v7 = vld [vmem:[%s11766_s2 + $0x210] ss:$8 sps:$4 sm:$0xff]  }
 0x35c   : > { %3913 = vmatprep.subr.bf16.mxu1 %v8577_v49  ;;  %v8595_v49 = vld [vmem:[%s11766_s2 + $0x224] ss:$8 sps:$4 sm:$0xff]  }
 0x35f   : > { %3914 = vmatpush1.bf16.msra.mxu1 %v8575_v0  ;;  %v8598_v0 = vld [vmem:[%s11766_s2 + $0x234] ss:$8 sps:$4 sm:$0xff]  }
 0x360   : > { %3915 = vmatprep.subr.bf16.mxu1 %v8580_v38  ;;  %v8596_v38 = vld [vmem:[%s11766_s2 + $0x230] ss:$8 sps:$4 sm:$0xff]  }
 0x363   : > { %3916 = vmatpush1.bf16.msra.mxu1 %v8578_v16  ;;  %v8601_v16 = vld [vmem:[%s11766_s2 + $0x244] ss:$8 sps:$4 sm:$0xff]  }
 0x364   : > { %3917 = vmatprep.subr.bf16.mxu1 %v8583_v27  ;;  %v8599_v27 = vld [vmem:[%s11766_s2 + $0x240] ss:$8 sps:$4 sm:$0xff]  }
 0x367   : > { %3918 = vmatpush1.bf16.msra.mxu1 %v8581_v60  ;;  %v8604_v60 = vld [vmem:[%s11766_s2 + $0x254] ss:$8 sps:$4 sm:$0xff]  }
 0x368   : > { %3919 = vmatprep.subr.bf16.mxu1 %v8586_v26  ;;  %v8602_v26 = vld [vmem:[%s11766_s2 + $0x250] ss:$8 sps:$4 sm:$0xff]  }
 0x36b   : > { %3920 = vmatpush1.bf16.msra.mxu1 %v8584_v24  ;;  %v8607_v24 = vld [vmem:[%s11766_s2 + $0x264] ss:$8 sps:$4 sm:$0xff]  }
 0x36c   : > { %4179 = vmatprep.subr.bf16.mxu1 %v8589_v46  ;;  %v8605_v46 = vld [vmem:[%s11766_s2 + $0x260] ss:$8 sps:$4 sm:$0xff]  }
 0x36e   : > { %7612 = vmatmul.mubr.msk.bf16.vlgmr.msra.gmra.mrb[0].mxu1 %vm9222_vm3, %v7611_v43  ;;  %v7644_v43 = vpack.c.bf16 %v11845_v45, %v11819_v12  ;;  %v8631_v45 = vld [vmem:[%s11766_s2 + $0x2e4] ss:$8 sps:$4 sm:$0xff]  }
 0x36f   : > { %7617 = vmatprep.mubr.msk.bf16.mxu1 %vm9297_vm4, %v10547_v50  ;;  %4180 = vmatpush1.bf16.msra.mxu1 %v8587_v42  ;;  %v8610_v42 = vld [vmem:[%s11766_s2 + $0x274] ss:$8 sps:$4 sm:$0xff]  }
 0x370   : > { %4181 = vmatprep.subr.bf16.mxu1 %v8592_v58  ;;  %v8608_v58 = vld [vmem:[%s11766_s2 + $0x270] ss:$8 sps:$4 sm:$0xff]  }
 0x373   : > { %4182 = vmatpush1.bf16.msra.mxu1 %v8590_v7  ;;  %v8613_v7 = vld [vmem:[%s11766_s2 + $0x284] ss:$8 sps:$4 sm:$0xff]  }
 0x374   : > { %4183 = vmatprep.subr.bf16.mxu1 %v8595_v49  ;;  %v8611_v49 = vld [vmem:[%s11766_s2 + $0x280] ss:$8 sps:$4 sm:$0xff]  }
 0x376   : > { %7622 = vmatmul.mubr.msk.bf16.gmra.mrb[4].mxu1 %vm9297_vm4, %v10529_v6 }
 0x377   : > { %7627 = vmatprep.mubr.msk.bf16.mxu1 %vm9297_vm4, %v10587_v13  ;;  %4184 = vmatpush1.bf16.msra.mxu1 %v8593_v11  ;;  %v8616_v11 = vld [vmem:[%s11766_s2 + $0x294] ss:$8 sps:$4 sm:$0xff]  }
 0x378   : > { %4185 = vmatprep.subr.bf16.mxu1 %v8598_v0  ;;  %v8614_v0 = vld [vmem:[%s11766_s2 + $0x290] ss:$8 sps:$4 sm:$0xff]  }
 0x37b   : > { %4186 = vmatpush1.bf16.msra.mxu1 %v8596_v38  ;;  %v8619_v38 = vld [vmem:[%s11766_s2 + $0x2a4] ss:$8 sps:$4 sm:$0xff]  }
 0x37c   : > { %4187 = vmatprep.subr.bf16.mxu1 %v8601_v16  ;;  %v8617_v16 = vld [vmem:[%s11766_s2 + $0x2a0] ss:$8 sps:$4 sm:$0xff]  }
 0x37e   : > { %7632 = vmatmul.mubr.msk.bf16.gmra.mrb[8].mxu1 %vm9297_vm4, %v10599_v63 }
 0x37f   : > { %7637 = vmatprep.mubr.msk.bf16.mxu1 %vm9297_vm4, %v10650_v59  ;;  %4188 = vmatpush1.bf16.msra.mxu1 %v8599_v27  ;;  %v8622_v27 = vld [vmem:[%s11766_s2 + $0x2b4] ss:$8 sps:$4 sm:$0xff]  }
 0x380   : > { %4189 = vmatprep.subr.bf16.mxu1 %v8604_v60  ;;  %v8620_v60 = vld [vmem:[%s11766_s2 + $0x2b0] ss:$8 sps:$4 sm:$0xff]  }
 0x383   : > { %4190 = vmatpush1.bf16.msra.mxu1 %v8602_v26  ;;  %v8625_v26 = vld [vmem:[%s11766_s2 + $0x2c4] ss:$8 sps:$4 sm:$0xff]  }
 0x384   : > { %4191 = vmatprep.subr.bf16.mxu1 %v8607_v24  ;;  %v8623_v24 = vld [vmem:[%s11766_s2 + $0x2c0] ss:$8 sps:$4 sm:$0xff]  }
 0x386   : > { %7642 = vmatmul.mubr.msk.bf16.gmra.mrb[12].mxu1 %vm9297_vm4, %v10654_v14 }
 0x387   : > { %4192 = vmatpush1.bf16.msra.mxu1 %v8605_v46  ;;  %7645 = vmatprep.mubr.msk.bf16.mxu1 %vm9405_vm6, %v7644_v43  ;;  %v8628_v46 = vld [vmem:[%s11766_s2 + $0x2d4] ss:$8 sps:$4 sm:$0xff]   ;;  %v8629_v43 = vld [vmem:[%s11766_s2 + $0x2e0] ss:$8 sps:$4 sm:$0xff]  }
 0x388   : > { %4193 = vmatprep.subr.bf16.mxu1 %v8610_v42  ;;  %v8626_v42 = vld [vmem:[%s11766_s2 + $0x2d0] ss:$8 sps:$4 sm:$0xff]  }
 0x38b   : > { %4194 = vmatpush1.bf16.msra.mxu1 %v8608_v58  ;;  %v8634_v58 = vld [vmem:[%s11766_s2 + $0x2f4] ss:$8 sps:$4 sm:$0xff]  }
 0x38c   : > { %4195 = vmatprep.subr.bf16.mxu1 %v8613_v7  ;;  %v8632_v7 = vld [vmem:[%s11766_s2 + $0x2f0] ss:$8 sps:$4 sm:$0xff]  }
 0x38f   : > { %4196 = vmatpush1.bf16.msra.mxu1 %v8611_v49  ;;  %v8637_v49 = vld [vmem:[%s11766_s2 + $0x304] ss:$8 sps:$4 sm:$0xff]  }
 0x390   : > { %4197 = vmatprep.subr.bf16.mxu1 %v8616_v11  ;;  %v8635_v11 = vld [vmem:[%s11766_s2 + $0x300] ss:$8 sps:$4 sm:$0xff]  }
 0x393   : > { %4198 = vmatpush1.bf16.msra.mxu1 %v8614_v0  ;;  %v11846_v0 = vrot.slane %v10455_v62, 1 }
 0x394   : > { %4199 = vmatprep.subr.bf16.mxu1 %v8619_v38 }
 0x395   : > { %v7647_v38 = vpack.c.bf16 %v11846_v0, %v11819_v12  ;;  %v8661_v0 = vld [vmem:[%s11766_s2 + $0x384] ss:$8 sps:$4 sm:$0xff]  }
 0x397   : > { %4200 = vmatpush1.bf16.msra.mxu1 %v8617_v16  ;;  %v8640_v16 = vld [vmem:[%s11766_s2 + $0x314] ss:$8 sps:$4 sm:$0xff]  }
 0x398   : > { %4201 = vmatprep.subr.bf16.mxu1 %v8622_v27  ;;  %v8638_v27 = vld [vmem:[%s11766_s2 + $0x310] ss:$8 sps:$4 sm:$0xff]  }
 0x39b   : > { %4202 = vmatpush1.bf16.msra.mxu1 %v8620_v60  ;;  %v8643_v60 = vld [vmem:[%s11766_s2 + $0x324] ss:$8 sps:$4 sm:$0xff]  }
 0x39c   : > { %4203 = vmatprep.subr.bf16.mxu1 %v8625_v26  ;;  %v8646_v26 = vld [vmem:[%s11766_s2 + $0x334] ss:$8 sps:$4 sm:$0xff]  }
 0x39f   : > { %4204 = vmatpush1.bf16.msra.mxu1 %v8623_v24  ;;  %v8644_v24 = vld [vmem:[%s11766_s2 + $0x330] ss:$8 sps:$4 sm:$0xff]  }
 0x3a0   : > { %4205 = vmatprep.subr.bf16.mxu1 %v8628_v46  ;;  %v8649_v46 = vld [vmem:[%s11766_s2 + $0x344] ss:$8 sps:$4 sm:$0xff]  }
 0x3a3   : > { %4206 = vmatpush1.bf16.msra.mxu1 %v8626_v42  ;;  %v8647_v42 = vld [vmem:[%s11766_s2 + $0x340] ss:$8 sps:$4 sm:$0xff]  }
 0x3a4   : > { %4207 = vmatprep.subr.bf16.mxu1 %v8631_v45  ;;  %v8652_v45 = vld [vmem:[%s11766_s2 + $0x354] ss:$8 sps:$4 sm:$0xff]  }
 0x3a7   : > { %4208 = vmatpush1.bf16.msra.mxu1 %v8629_v43  ;;  %v8650_v43 = vld [vmem:[%s11766_s2 + $0x350] ss:$8 sps:$4 sm:$0xff]  }
 0x3a8   : > { %4209 = vmatprep.subr.bf16.mxu1 %v8634_v58  ;;  %v8655_v58 = vld [vmem:[%s11766_s2 + $0x364] ss:$8 sps:$4 sm:$0xff]  }
 0x3ab   : > { %4210 = vmatpush1.bf16.msra.mxu1 %v8632_v7  ;;  %v8653_v7 = vld [vmem:[%s11766_s2 + $0x360] ss:$8 sps:$4 sm:$0xff]  }
 0x3ac   : > { %4485 = vmatprep.subr.bf16.mxu1 %v8637_v49  ;;  %v8658_v49 = vld [vmem:[%s11766_s2 + $0x374] ss:$8 sps:$4 sm:$0xff]  }
 0x3ae   : > { %7648 = vmatmul.mubr.msk.bf16.vlgmr.msra.gmra.mrb[0].mxu1 %vm9405_vm6, %v7647_v38  ;;  %v8659_v38 = vld [vmem:[%s11766_s2 + $0x380] ss:$8 sps:$4 sm:$0xff]  }
 0x3af   : > { %7651 = vmatprep.mubr.msk.bf16.mxu1 %vm9474_vm7, %v10605_v37  ;;  %4486 = vmatpush1.bf16.msra.mxu1 %v8635_v11  ;;  %v8656_v11 = vld [vmem:[%s11766_s2 + $0x370] ss:$8 sps:$4 sm:$0xff]  }
 0x3b0   : > { %4487 = vmatprep.subr.bf16.mxu1 %v8640_v16  ;;  %v8664_v16 = vld [vmem:[%s11766_s2 + $0x394] ss:$8 sps:$4 sm:$0xff]  }
 0x3b3   : > { %4488 = vmatpush1.bf16.msra.mxu1 %v8638_v27  ;;  %v8667_v27 = vld [vmem:[%s11766_s2 + $0x3a4] ss:$8 sps:$4 sm:$0xff]  }
 0x3b4   : > { %4489 = vmatprep.subr.bf16.mxu1 %v8643_v60  ;;  %v8665_v60 = vld [vmem:[%s11766_s2 + $0x3a0] ss:$8 sps:$4 sm:$0xff]  }
 0x3b6   : > { %7654 = vmatmul.mubr.msk.bf16.gmra.mrb[4].mxu1 %vm9474_vm7, %v10645_v47 }
 0x3b7   : > { %7657 = vmatprep.mubr.msk.bf16.mxu1 %vm9474_vm7, %v10661_v40  ;;  %4490 = vmatpush1.bf16.msra.mxu1 %v8641_v31  ;;  %v8670_v31 = vld [vmem:[%s11766_s2 + $0x3b4] ss:$8 sps:$4 sm:$0xff]  }
 0x3b8   : > { %4491 = vmatprep.subr.bf16.mxu1 %v8646_v26  ;;  %v8668_v26 = vld [vmem:[%s11766_s2 + $0x3b0] ss:$8 sps:$4 sm:$0xff]  }
 0x3bb   : > { %4492 = vmatpush1.bf16.msra.mxu1 %v8644_v24  ;;  %v8673_v24 = vld [vmem:[%s11766_s2 + $0x3c4] ss:$8 sps:$4 sm:$0xff]  }
 0x3bc   : > { %4493 = vmatprep.subr.bf16.mxu1 %v8649_v46  ;;  %v8671_v46 = vld [vmem:[%s11766_s2 + $0x3c0] ss:$8 sps:$4 sm:$0xff]  }
 0x3be   : > { %7660 = vmatmul.mubr.msk.bf16.gmra.mrb[8].mxu1 %vm9474_vm7, %v10669_v61 }
 0x3bf   : > { %7663 = vmatprep.mubr.msk.bf16.mxu1 %vm9474_vm7, %v10684_v23  ;;  %4494 = vmatpush1.bf16.msra.mxu1 %v8647_v42  ;;  %v8676_v42 = vld [vmem:[%s11766_s2 + $0x3d4] ss:$8 sps:$4 sm:$0xff]  }
 0x3c0   : > { %4495 = vmatprep.subr.bf16.mxu1 %v8652_v45  ;;  %v8674_v45 = vld [vmem:[%s11766_s2 + $0x3d0] ss:$8 sps:$4 sm:$0xff]  }
 0x3c3   : > { %4496 = vmatpush1.bf16.msra.mxu1 %v8650_v43  ;;  %v8679_v43 = vld [vmem:[%s11766_s2 + $0x3e4] ss:$8 sps:$4 sm:$0xff]  }
 0x3c4   : > { %4497 = vmatprep.subr.bf16.mxu1 %v8655_v58  ;;  %v8677_v58 = vld [vmem:[%s11766_s2 + $0x3e0] ss:$8 sps:$4 sm:$0xff]  }
 0x3c6   : > { %7666 = vmatmul.mubr.msk.bf16.gmra.mrb[12].mxu1 %vm9474_vm7, %v10703_v1 }
 0x3c7   : > { %4498 = vmatpush1.bf16.msra.mxu1 %v8653_v7  ;;  %7671 = vmatprep.mubr.msk.bf16.mxu1 %vm9297_vm4, %v10676_v35  ;;  %v8662_v35 = vld [vmem:[%s11766_s2 + $0x390] ss:$8 sps:$4 sm:$0xff]   ;;  %v8682_v7 = vld [vmem:[%s11766_s2 + $0x3f4] ss:$8 sps:$4 sm:$0xff]  }
 0x3c8   : > { %4499 = vmatprep.subr.bf16.mxu1 %v8658_v49  ;;  %v8680_v49 = vld [vmem:[%s11766_s2 + $0x3f0] ss:$8 sps:$4 sm:$0xff]  }
 0x3cb   : > { %4500 = vmatpush1.bf16.msra.mxu1 %v8656_v11  ;;  %v8685_v11 = vld [vmem:[%s11766_s2 + $0x404] ss:$8 sps:$4 sm:$0xff]  }
 0x3cc   : > { %4501 = vmatprep.subr.bf16.mxu1 %v8661_v0  ;;  %v8683_v0 = vld [vmem:[%s11766_s2 + $0x400] ss:$8 sps:$4 sm:$0xff]  }
 0x3cf   : > { %4502 = vmatpush1.bf16.msra.mxu1 %v8659_v38  ;;  %v8688_v38 = vld [vmem:[%s11766_s2 + $0x414] ss:$8 sps:$4 sm:$0xff]  }
 0x3d0   : > { %4503 = vmatprep.subr.bf16.mxu1 %v8664_v16  ;;  %v8686_v16 = vld [vmem:[%s11766_s2 + $0x410] ss:$8 sps:$4 sm:$0xff]  }
 0x3d3   : > { %4504 = vmatpush1.bf16.msra.mxu1 %v8662_v35  ;;  %v8691_v35 = vld [vmem:[%s11766_s2 + $0x424] ss:$8 sps:$4 sm:$0xff]  }
 0x3d4   : > { %4505 = vmatprep.subr.bf16.mxu1 %v8667_v27  ;;  %v8689_v27 = vld [vmem:[%s11766_s2 + $0x420] ss:$8 sps:$4 sm:$0xff]  }
 0x3d7   : > { %4506 = vmatpush1.bf16.msra.mxu1 %v8665_v60  ;;  %v8697_v60 = vld [vmem:[%s11766_s2 + $0x444] ss:$8 sps:$4 sm:$0xff]  }
 0x3d8   : > { %4507 = vmatprep.subr.bf16.mxu1 %v8670_v31  ;;  %v8695_v31 = vld [vmem:[%s11766_s2 + $0x440] ss:$8 sps:$4 sm:$0xff]  }
 0x3db   : > { %4508 = vmatpush1.bf16.msra.mxu1 %v8668_v26  ;;  %v8703_v26 = vld [vmem:[%s11766_s2 + $0x464] ss:$8 sps:$4 sm:$0xff]  }
 0x3dc   : > { %4509 = vmatprep.subr.bf16.mxu1 %v8673_v24  ;;  %v8701_v24 = vld [vmem:[%s11766_s2 + $0x460] ss:$8 sps:$4 sm:$0xff]  }
 0x3df   : > { %4510 = vmatpush1.bf16.msra.mxu1 %v8671_v46  ;;  %v8704_v46 = vld [vmem:[%s11766_s2 + $0x470] ss:$8 sps:$4 sm:$0xff]  }
 0x3e0   : > { %4511 = vmatprep.subr.bf16.mxu1 %v8676_v42  ;;  %v8709_v42 = vld [vmem:[%s11766_s2 + $0x484] ss:$8 sps:$4 sm:$0xff]  }
 0x3e3   : > { %4512 = vmatpush1.bf16.msra.mxu1 %v8674_v45  ;;  %v8707_v45 = vld [vmem:[%s11766_s2 + $0x480] ss:$8 sps:$4 sm:$0xff]  }
 0x3e4   : > { %4513 = vmatprep.subr.bf16.mxu1 %v8679_v43  ;;  %v8713_v43 = vld [vmem:[%s11766_s2 + $0x4a0] ss:$8 sps:$4 sm:$0xff]  }
 0x3e7   : > { %4514 = vmatpush1.bf16.msra.mxu1 %v8677_v58  ;;  %v8718_v58 = vld [vmem:[%s11766_s2 + $0x4b4] ss:$8 sps:$4 sm:$0xff]  }
 0x3e8   : > { %4515 = vmatprep.subr.bf16.mxu1 %v8682_v7  ;;  %v8716_v7 = vld [vmem:[%s11766_s2 + $0x4b0] ss:$8 sps:$4 sm:$0xff]  }
 0x3eb   : > { %4516 = vmatpush1.bf16.msra.mxu1 %v8680_v49  ;;  %v8721_v49 = vld [vmem:[%s11766_s2 + $0x4c4] ss:$8 sps:$4 sm:$0xff]  }
 0x3ec   : > { %4791 = vmatprep.subr.bf16.mxu1 %v8685_v11  ;;  %v8719_v11 = vld [vmem:[%s11766_s2 + $0x4c0] ss:$8 sps:$4 sm:$0xff]  }
 0x3ee   : > { %7676 = vmatmul.mubr.msk.bf16.vlgmr.msra.gmra.mrb[0].mxu1 %vm9297_vm4, %v10512_v52  ;;  %v8692_v52 = vld [vmem:[%s11766_s2 + $0x430] ss:$8 sps:$4 sm:$0xff]  }
 0x3ef   : > { %7681 = vmatprep.mubr.msk.bf16.mxu1 %vm9297_vm4, %v10682_v2  ;;  %4792 = vmatpush1.bf16.msra.mxu1 %v8683_v0  ;;  %v8694_v2 = vld [vmem:[%s11766_s2 + $0x434] ss:$8 sps:$4 sm:$0xff]  }
 0x3f0   : > { %4793 = vmatprep.subr.bf16.mxu1 %v8688_v38  ;;  %v8724_v0 = vld [vmem:[%s11766_s2 + $0x4d4] ss:$8 sps:$4 sm:$0xff]   ;;  %v8722_v38 = vld [vmem:[%s11766_s2 + $0x4d0] ss:$8 sps:$4 sm:$0xff]  }
 0x3f3   : > { %4794 = vmatpush1.bf16.msra.mxu1 %v8686_v16  ;;  %v8727_v16 = vld [vmem:[%s11766_s2 + $0x4e4] ss:$8 sps:$4 sm:$0xff]  }
 0x3f4   : > { %4795 = vmatprep.subr.bf16.mxu1 %v8691_v35  ;;  %v8725_v35 = vld [vmem:[%s11766_s2 + $0x4e0] ss:$8 sps:$4 sm:$0xff]  }
 0x3f6   : > { %7686 = vmatmul.mubr.msk.bf16.gmra.mrb[4].mxu1 %vm9297_vm4, %v10690_v4  ;;  %v8700_v4 = vld [vmem:[%s11766_s2 + $0x454] ss:$8 sps:$4 sm:$0xff]  }
 0x3f7   : > { %7691 = vmatprep.mubr.msk.bf16.mxu1 %vm9297_vm4, %v10694_v20  ;;  %4796 = vmatpush1.bf16.msra.mxu1 %v8689_v27  ;;  %v8698_v20 = vld [vmem:[%s11766_s2 + $0x450] ss:$8 sps:$4 sm:$0xff]   ;;  %v8730_v27 = vld [vmem:[%s11766_s2 + $0x4f4] ss:$8 sps:$4 sm:$0xff]  }
 0x3f8   : > { %4797 = vmatprep.subr.bf16.mxu1 %v8694_v2  ;;  %v8728_v2 = vld [vmem:[%s11766_s2 + $0x4f0] ss:$8 sps:$4 sm:$0xff]  }
 0x3fb   : > { %4798 = vmatpush1.bf16.msra.mxu1 %v8692_v52  ;;  %v8733_v52 = vld [vmem:[%s11766_s2 + $0x504] ss:$8 sps:$4 sm:$0xff]  }
 0x3fc   : > { %4799 = vmatprep.subr.bf16.mxu1 %v8697_v60  ;;  %v8731_v60 = vld [vmem:[%s11766_s2 + $0x500] ss:$8 sps:$4 sm:$0xff]  }
 0x3fe   : > { %7696 = vmatmul.mubr.msk.bf16.gmra.mrb[8].mxu1 %vm9297_vm4, %v10700_v18  ;;  %v8706_v18 = vld [vmem:[%s11766_s2 + $0x474] ss:$8 sps:$4 sm:$0xff]  }
 0x3ff   : > { %7701 = vmatprep.mubr.msk.bf16.mxu1 %vm9297_vm4, %v10727_v57  ;;  %4800 = vmatpush1.bf16.msra.mxu1 %v8695_v31  ;;  %v11847_v57 = vpack.c.bf16 %v10466_v55, %v10460_v9  ;;  %v8712_v9 = vld [vmem:[%s11766_s2 + $0x494] ss:$8 sps:$4 sm:$0xff]   ;;  %v8710_v55 = vld [vmem:[%s11766_s2 + $0x490] ss:$8 sps:$4 sm:$0xff]  }
 0x400   : > { %4801 = vmatprep.subr.bf16.mxu1 %v8700_v4  ;;  %v8736_v31 = vld [vmem:[%s11766_s2 + $0x514] ss:$8 sps:$4 sm:$0xff]   ;;  %v11848_v4 = vpack.c.bf16 %v10457_v30, %v10455_v62  ;;  %v8737_v62 = vld [vmem:[%s11766_s2 + $0x520] ss:$8 sps:$4 sm:$0xff]  }
 0x401   : > { %v8742_v30 = vld [vmem:[%s11766_s2 + $0x534] ss:$8 sps:$4 sm:$0xff]  }
 0x403   : > { %4802 = vmatpush1.bf16.msra.mxu1 %v8698_v20  ;;  %v11849_v20 = vpack.c.bf16 %v10517_v54, %v10503_v53  ;;  %v11850_v53 = vpack.c.bf16 %v10515_v3, %v10494_v36  ;;  %v11851_v54 = vpack.c.bf16 %v10575_v32, %v10555_v21  ;;  %v8743_v36 = vld [vmem:[%s11766_s2 + $0x540] ss:$8 sps:$4 sm:$0xff]   ;;  %v8748_v3 = vld [vmem:[%s11766_s2 + $0x554] ss:$8 sps:$4 sm:$0xff]   ;;  %v11852_v21 = vpack.c.bf16 %v10564_v56, %v10551_v48 }
 0x404   : > { %4803 = vmatprep.subr.bf16.mxu1 %v8703_v26  ;;  %v8734_v26 = vld [vmem:[%s11766_s2 + $0x510] ss:$8 sps:$4 sm:$0xff]   ;;  %v11853_v32 = vpack.c.bf16 %v10641_v19, %v10621_v10  ;;  %v8749_v48 = vld [vmem:[%s11766_s2 + $0x560] ss:$8 sps:$4 sm:$0xff]   ;;  %v8754_v56 = vld [vmem:[%s11766_s2 + $0x574] ss:$8 sps:$4 sm:$0xff]   ;;  %v11854_v10 = vpack.c.bf16 %v10630_v34, %v10614_v5 }
 0x405   : > { %v8755_v5 = vld [vmem:[%s11766_s2 + $0x580] ss:$8 sps:$4 sm:$0xff]  }
 0x406   : > { %7706 = vmatmul.mubr.msk.bf16.gmra.mrb[12].mxu1 %vm9297_vm4, %v10731_v22  ;;  %v8715_v22 = vld [vmem:[%s11766_s2 + $0x4a4] ss:$8 sps:$4 sm:$0xff]  }
 0x407   : > { %4804 = vmatpush1.bf16.msra.mxu1 %v8701_v24  ;;  %4823 = vmatprep.mubr.bf16.mxu1 %v11847_v57  ;;  %v8739_v24 = vld [vmem:[%s11766_s2 + $0x524] ss:$8 sps:$4 sm:$0xff]  }
 0x408   : > { %4805 = vmatprep.subr.bf16.mxu1 %v8706_v18  ;;  %v8740_v18 = vld [vmem:[%s11766_s2 + $0x530] ss:$8 sps:$4 sm:$0xff]   ;;  %v8745_v57 = vld [vmem:[%s11766_s2 + $0x544] ss:$8 sps:$4 sm:$0xff]  }
 0x40b   : > { %4806 = vmatpush1.bf16.msra.mxu1 %v8704_v46  ;;  %v8746_v46 = vld [vmem:[%s11766_s2 + $0x550] ss:$8 sps:$4 sm:$0xff]  }
 0x40c   : > { %4807 = vmatprep.subr.bf16.mxu1 %v8709_v42  ;;  %v8751_v42 = vld [vmem:[%s11766_s2 + $0x564] ss:$8 sps:$4 sm:$0xff]  }
 0x40f   : > { %4808 = vmatpush1.bf16.msra.mxu1 %v8707_v45  ;;  %v8752_v45 = vld [vmem:[%s11766_s2 + $0x570] ss:$8 sps:$4 sm:$0xff]  }
 0x410   : > { %4809 = vmatprep.subr.bf16.mxu1 %v8712_v9  ;;  %v8757_v9 = vld [vmem:[%s11766_s2 + $0x584] ss:$8 sps:$4 sm:$0xff]  }
 0x413   : > { %4810 = vmatpush1.bf16.msra.mxu1 %v8710_v55  ;;  %v8760_v55 = vld [vmem:[%s11766_s2 + $0x594] ss:$8 sps:$4 sm:$0xff]  }
 0x414   : > { %4811 = vmatprep.subr.bf16.mxu1 %v8715_v22  ;;  %v8763_v22 = vld [vmem:[%s11766_s2 + $0x5a4] ss:$8 sps:$4 sm:$0xff]  }
 0x417   : > { %4812 = vmatpush1.bf16.msra.mxu1 %v8713_v43  ;;  %v8761_v43 = vld [vmem:[%s11766_s2 + $0x5a0] ss:$8 sps:$4 sm:$0xff]  }
 0x418   : > { %4813 = vmatprep.subr.bf16.mxu1 %v8718_v58  ;;  %v8766_v58 = vld [vmem:[%s11766_s2 + $0x5b4] ss:$8 sps:$4 sm:$0xff]  }
 0x41b   : > { %4814 = vmatpush1.bf16.msra.mxu1 %v8716_v7  ;;  %v8764_v7 = vld [vmem:[%s11766_s2 + $0x5b0] ss:$8 sps:$4 sm:$0xff]  }
 0x41c   : > { %4815 = vmatprep.subr.bf16.mxu1 %v8721_v49  ;;  %v8769_v49 = vld [vmem:[%s11766_s2 + $0x5c4] ss:$8 sps:$4 sm:$0xff]  }
 0x41f   : > { %4816 = vmatpush1.bf16.msra.mxu1 %v8719_v11  ;;  %v8767_v11 = vld [vmem:[%s11766_s2 + $0x5c0] ss:$8 sps:$4 sm:$0xff]  }
 0x420   : > { %4817 = vmatprep.subr.bf16.mxu1 %v8724_v0  ;;  %v8772_v0 = vld [vmem:[%s11766_s2 + $0x5d4] ss:$8 sps:$4 sm:$0xff]  }
 0x423   : > { %4818 = vmatpush1.bf16.msra.mxu1 %v8722_v38  ;;  %v8770_v38 = vld [vmem:[%s11766_s2 + $0x5d0] ss:$8 sps:$4 sm:$0xff]  }
 0x424   : > { %4819 = vmatprep.subr.bf16.mxu1 %v8727_v16  ;;  %v8775_v16 = vld [vmem:[%s11766_s2 + $0x5e4] ss:$8 sps:$4 sm:$0xff]  }
 0x427   : > { %4820 = vmatpush1.bf16.msra.mxu1 %v8725_v35  ;;  %v8773_v35 = vld [vmem:[%s11766_s2 + $0x5e0] ss:$8 sps:$4 sm:$0xff]  }
 0x428   : > { %4821 = vmatprep.subr.bf16.mxu1 %v8730_v27  ;;  %v8778_v27 = vld [vmem:[%s11766_s2 + $0x5f4] ss:$8 sps:$4 sm:$0xff]  }
 0x42b   : > { %4822 = vmatpush1.bf16.msra.mxu1 %v8728_v2  ;;  %v8776_v2 = vld [vmem:[%s11766_s2 + $0x5f0] ss:$8 sps:$4 sm:$0xff]  }
 0x42c   : > { %5097 = vmatprep.subr.bf16.mxu1 %v8733_v52  ;;  %v8781_v52 = vld [vmem:[%s11766_s2 + $0x604] ss:$8 sps:$4 sm:$0xff]  }
 0x42e   : > { %4824 = vmatmul.mubr.bf16.vlgmr.msra.gmra.mrb[0].mxu1 %v11848_v4  ;;  %v8782_v4 = vld [vmem:[%s11766_s2 + $0x610] ss:$8 sps:$4 sm:$0xff]  }
 0x42f   : > { %4833 = vmatprep.mubr.bf16.mxu1 %v11849_v20  ;;  %5098 = vmatpush1.bf16.msra.mxu1 %v8731_v60  ;;  %v8779_v60 = vld [vmem:[%s11766_s2 + $0x600] ss:$8 sps:$4 sm:$0xff]   ;;  %v8787_v20 = vld [vmem:[%s11766_s2 + $0x624] ss:$8 sps:$4 sm:$0xff]  }
 0x430   : > { %5099 = vmatprep.subr.bf16.mxu1 %v8736_v31  ;;  %v8784_v31 = vld [vmem:[%s11766_s2 + $0x614] ss:$8 sps:$4 sm:$0xff]  }
 0x433   : > { %5100 = vmatpush1.bf16.msra.mxu1 %v8734_v26  ;;  %v8785_v26 = vld [vmem:[%s11766_s2 + $0x620] ss:$8 sps:$4 sm:$0xff]  }
 0x434   : > { %5101 = vmatprep.subr.bf16.mxu1 %v8739_v24  ;;  %v8793_v24 = vld [vmem:[%s11766_s2 + $0x644] ss:$8 sps:$4 sm:$0xff]  }
 0x436   : > { %4834 = vmatmul.mubr.bf16.gmra.mrb[4].mxu1 %v11850_v53  ;;  %v8797_v53 = vld [vmem:[%s11766_s2 + $0x660] ss:$8 sps:$4 sm:$0xff]  }
 0x437   : > { %4843 = vmatprep.mubr.bf16.mxu1 %v11851_v54  ;;  %5102 = vmatpush1.bf16.msra.mxu1 %v8737_v62  ;;  %v8791_v62 = vld [vmem:[%s11766_s2 + $0x640] ss:$8 sps:$4 sm:$0xff]   ;;  %v8805_v54 = vld [vmem:[%s11766_s2 + $0x684] ss:$8 sps:$4 sm:$0xff]  }
 0x438   : > { %5103 = vmatprep.subr.bf16.mxu1 %v8742_v30  ;;  %v8799_v30 = vld [vmem:[%s11766_s2 + $0x664] ss:$8 sps:$4 sm:$0xff]  }
 0x43b   : > { %5104 = vmatpush1.bf16.msra.mxu1 %v8740_v18  ;;  %v8803_v18 = vld [vmem:[%s11766_s2 + $0x680] ss:$8 sps:$4 sm:$0xff]  }
 0x43c   : > { %5105 = vmatprep.subr.bf16.mxu1 %v8745_v57  ;;  %v8811_v57 = vld [vmem:[%s11766_s2 + $0x6a4] ss:$8 sps:$4 sm:$0xff]  }
 0x43e   : > { %4844 = vmatmul.mubr.bf16.gmra.mrb[8].mxu1 %v11852_v21  ;;  %v8812_v21 = vld [vmem:[%s11766_s2 + $0x6b0] ss:$8 sps:$4 sm:$0xff]  }
 0x43f   : > { %4853 = vmatprep.mubr.bf16.mxu1 %v11853_v32  ;;  %5106 = vmatpush1.bf16.msra.mxu1 %v8743_v36  ;;  %v8809_v36 = vld [vmem:[%s11766_s2 + $0x6a0] ss:$8 sps:$4 sm:$0xff]   ;;  %v8817_v32 = vld [vmem:[%s11766_s2 + $0x6c4] ss:$8 sps:$4 sm:$0xff]  }
 0x440   : > { %5107 = vmatprep.subr.bf16.mxu1 %v8748_v3  ;;  %v8814_v3 = vld [vmem:[%s11766_s2 + $0x6b4] ss:$8 sps:$4 sm:$0xff]  }
 0x443   : > { %5108 = vmatpush1.bf16.msra.mxu1 %v8746_v46  ;;  %v8815_v46 = vld [vmem:[%s11766_s2 + $0x6c0] ss:$8 sps:$4 sm:$0xff]  }
 0x444   : > { %5109 = vmatprep.subr.bf16.mxu1 %v8751_v42  ;;  %v8820_v42 = vld [vmem:[%s11766_s2 + $0x6d4] ss:$8 sps:$4 sm:$0xff]  }
 0x446   : > { %4854 = vmatmul.mubr.bf16.gmra.mrb[12].mxu1 %v11854_v10  ;;  %v8821_v10 = vld [vmem:[%s11766_s2 + $0x6e0] ss:$8 sps:$4 sm:$0xff]  }
 0x447   : > { %5110 = vmatpush1.bf16.msra.mxu1 %v8749_v48  ;;  %7709 = vmatprep.mubr.msk.bf16.mxu1 %vm9474_vm7, %v10743_v25  ;;  %v8758_v25 = vld [vmem:[%s11766_s2 + $0x590] ss:$8 sps:$4 sm:$0xff]  }
 0x448   : > { %5111 = vmatprep.subr.bf16.mxu1 %v8754_v56  ;;  %v8818_v48 = vld [vmem:[%s11766_s2 + $0x6d0] ss:$8 sps:$4 sm:$0xff]   ;;  %v8823_v56 = vld [vmem:[%s11766_s2 + $0x6e4] ss:$8 sps:$4 sm:$0xff]  }
 0x44b   : > { %5112 = vmatpush1.bf16.msra.mxu1 %v8752_v45  ;;  %v8826_v45 = vld [vmem:[%s11766_s2 + $0x6f4] ss:$8 sps:$4 sm:$0xff]  }
 0x44c   : > { %5113 = vmatprep.subr.bf16.mxu1 %v8757_v9  ;;  %v8824_v9 = vld [vmem:[%s11766_s2 + $0x6f0] ss:$8 sps:$4 sm:$0xff]  }
 0x44f   : > { %5114 = vmatpush1.bf16.msra.mxu1 %v8755_v5  ;;  %v8829_v5 = vld [vmem:[%s11766_s2 + $0x704] ss:$8 sps:$4 sm:$0xff]  }
 0x450   : > { %5115 = vmatprep.subr.bf16.mxu1 %v8760_v55  ;;  %v8827_v55 = vld [vmem:[%s11766_s2 + $0x700] ss:$8 sps:$4 sm:$0xff]  }
 0x453   : > { %5116 = vmatpush1.bf16.msra.mxu1 %v8758_v25  ;;  %v8832_v25 = vld [vmem:[%s11766_s2 + $0x714] ss:$8 sps:$4 sm:$0xff]  }
 0x454   : > { %5117 = vmatprep.subr.bf16.mxu1 %v8763_v22  ;;  %v8830_v22 = vld [vmem:[%s11766_s2 + $0x710] ss:$8 sps:$4 sm:$0xff]  }
 0x457   : > { %5118 = vmatpush1.bf16.msra.mxu1 %v8761_v43  ;;  %v8835_v43 = vld [vmem:[%s11766_s2 + $0x724] ss:$8 sps:$4 sm:$0xff]  }
 0x458   : > { %5119 = vmatprep.subr.bf16.mxu1 %v8766_v58  ;;  %v8833_v58 = vld [vmem:[%s11766_s2 + $0x720] ss:$8 sps:$4 sm:$0xff]  }
 0x45b   : > { %5120 = vmatpush1.bf16.msra.mxu1 %v8764_v7  ;;  %v8841_v7 = vld [vmem:[%s11766_s2 + $0x744] ss:$8 sps:$4 sm:$0xff]  }
 0x45c   : > { %5121 = vmatprep.subr.bf16.mxu1 %v8769_v49  ;;  %v8839_v49 = vld [vmem:[%s11766_s2 + $0x740] ss:$8 sps:$4 sm:$0xff]  }
 0x45f   : > { %5122 = vmatpush1.bf16.msra.mxu1 %v8767_v11 }
 0x460   : > { %5123 = vmatprep.subr.bf16.mxu1 %v8772_v0  ;;  %v8910_v0 = vld [vmem:[%s11766_s2 + $0x8b4] ss:$8 sps:$4 sm:$0xff]  }
 0x463   : > { %5124 = vmatpush1.bf16.msra.mxu1 %v8770_v38  ;;  %v8842_v38 = vld [vmem:[%s11766_s2 + $0x750] ss:$8 sps:$4 sm:$0xff]  }
 0x464   : > { %5125 = vmatprep.subr.bf16.mxu1 %v8775_v16  ;;  %v8847_v16 = vld [vmem:[%s11766_s2 + $0x764] ss:$8 sps:$4 sm:$0xff]  }
 0x467   : > { %5126 = vmatpush1.bf16.msra.mxu1 %v8773_v35  ;;  %v8845_v35 = vld [vmem:[%s11766_s2 + $0x760] ss:$8 sps:$4 sm:$0xff]  }
 0x468   : > { %5127 = vmatprep.subr.bf16.mxu1 %v8778_v27  ;;  %v8850_v27 = vld [vmem:[%s11766_s2 + $0x774] ss:$8 sps:$4 sm:$0xff]  }
 0x46b   : > { %5128 = vmatpush1.bf16.msra.mxu1 %v8776_v2  ;;  %v11858_v2 = vld [vmem:[#allocation8_spill] sm:$0xff] }
 0x46c   : > { %5403 = vmatprep.subr.bf16.mxu1 %v8781_v52  ;;  %v8848_v52 = vld [vmem:[%s11766_s2 + $0x770] ss:$8 sps:$4 sm:$0xff]  }
 0x46e   : > { %7712 = vmatmul.mubr.msk.bf16.vlgmr.msra.gmra.mrb[0].mxu1 %vm9474_vm7, %v10619_v33  ;;  %v8790_v33 = vld [vmem:[%s11766_s2 + $0x634] ss:$8 sps:$4 sm:$0xff]  }
 0x46f   : > { %7715 = vmatprep.mubr.msk.bf16.mxu1 %vm9474_vm7, %v10747_v8  ;;  %5404 = vmatpush1.bf16.msra.mxu1 %v8779_v60  ;;  %v8788_v8 = vld [vmem:[%s11766_s2 + $0x630] ss:$8 sps:$4 sm:$0xff]   ;;  %v8853_v60 = vld [vmem:[%s11766_s2 + $0x784] ss:$8 sps:$4 sm:$0xff]  }
 0x470   : > { %5405 = vmatprep.subr.bf16.mxu1 %v8784_v31  ;;  %v8851_v31 = vld [vmem:[%s11766_s2 + $0x780] ss:$8 sps:$4 sm:$0xff]  }
 0x473   : > { %5406 = vmatpush1.bf16.msra.mxu1 %v8782_v4  ;;  %v8856_v4 = vld [vmem:[%s11766_s2 + $0x794] ss:$8 sps:$4 sm:$0xff]  }
 0x474   : > { %5407 = vmatprep.subr.bf16.mxu1 %v8787_v20  ;;  %v8854_v20 = vld [vmem:[%s11766_s2 + $0x790] ss:$8 sps:$4 sm:$0xff]  }
 0x476   : > { %7718 = vmatmul.mubr.msk.bf16.gmra.mrb[4].mxu1 %vm9474_vm7, %v10751_v28  ;;  %v8796_v28 = vld [vmem:[%s11766_s2 + $0x654] ss:$8 sps:$4 sm:$0xff]  }
 0x477   : > { %7721 = vmatprep.mubr.msk.bf16.mxu1 %vm9474_vm7, %v10753_v51  ;;  %5408 = vmatpush1.bf16.msra.mxu1 %v8785_v26  ;;  %v8794_v51 = vld [vmem:[%s11766_s2 + $0x650] ss:$8 sps:$4 sm:$0xff]   ;;  %v8859_v26 = vld [vmem:[%s11766_s2 + $0x7a4] ss:$8 sps:$4 sm:$0xff]  }
 0x478   : > { %5409 = vmatprep.subr.bf16.mxu1 %v8790_v33  ;;  %v8857_v33 = vld [vmem:[%s11766_s2 + $0x7a0] ss:$8 sps:$4 sm:$0xff]  }
 0x47b   : > { %5410 = vmatpush1.bf16.msra.mxu1 %v8788_v8  ;;  %v8862_v8 = vld [vmem:[%s11766_s2 + $0x7b4] ss:$8 sps:$4 sm:$0xff]  }
 0x47c   : > { %5411 = vmatprep.subr.bf16.mxu1 %v8793_v24  ;;  %v8860_v24 = vld [vmem:[%s11766_s2 + $0x7b0] ss:$8 sps:$4 sm:$0xff]  }
 0x47e   : > { %7724 = vmatmul.mubr.msk.bf16.gmra.mrb[8].mxu1 %vm9474_vm7, %v10755_v41  ;;  %v8800_v41 = vld [vmem:[%s11766_s2 + $0x670] ss:$8 sps:$4 sm:$0xff]  }
 0x47f   : > { %7727 = vmatprep.mubr.msk.bf16.mxu1 %vm9474_vm7, %v10759_v15  ;;  %5412 = vmatpush1.bf16.msra.mxu1 %v8791_v62  ;;  %v8802_v15 = vld [vmem:[%s11766_s2 + $0x674] ss:$8 sps:$4 sm:$0xff]   ;;  %v8865_v62 = vld [vmem:[%s11766_s2 + $0x7c4] ss:$8 sps:$4 sm:$0xff]  }
 0x480   : > { %5413 = vmatprep.subr.bf16.mxu1 %v8796_v28  ;;  %v8863_v28 = vld [vmem:[%s11766_s2 + $0x7c0] ss:$8 sps:$4 sm:$0xff]  }
 0x483   : > { %5414 = vmatpush1.bf16.msra.mxu1 %v8794_v51  ;;  %v8868_v51 = vld [vmem:[%s11766_s2 + $0x7d4] ss:$8 sps:$4 sm:$0xff]  }
 0x484   : > { %5415 = vmatprep.subr.bf16.mxu1 %v8799_v30  ;;  %v8866_v30 = vld [vmem:[%s11766_s2 + $0x7d0] ss:$8 sps:$4 sm:$0xff]  }
 0x486   : > { %7730 = vmatmul.mubr.msk.bf16.gmra.mrb[12].mxu1 %vm9474_vm7, %v10770_v39  ;;  %v8808_v39 = vld [vmem:[%s11766_s2 + $0x694] ss:$8 sps:$4 sm:$0xff]  }
 0x487   : > { %5416 = vmatpush1.bf16.msra.mxu1 %v8797_v53  ;;  %7735 = vmatprep.mubr.msk.bf16.mxu1 %vm9297_vm4, %v10547_v50  ;;  %v8806_v50 = vld [vmem:[%s11766_s2 + $0x690] ss:$8 sps:$4 sm:$0xff]   ;;  %v8871_v53 = vld [vmem:[%s11766_s2 + $0x7e4] ss:$8 sps:$4 sm:$0xff]  }
 0x488   : > { %5417 = vmatprep.subr.bf16.mxu1 %v8802_v15  ;;  %v8869_v15 = vld [vmem:[%s11766_s2 + $0x7e0] ss:$8 sps:$4 sm:$0xff]  }
 0x48b   : > { %5418 = vmatpush1.bf16.msra.mxu1 %v8800_v41  ;;  %v8874_v41 = vld [vmem:[%s11766_s2 + $0x7f4] ss:$8 sps:$4 sm:$0xff]  }
 0x48c   : > { %5419 = vmatprep.subr.bf16.mxu1 %v8805_v54  ;;  %v8872_v54 = vld [vmem:[%s11766_s2 + $0x7f0] ss:$8 sps:$4 sm:$0xff]  }
 0x48f   : > { %5420 = vmatpush1.bf16.msra.mxu1 %v8803_v18  ;;  %v8877_v18 = vld [vmem:[%s11766_s2 + $0x804] ss:$8 sps:$4 sm:$0xff]  }
 0x490   : > { %5421 = vmatprep.subr.bf16.mxu1 %v8808_v39  ;;  %v8875_v39 = vld [vmem:[%s11766_s2 + $0x800] ss:$8 sps:$4 sm:$0xff]  }
 0x493   : > { %5422 = vmatpush1.bf16.msra.mxu1 %v8806_v50  ;;  %v8880_v50 = vld [vmem:[%s11766_s2 + $0x814] ss:$8 sps:$4 sm:$0xff]  }
 0x494   : > { %5423 = vmatprep.subr.bf16.mxu1 %v8811_v57  ;;  %v11859_v57 = vld [vmem:[#allocation7_spill] sm:$0xff] }
 0x497   : > { %5424 = vmatpush1.bf16.msra.mxu1 %v8809_v36  ;;  %v11860_v36 = vld [vmem:[#allocation10_spill] sm:$0xff] }
 0x498   : > { %5425 = vmatprep.subr.bf16.mxu1 %v8814_v3  ;;  %v8878_v3 = vld [vmem:[%s11766_s2 + $0x810] ss:$8 sps:$4 sm:$0xff]  }
 0x49b   : > { %5426 = vmatpush1.bf16.msra.mxu1 %v8812_v21  ;;  %v8883_v21 = vld [vmem:[%s11766_s2 + $0x824] ss:$8 sps:$4 sm:$0xff]  }
 0x49c   : > { %5427 = vmatprep.subr.bf16.mxu1 %v8817_v32  ;;  %v8881_v32 = vld [vmem:[%s11766_s2 + $0x820] ss:$8 sps:$4 sm:$0xff]  }
 0x49f   : > { %5428 = vmatpush1.bf16.msra.mxu1 %v8815_v46  ;;  %v8886_v46 = vld [vmem:[%s11766_s2 + $0x834] ss:$8 sps:$4 sm:$0xff]  }
 0x4a0   : > { %5429 = vmatprep.subr.bf16.mxu1 %v8820_v42  ;;  %v11861_v42 = vld [vmem:[#allocation9_spill] sm:$0xff] }
 0x4a3   : > { %5430 = vmatpush1.bf16.msra.mxu1 %v8818_v48  ;;  %v11862_v48 = vld [vmem:[#allocation12_spill] sm:$0xff] }
 0x4a4   : > { %5431 = vmatprep.subr.bf16.mxu1 %v8823_v56  ;;  %v8884_v56 = vld [vmem:[%s11766_s2 + $0x830] ss:$8 sps:$4 sm:$0xff]  }
 0x4a7   : > { %5432 = vmatpush1.bf16.msra.mxu1 %v8821_v10  ;;  %v8889_v10 = vld [vmem:[%s11766_s2 + $0x844] ss:$8 sps:$4 sm:$0xff]  }
 0x4a8   : > { %5433 = vmatprep.subr.bf16.mxu1 %v8826_v45  ;;  %v8887_v45 = vld [vmem:[%s11766_s2 + $0x840] ss:$8 sps:$4 sm:$0xff]  }
 0x4ab   : > { %5434 = vmatpush1.bf16.msra.mxu1 %v8824_v9  ;;  %v8892_v9 = vld [vmem:[%s11766_s2 + $0x854] ss:$8 sps:$4 sm:$0xff]  }
 0x4ac   : > { %5709 = vmatprep.subr.bf16.mxu1 %v8829_v5  ;;  %v5515_v5 = vpack.c.bf16 %v11819_v12, %v10641_v19 }
 0x4ae   : > { %7740 = vmatmul.mubr.msk.bf16.vlgmr.msra.gmra.mrb[0].mxu1 %vm9297_vm4, %v10529_v6  ;;  %v8838_v6 = vld [vmem:[%s11766_s2 + $0x734] ss:$8 sps:$4 sm:$0xff]  }
 0x4af   : > { %7745 = vmatprep.mubr.msk.bf16.mxu1 %vm9297_vm4, %v10587_v13  ;;  %5710 = vmatpush1.bf16.msra.mxu1 %v8827_v55  ;;  %v8836_v13 = vld [vmem:[%s11766_s2 + $0x730] ss:$8 sps:$4 sm:$0xff]   ;;  %v11863_v55 = vld [vmem:[#allocation11_spill] sm:$0xff] }
 0x4b0   : > { %5711 = vmatprep.subr.bf16.mxu1 %v8832_v25  ;;  %v8890_v25 = vld [vmem:[%s11766_s2 + $0x850] ss:$8 sps:$4 sm:$0xff]  }
 0x4b3   : > { %5712 = vmatpush1.bf16.msra.mxu1 %v8830_v22  ;;  %v8895_v22 = vld [vmem:[%s11766_s2 + $0x864] ss:$8 sps:$4 sm:$0xff]  }
 0x4b4   : > { %5713 = vmatprep.subr.bf16.mxu1 %v8835_v43  ;;  %v8893_v43 = vld [vmem:[%s11766_s2 + $0x860] ss:$8 sps:$4 sm:$0xff]  }
 0x4b6   : > { %7750 = vmatmul.mubr.msk.bf16.gmra.mrb[4].mxu1 %vm9297_vm4, %v10599_v63  ;;  %v8844_v63 = vld [vmem:[%s11766_s2 + $0x754] ss:$8 sps:$4 sm:$0xff]  }
 0x4b7   : > { %7755 = vmatprep.mubr.msk.bf16.mxu1 %vm9297_vm4, %v10650_v59  ;;  %5714 = vmatpush1.bf16.msra.mxu1 %v8833_v58  ;;  %v11855_v59 = vrot.slane %v10641_v19, 7  ;;  %v5514_v58 = vpack.c.bf16 %v11819_v12, %v10630_v34 }
 0x4b8   : > { %5715 = vmatprep.subr.bf16.mxu1 %v8838_v6  ;;  %v8898_v6 = vld [vmem:[%s11766_s2 + $0x874] ss:$8 sps:$4 sm:$0xff]  }
 0x4b9   : > { %v7763_v11 = vpack.c.bf16 %v11819_v12, %v11855_v59  ;;  %v8907_v59 = vld [vmem:[%s11766_s2 + $0x8a4] ss:$8 sps:$4 sm:$0xff]  }
 0x4bb   : > { %5716 = vmatpush1.bf16.msra.mxu1 %v8836_v13  ;;  %v8896_v13 = vld [vmem:[%s11766_s2 + $0x870] ss:$8 sps:$4 sm:$0xff]  }
 0x4bc   : > { %5717 = vmatprep.subr.bf16.mxu1 %v8841_v7  ;;  %v8901_v7 = vld [vmem:[%s11766_s2 + $0x884] ss:$8 sps:$4 sm:$0xff]  }
 0x4be   : > { %7760 = vmatmul.mubr.msk.bf16.gmra.mrb[8].mxu1 %vm9297_vm4, %v10654_v14  ;;  %v7767_v14 = vpack.c.bf16 %v11819_v12, %v11857_v44  ;;  %v8916_v44 = vld [vmem:[%s11766_s2 + $0x8d4] ss:$8 sps:$4 sm:$0xff]  }
 0x4bf   : > { %7764 = vmatprep.mubr.msk.bf16.mxu1 %vm10109_vm8, %v7763_v11  ;;  %5718 = vmatpush1.bf16.msra.mxu1 %v8839_v49  ;;  %v8899_v49 = vld [vmem:[%s11766_s2 + $0x880] ss:$8 sps:$4 sm:$0xff]  }
 0x4c0   : > { %5719 = vmatprep.subr.bf16.mxu1 %v8844_v63  ;;  %v8904_v63 = vld [vmem:[%s11766_s2 + $0x894] ss:$8 sps:$4 sm:$0xff]   ;;  %v8905_v11 = vld [vmem:[%s11766_s2 + $0x8a0] ss:$8 sps:$4 sm:$0xff]  }
 0x4c3   : > { %5720 = vmatpush1.bf16.msra.mxu1 %v8842_v38  ;;  %v8908_v38 = vld [vmem:[%s11766_s2 + $0x8b0] ss:$8 sps:$4 sm:$0xff]  }
 0x4c4   : > { %5721 = vmatprep.subr.bf16.mxu1 %v8847_v16  ;;  %v8913_v16 = vld [vmem:[%s11766_s2 + $0x8c4] ss:$8 sps:$4 sm:$0xff]  }
 0x4c6   : > { %7768 = vmatmul.mubr.msk.bf16.gmra.mrb[12].mxu1 %vm10109_vm8, %v7767_v14  ;;  %v8914_v14 = vld [vmem:[%s11766_s2 + $0x8d0] ss:$8 sps:$4 sm:$0xff]  }
 0x4c7   : > { %5722 = vmatpush1.bf16.msra.mxu1 %v8845_v35  ;;  %5741 = vmatprep.mubr.bf16.mxu1 %v11858_v2  ;;  %v8911_v35 = vld [vmem:[%s11766_s2 + $0x8c0] ss:$8 sps:$4 sm:$0xff]  }
 0x4c8   : > { %5723 = vmatprep.subr.bf16.mxu1 %v8850_v27  ;;  %v8919_v27 = vld [vmem:[%s11766_s2 + $0x8e4] ss:$8 sps:$4 sm:$0xff]   ;;  %v8917_v2 = vld [vmem:[%s11766_s2 + $0x8e0] ss:$8 sps:$4 sm:$0xff]  }
 0x4cb   : > { %5724 = vmatpush1.bf16.msra.mxu1 %v8848_v52  ;;  %v8922_v52 = vld [vmem:[%s11766_s2 + $0x8f4] ss:$8 sps:$4 sm:$0xff]  }
 0x4cc   : > { %5725 = vmatprep.subr.bf16.mxu1 %v8853_v60  ;;  %v8920_v60 = vld [vmem:[%s11766_s2 + $0x8f0] ss:$8 sps:$4 sm:$0xff]  }
 0x4cf   : > { %5726 = vmatpush1.bf16.msra.mxu1 %v8851_v31  ;;  %v11864_v31 = vrot.slane %v10641_v19, 1  ;;  %v7411_v19 = vld [vmem:[%s11767_s3 + $0x2] ss:$8 sm:$0x3] }
 0x4d0   : > { %5727 = vmatprep.subr.bf16.mxu1 %v8856_v4 }
 0x4d1   : > { %v7788_v4 = vpack.c.bf16 %v11819_v12, %v11864_v31 }
 0x4d3   : > { %5728 = vmatpush1.bf16.msra.mxu1 %v8854_v20 }
 0x4d4   : > { %5729 = vmatprep.subr.bf16.mxu1 %v8859_v26 }
 0x4d7   : > { %5730 = vmatpush1.bf16.msra.mxu1 %v8857_v33 }
 0x4d8   : > { %5731 = vmatprep.subr.bf16.mxu1 %v8862_v8  ;;  %v6162_v8 = vld [vmem:[%s9021_s18] sm:$0xff] }
 0x4db   : > { %5732 = vmatpush1.bf16.msra.mxu1 %v8860_v24 }
 0x4dc   : > { %5733 = vmatprep.subr.bf16.mxu1 %v8865_v62 }
 0x4df   : > { %5734 = vmatpush1.bf16.msra.mxu1 %v8863_v28 }
 0x4e0   : > { %5735 = vmatprep.subr.bf16.mxu1 %v8868_v51  ;;  %v6163_v51 = vld [vmem:[%s9021_s18 + $0x8] sm:$0xff] }
 0x4e3   : > { %5736 = vmatpush1.bf16.msra.mxu1 %v8866_v30 }
 0x4e4   : > { %5737 = vmatprep.subr.bf16.mxu1 %v8871_v53 }
 0x4e7   : > { %5738 = vmatpush1.bf16.msra.mxu1 %v8869_v15 }
 0x4e8   : > { %5739 = vmatprep.subr.bf16.mxu1 %v8874_v41  ;;  %v6164_v41 = vld [vmem:[%s9021_s18 + $0x10] sm:$0xff] }
 0x4eb   : > { %5740 = vmatpush1.bf16.msra.mxu1 %v8872_v54 }
 0x4ec   : > { %6015 = vmatprep.subr.bf16.mxu1 %v8877_v18 }
 0x4ee   : > { %5742 = vmatmul.mubr.bf16.vlgmr.msra.gmra.mrb[0].mxu1 %v11859_v57 }
 0x4ef   : > { %5751 = vmatprep.mubr.bf16.mxu1 %v11860_v36  ;;  %6016 = vmatpush1.bf16.msra.mxu1 %v8875_v39 }
 0x4f0   : > { %6017 = vmatprep.subr.bf16.mxu1 %v8880_v50  ;;  %v6165_v50 = vld [vmem:[%s9021_s18 + $0x18] sm:$0xff] }
 0x4f3   : > { %6018 = vmatpush1.bf16.msra.mxu1 %v8878_v3 }
 0x4f4   : > { %6019 = vmatprep.subr.bf16.mxu1 %v8883_v21 }
 0x4f6   : > { %5752 = vmatmul.mubr.bf16.gmra.mrb[4].mxu1 %v11861_v42 }
 0x4f7   : > { %5761 = vmatprep.mubr.bf16.mxu1 %v11862_v48  ;;  %6020 = vmatpush1.bf16.msra.mxu1 %v8881_v32 }
 0x4f8   : > { %6021 = vmatprep.subr.bf16.mxu1 %v8886_v46 }
 0x4fb   : > { %6022 = vmatpush1.bf16.msra.mxu1 %v8884_v56 }
 0x4fc   : > { %6023 = vmatprep.subr.bf16.mxu1 %v8889_v10 }
 0x4fe   : > { %5762 = vmatmul.mubr.bf16.gmra.mrb[8].mxu1 %v11863_v55  ;;  %v6166_v55 = vld [vmem:[%s9021_s18 + $0x20] sm:$0xff] }
 0x4ff   : > { %5771 = vmatprep.mubr.bf16.mxu1 %v5515_v5  ;;  %6024 = vmatpush1.bf16.msra.mxu1 %v8887_v45 }
 0x500   : > { %6025 = vmatprep.subr.bf16.mxu1 %v8892_v9 }
 0x503   : > { %6026 = vmatpush1.bf16.msra.mxu1 %v8890_v25 }
 0x504   : > { %6027 = vmatprep.subr.bf16.mxu1 %v8895_v22 }
 0x506   : > { %5772 = vmatmul.mubr.bf16.gmra.mrb[12].mxu1 %v5514_v58 }
 0x507   : > { %6028 = vmatpush1.bf16.msra.mxu1 %v8893_v43  ;;  %7771 = vmatprep.mubr.msk.bf16.mxu1 %vm9474_vm7, %v10605_v37  ;;  %v8902_v37 = vld [vmem:[%s11766_s2 + $0x890] ss:$8 sps:$4 sm:$0xff]  }
 0x508   : > { %6029 = vmatprep.subr.bf16.mxu1 %v8898_v6  ;;  %v6167_v6 = vld [vmem:[%s9021_s18 + $0x28] sm:$0xff] }
 0x50b   : > { %6030 = vmatpush1.bf16.msra.mxu1 %v8896_v13 }
 0x50c   : > { %6031 = vmatprep.subr.bf16.mxu1 %v8901_v7 }
 0x50f   : > { %6032 = vmatpush1.bf16.msra.mxu1 %v8899_v49 }
 0x510   : > { %6033 = vmatprep.subr.bf16.mxu1 %v8904_v63 }
 0x513   : > { %6034 = vmatpush1.bf16.msra.mxu1 %v8902_v37  ;;  %v6168_v37 = vld [vmem:[%s9021_s18 + $0x30] sm:$0xff] }
 0x514   : > { %6035 = vmatprep.subr.bf16.mxu1 %v8907_v59 }
 0x517   : > { %6036 = vmatpush1.bf16.msra.mxu1 %v8905_v11 }
 0x518   : > { %6037 = vmatprep.subr.bf16.mxu1 %v8910_v0 }
 0x51b   : > { %6038 = vmatpush1.bf16.msra.mxu1 %v8908_v38  ;;  %v6169_v38 = vld [vmem:[%s9021_s18 + $0x38] sm:$0xff] }
 0x51c   : > { %6039 = vmatprep.subr.bf16.mxu1 %v8913_v16 }
 0x51f   : > { %6040 = vmatpush1.bf16.msra.mxu1 %v8911_v35 }
 0x520   : > { %6041 = vmatprep.subr.bf16.mxu1 %v8916_v44 }
 0x523   : > { %6042 = vmatpush1.bf16.msra.mxu1 %v8914_v14 }
 0x524   : > { %6043 = vmatprep.subr.bf16.mxu1 %v8919_v27 }
 0x527   : > { %6044 = vmatpush1.bf16.msra.mxu1 %v8917_v2 }
 0x528   : > { %6045 = vmatprep.subr.bf16.mxu1 %v8922_v52 }
 0x52b   : > { %6046 = vmatpush1.bf16.msra.mxu1 %v8920_v60 }
 0x52e   : > { %7774 = vmatmul.mubr.msk.bf16.vlgmr.msra.gmra.mrb[0].mxu1 %vm9474_vm7, %v10645_v47 }
 0x52f   : > { %7777 = vmatprep.mubr.msk.bf16.mxu1 %vm9474_vm7, %v10661_v40  ;;  %v11866_v40 = vld [vmem:[#allocation5_spill] sm:$0xff] }
 0x536   : > { %7780 = vmatmul.mubr.msk.bf16.gmra.mrb[4].mxu1 %vm9474_vm7, %v10669_v61  ;;  %v7791_v61 = vpack.c.bf16 %v11819_v12, %v3333_v17  ;;  %v11685_v12 = vrot.slane %v7412_v29, %v11866_v40 }
 0x537   : > { %7783 = vmatprep.mubr.msk.bf16.mxu1 %vm9474_vm7, %v10684_v23  ;;  %v11679_v23 = vrot.slane %v7411_v19, %v11866_v40 }
 0x53e   : > { %7786 = vmatmul.mubr.msk.bf16.gmra.mrb[8].mxu1 %vm9474_vm7, %v10703_v1  ;;  %v11867_v1 = vld [vmem:[#allocation6_spill] sm:$0xff] }
 0x53f   : > { %7789 = vmatprep.mubr.msk.bf16.mxu1 %vm10393_vm9, %v7788_v4  ;;  %v11682_v34 = vrot.slane %v7411_v19, %v11867_v1  ;;  %v11688_v20 = vrot.slane %v7412_v29, %v11867_v1  ;;  %v6170_v29 = vld [vmem:[%s9021_s18 + $0x40] sm:$0xff] }
 0x546   : > { %7792 = vmatmul.mubr.msk.bf16.gmra.mrb[12].mxu1 %vm10393_vm9, %v7791_v61 }
 0x601   : > { %v6049_v17 = vpop.f32.mrb[0].mxu1 }
 0x602   : > { %v6117_v26 = vmul.f32 %v11679_v23, %v6049_v17  ;;  %v6051_v33 = vpop.f32.mrb[1].mxu1 }
 0x603   : > { %v6118_v24 = vmul.f32 %v11682_v34, %v6051_v33  ;;  %v6053_v62 = vpop.f32.mrb[2].mxu1  ;;  %v6171_v33 = vld [vmem:[%s9021_s18 + $0x48] sm:$0xff] }
 0x604   : > { %v6146_v28 = vadd.f32 %v11685_v12, %v6117_v26  ;;  %v6119_v30 = vmul.f32 %v11679_v23, %v6053_v62  ;;  %v6055_v53 = vpop.f32.mrb[3].mxu1 }
 0x605   : > { %v6147_v15 = vadd.f32 %v11688_v20, %v6118_v24  ;;  %v6120_v54 = vmul.f32 %v11682_v34, %v6055_v53 }
 0x606   : > { %v6178_v18 = vadd.f32 %v6162_v8, %v6146_v28  ;;  %v6148_v39 = vadd.f32 %v11685_v12, %v6119_v30 }
 0x607   : > { %v6179_v57 = vadd.f32 %v6163_v51, %v6147_v15  ;;  %v6149_v36 = vadd.f32 %v11688_v20, %v6120_v54  ;;  %v6172_v51 = vld [vmem:[%s9021_s18 + $0x50] sm:$0xff] }
 0x608   : > { %vm6194_vm3 = vcmp.gt.f32.partialorder %v6178_v18, 0.0  ;;  %v6210_v3 = vmul.f32 0.01, %v6178_v18  ;;  %v6180_v21 = vadd.f32 %v6164_v41, %v6148_v39  ;;  %v6173_v41 = vld [vmem:[%s9021_s18 + $0x58] sm:$0xff] }
 0x609   : > { %vm6195_vm4 = vcmp.gt.f32.partialorder %v6179_v57, 0.0  ;;  %v6211_v32 = vmul.f32 0.01, %v6179_v57  ;;  %v6181_v46 = vadd.f32 %v6165_v50, %v6149_v36  ;;  %v6059_v42 = vpop.f32.mrb[4].mxu1 }
 0x60a   : > { %v6226_v48 = vsel %vm6194_vm3, %v6178_v18, %v6210_v3  ;;  %vm6196_vm6 = vcmp.gt.f32.partialorder %v6180_v21, 0.0  ;;  %v6212_v56 = vmul.f32 0.01, %v6180_v21  ;;  %v6121_v10 = vmul.f32 %v11679_v23, %v6059_v42  ;;  %v6061_v45 = vpop.f32.mrb[5].mxu1 }
 0x60b   : > { %6242 = vst [vmem:[%s11707_s12] sm:$0xff] %v6226_v48  ;;  %v6227_v9 = vsel %vm6195_vm4, %v6179_v57, %v6211_v32  ;;  %vm6197_vm7 = vcmp.gt.f32.partialorder %v6181_v46, 0.0  ;;  %v6213_v5 = vmul.f32 0.01, %v6181_v46  ;;  %v6122_v25 = vmul.f32 %v11682_v34, %v6061_v45  ;;  %v6063_v22 = vpop.f32.mrb[6].mxu1 }
 0x60c   : > { %6243 = vst [vmem:[%s11707_s12 + $0x8] sm:$0xff] %v6227_v9  ;;  %v6228_v43 = vsel %vm6196_vm6, %v6180_v21, %v6212_v56  ;;  %v6150_v58 = vadd.f32 %v11685_v12, %v6121_v10  ;;  %v6123_v13 = vmul.f32 %v11679_v23, %v6063_v22  ;;  %v6065_v7 = vpop.f32.mrb[7].mxu1  ;;  %v6174_v10 = vld [vmem:[%s9021_s18 + $0x60] sm:$0xff] }
 0x60d   : > { %6244 = vst [vmem:[%s11707_s12 + $0x10] sm:$0xff] %v6228_v43  ;;  %v6229_v49 = vsel %vm6197_vm7, %v6181_v46, %v6213_v5  ;;  %v6151_v63 = vadd.f32 %v11688_v20, %v6122_v25  ;;  %v6124_v59 = vmul.f32 %v11682_v34, %v6065_v7  ;;  %v6175_v25 = vld [vmem:[%s9021_s18 + $0x68] sm:$0xff] }
 0x60e   : > { %6245 = vst [vmem:[%s11707_s12 + $0x18] sm:$0xff] %v6229_v49  ;;  %v6182_v11 = vadd.f32 %v6166_v55, %v6150_v58  ;;  %v6152_v0 = vadd.f32 %v11685_v12, %v6123_v13  ;;  %v6176_v13 = vld [vmem:[%s9021_s18 + $0x70] sm:$0xff] }
 0x60f   : > { %v6183_v16 = vadd.f32 %v6167_v6, %v6151_v63  ;;  %v6153_v35 = vadd.f32 %v11688_v20, %v6124_v59 }
 0x610   : > { %vm6198_vm8 = vcmp.gt.f32.partialorder %v6182_v11, 0.0  ;;  %v6214_v44 = vmul.f32 0.01, %v6182_v11  ;;  %v6184_v14 = vadd.f32 %v6168_v37, %v6152_v0  ;;  %v6177_v37 = vld [vmem:[%s9021_s18 + $0x78] sm:$0xff] }
 0x611   : > { %vm6199_vm9 = vcmp.gt.f32.partialorder %v6183_v16, 0.0  ;;  %v6215_v27 = vmul.f32 0.01, %v6183_v16  ;;  %v6185_v2 = vadd.f32 %v6169_v38, %v6153_v35  ;;  %v6069_v52 = vpop.f32.mrb[8].mxu1 }
 0x612   : > { %v6230_v60 = vsel %vm6198_vm8, %v6182_v11, %v6214_v44  ;;  %vm6200_vm0 = vcmp.gt.f32.partialorder %v6184_v14, 0.0  ;;  %v6216_v31 = vmul.f32 0.01, %v6184_v14  ;;  %v6125_v4 = vmul.f32 %v11679_v23, %v6069_v52  ;;  %v6071_v47 = vpop.f32.mrb[9].mxu1 }
 0x613   : > { %6246 = vst [vmem:[%s11707_s12 + $0x20] sm:$0xff] %v6230_v60  ;;  %v6231_v61 = vsel %vm6199_vm9, %v6183_v16, %v6215_v27  ;;  %vm6201_vm1 = vcmp.gt.f32.partialorder %v6185_v2, 0.0  ;;  %v6217_v19 = vmul.f32 0.01, %v6185_v2  ;;  %v6126_v40 = vmul.f32 %v11682_v34, %v6071_v47  ;;  %v6073_v1 = vpop.f32.mrb[10].mxu1 }
 0x614   : > { %6247 = vst [vmem:[%s11707_s12 + $0x28] sm:$0xff] %v6231_v61  ;;  %v6232_v17 = vsel %vm6200_vm0, %v6184_v14, %v6216_v31  ;;  %v6154_v26 = vadd.f32 %v11685_v12, %v6125_v4  ;;  %v6127_v8 = vmul.f32 %v11679_v23, %v6073_v1  ;;  %v6075_v24 = vpop.f32.mrb[11].mxu1 }
 0x615   : > { %6248 = vst [vmem:[%s11707_s12 + $0x30] sm:$0xff] %v6232_v17  ;;  %v6233_v62 = vsel %vm6201_vm1, %v6185_v2, %v6217_v19  ;;  %v6155_v28 = vadd.f32 %v11688_v20, %v6126_v40  ;;  %v6128_v30 = vmul.f32 %v11682_v34, %v6075_v24 }
 0x616   : > { %6249 = vst [vmem:[%s11707_s12 + $0x38] sm:$0xff] %v6233_v62  ;;  %v6186_v53 = vadd.f32 %v6170_v29, %v6154_v26  ;;  %v6156_v15 = vadd.f32 %v11685_v12, %v6127_v8 }
 0x617   : > { %v6187_v54 = vadd.f32 %v6171_v33, %v6155_v28  ;;  %v6157_v18 = vadd.f32 %v11688_v20, %v6128_v30 }
 0x618   : > { %vm6202_vm2 = vcmp.gt.f32.partialorder %v6186_v53, 0.0  ;;  %v6218_v39 = vmul.f32 0.01, %v6186_v53  ;;  %v6188_v50 = vadd.f32 %v6172_v51, %v6156_v15 }
 0x619   : > { %vm6203_vm5 = vcmp.gt.f32.partialorder %v6187_v54, 0.0  ;;  %v6219_v57 = vmul.f32 0.01, %v6187_v54  ;;  %v6189_v36 = vadd.f32 %v6173_v41, %v6157_v18  ;;  %v6079_v3 = vpop.f32.mrb[12].mxu1 }
 0x61a   : > { %v6234_v21 = vsel %vm6202_vm2, %v6186_v53, %v6218_v39  ;;  %vm6204_vm10 = vcmp.gt.f32.partialorder %v6188_v50, 0.0  ;;  %v6220_v32 = vmul.f32 0.01, %v6188_v50  ;;  %v6129_v46 = vmul.f32 %v11679_v23, %v6079_v3  ;;  %v6081_v42 = vpop.f32.mrb[13].mxu1 }
 0x61b   : > { %6250 = vst [vmem:[%s11707_s12 + $0x40] sm:$0xff] %v6234_v21  ;;  %v6235_v48 = vsel %vm6203_vm5, %v6187_v54, %v6219_v57  ;;  %vm6205_vm11 = vcmp.gt.f32.partialorder %v6189_v36, 0.0  ;;  %v6221_v56 = vmul.f32 0.01, %v6189_v36  ;;  %v6130_v45 = vmul.f32 %v11682_v34, %v6081_v42  ;;  %v6083_v9 = vpop.f32.mrb[14].mxu1 }
 0x61c   : > { %6251 = vst [vmem:[%s11707_s12 + $0x48] sm:$0xff] %v6235_v48  ;;  %v6236_v5 = vsel %vm6204_vm10, %v6188_v50, %v6220_v32  ;;  %v6158_v55 = vadd.f32 %v11685_v12, %v6129_v46  ;;  %v6131_v22 = vmul.f32 %v11679_v23, %v6083_v9  ;;  %v6085_v43 = vpop.f32.mrb[15].mxu1 }
 0x61d   : > { %6252 = vst [vmem:[%s11707_s12 + $0x50] sm:$0xff] %v6236_v5  ;;  %v6237_v58 = vsel %vm6205_vm11, %v6189_v36, %v6221_v56  ;;  %v6159_v6 = vadd.f32 %v11688_v20, %v6130_v45  ;;  %v6132_v7 = vmul.f32 %v11682_v34, %v6085_v43 }
 0x61e   : > { %6253 = vst [vmem:[%s11707_s12 + $0x58] sm:$0xff] %v6237_v58  ;;  %v6190_v49 = vadd.f32 %v6174_v10, %v6158_v55  ;;  %v6160_v63 = vadd.f32 %v11685_v12, %v6131_v22 }
 0x61f   : > { %v6191_v59 = vadd.f32 %v6175_v25, %v6159_v6  ;;  %v6161_v11 = vadd.f32 %v11688_v20, %v6132_v7 }
 0x620   : > { %vm6206_vm12 = vcmp.gt.f32.partialorder %v6190_v49, 0.0  ;;  %v6222_v23 = vmul.f32 0.01, %v6190_v49  ;;  %v6192_v0 = vadd.f32 %v6176_v13, %v6160_v63 }
 0x621   : > { %vm6207_vm13 = vcmp.gt.f32.partialorder %v6191_v59, 0.0  ;;  %v6223_v38 = vmul.f32 0.01, %v6191_v59  ;;  %v6193_v16 = vadd.f32 %v6177_v37, %v6161_v11 }
 0x622   : > { %v6238_v35 = vsel %vm6206_vm12, %v6190_v49, %v6222_v23  ;;  %vm6208_vm14 = vcmp.gt.f32.partialorder %v6192_v0, 0.0  ;;  %v6224_v34 = vmul.f32 0.01, %v6192_v0 }
 0x623   : > { %6254 = vst [vmem:[%s11707_s12 + $0x60] sm:$0xff] %v6238_v35  ;;  %v6239_v44 = vsel %vm6207_vm13, %v6191_v59, %v6223_v38  ;;  %vm6209_vm15 = vcmp.gt.f32.partialorder %v6193_v16, 0.0  ;;  %v6225_v12 = vmul.f32 0.01, %v6193_v16 }
 0x624   : > { %6255 = vst [vmem:[%s11707_s12 + $0x68] sm:$0xff] %v6239_v44  ;;  %v6240_v14 = vsel %vm6208_vm14, %v6192_v0, %v6224_v34 }
 0x625   : > { %6256 = vst [vmem:[%s11707_s12 + $0x70] sm:$0xff] %v6240_v14  ;;  %v6241_v27 = vsel %vm6209_vm15, %v6193_v16, %v6225_v12 }
 0x626   : > { %6257 = vst [vmem:[%s11707_s12 + $0x78] sm:$0xff] %v6241_v27 }
 0x627 PF: > { %s14_s15 = sadd.s32 1, %s8943_s15  }
 0x628   : > { %p11_p4 = scmp.ge.s32.totalorder %s14_s15, 4  }
 0x62a   :  { %13 = sbr.rel (!%p11_p4) target bundleno = 1 (0x1), region = 94 }

</bundles_post_ra>
